<compile_context>
chip_gen: v7x
topology: tpu7x:2x2x1
jax: 0.10.0
libtpu: 0.0.40
codegen_flags: <defaults>
</compile_context>

<pallas_src>
import jax
import jax.numpy as jnp
import numpy as np
from jax import lax
from jax.experimental import pallas as pl
from jax.experimental.pallas import tpu as pltpu

N_LAYERS = 5
EMB_DIM = 300


def _round_up(x, m):
    return (x + m - 1) // m * m


def rnn_forward_kernel(ids_ref, tbl_ref, wih0_ref, wihl_ref, whh_ref, bias_ref,
                       wfc_ref, bfc_ref, out_ref, xproj_ref, seq_ref):
    """One batch block per grid step.

    ids_ref  : (T, Bb, 1) int32   time-major token ids for this batch block
    tbl_ref  : (Vp, Ep)   f32     zero-padded embedding table (VMEM resident)
    wih0_ref : (Ep, H)    f32     layer-0 input->hidden weight (pre-transposed)
    wihl_ref : (L-1,H,H)  f32     layers 1..L-1 input->hidden weights
    whh_ref  : (L, H, H)  f32     hidden->hidden weights
    bias_ref : (L, 1, H)  f32     folded biases (b_ih + b_hh)
    wfc_ref  : (H, Op)    f32     fc weight (pre-transposed, lane-padded)
    bfc_ref  : (1, Op)    f32     fc bias (pad lanes = -1e30)
    out_ref  : (Bb, Op)   f32     softmax probabilities (lane-dense store)
    xproj_ref: (T*Bb, H)  f32     scratch: current layer's batched input projection
    seq_ref  : (T*Bb, H)  f32     scratch: current layer's output sequence
    """
    T, Bb, _ = ids_ref.shape
    Vp = tbl_ref.shape[0]
    H = whh_ref.shape[-1]
    L = whh_ref.shape[0]

    # ---- layer 0: fused embed+project table; row v = emb[v] @ W_ih0 + bias0 ----
    tbl_proj = (jnp.dot(tbl_ref[...], wih0_ref[...],
                        preferred_element_type=jnp.float32) + bias_ref[0])   # (Vp,H)

    # Whole-sequence layer-0 input projection via one-hot row pick (MXU gather).
    lane_iota = lax.broadcasted_iota(jnp.int32, (Bb, Vp), 1)   # hoisted (no re-broadcast)
    for t in range(T):                                         # independent, no serial chain
        onehot = (ids_ref[t] == lane_iota).astype(jnp.float32)              # (Bb,Vp)
        xproj_ref[pl.ds(t * Bb, Bb), :] = jnp.dot(
            onehot, tbl_proj, preferred_element_type=jnp.float32)           # (Bb,H)

    def recurrence(layer):
        """ReLU RNN time scan for one layer; xproj_ref already holds x_t@W_ih + bias."""
        whh = whh_ref[layer]                      # (H,H), hoisted out of the t loop
        h = jnp.zeros((Bb, H), jnp.float32)
        for t in range(T):                        # TODO(synk): lax.fori_loop if T grows
            proj_t = xproj_ref[pl.ds(t * Bb, Bb), :]
            h = jnp.maximum(
                proj_t + jnp.dot(h, whh, preferred_element_type=jnp.float32), 0.0)
            seq_ref[pl.ds(t * Bb, Bb), :] = h
        return h

    h = recurrence(0)
    for l in range(1, L):
        # One whole-sequence input projection per layer (bias folded in).
        xproj_ref[...] = (jnp.dot(seq_ref[...], wihl_ref[l - 1],
                                  preferred_element_type=jnp.float32) + bias_ref[l])
        h = recurrence(l)

    # ---- fc on last timestep of last layer + softmax over (padded) class dim ----
    logits = jnp.dot(h, wfc_ref[...], preferred_element_type=jnp.float32) + bfc_ref[...]
    m = jnp.max(logits, axis=1, keepdims=True)
    e = jnp.exp(logits - m)                       # pad lanes: exp(-1e30 - m) == 0.0
    # Exact reciprocal keeps the tight correctness check; pl.reciprocal(..., approx=True)
    # would move the divide to the EUP slot at ~1e-3-level tolerance.
    inv = pl.reciprocal(jnp.sum(e, axis=1, keepdims=True), approx=False)
    out_ref[...] = e * inv


def my_rnn_forward(x, params):
    """x: (B, T) int32 token ids. Returns softmax probs (B, O) float32."""
    B, T = x.shape
    V, E = params["emb"].shape
    H = params["whh"].shape[-1]
    O = params["wfc"].shape[-1]
    L = params["whh"].shape[0]

    # Padded sizes (zero / -1e30 padding is mathematically exact).
    Vp = _round_up(V, 128)   # lane-dense one-hot.  TODO(synk): for large vocab switch to
    #                          scalar-prefetch + DMA row gather instead of one-hot matmul.
    Ep = _round_up(E, 8)     # 300 -> 304 contraction dim
    Op = _round_up(O, 128)   # lane-dense output store

    b_blk = min(B, 64)       # batch tile (re-derive against VMEM for real B/T/H; v7x=64MiB)
    Bp = _round_up(B, b_blk)

    f32 = jnp.float32
    tbl_p  = jnp.zeros((Vp, Ep), f32).at[:V, :E].set(params["emb"].astype(f32))
    wih0_p = jnp.zeros((Ep, H), f32).at[:E, :].set(params["wih0"])
    wfc_p  = jnp.zeros((H, Op), f32).at[:, :O].set(params["wfc"])
    bfc_p  = jnp.full((1, Op), -1e30, f32).at[:, :O].set(params["bfc"])
    bias   = params["bih"] + params["bhh"]                       # (L,1,H) folded bias

    # Tiny int32 glue: (B,T) -> (T,B,1) time-major ids (the big f32 transpose is gone).
    ids_tm = jnp.transpose(x.astype(jnp.int32))[:, :, None]
    ids_tm = jnp.pad(ids_tm, ((0, 0), (0, Bp - B), (0, 0)))

    out = pl.pallas_call(
        rnn_forward_kernel,
        out_shape=jax.ShapeDtypeStruct((Bp, Op), f32),
        grid=(Bp // b_blk,),
        in_specs=[
            pl.BlockSpec((T, b_blk, 1), lambda i: (0, i, 0)),    # token ids (batch-tiled)
            pl.BlockSpec((Vp, Ep),      lambda i: (0, 0)),       # embedding table
            pl.BlockSpec((Ep, H),       lambda i: (0, 0)),       # W_ih layer 0
            pl.BlockSpec((L - 1, H, H), lambda i: (0, 0, 0)),    # W_ih layers 1..L-1
            pl.BlockSpec((L, H, H),     lambda i: (0, 0, 0)),    # W_hh
            pl.BlockSpec((L, 1, H),     lambda i: (0, 0, 0)),    # folded biases
            pl.BlockSpec((H, Op),       lambda i: (0, 0)),       # fc weight
            pl.BlockSpec((1, Op),       lambda i: (0, 0)),       # fc bias
        ],
        out_specs=pl.BlockSpec((b_blk, Op), lambda i: (i, 0)),
        scratch_shapes=[
            pltpu.VMEM((T * b_blk, H), f32),   # batched input projection
            pltpu.VMEM((T * b_blk, H), f32),   # layer output sequence
        ],
        compiler_params=pltpu.CompilerParams(
            dimension_semantics=("parallel",),          # batch blocks are independent
            vmem_limit_bytes=32 * 1024 * 1024),
    )(ids_tm, tbl_p, wih0_p, params["wihl"], params["whh"], bias, wfc_p, bfc_p)
    return out[:B, :O]


def my_rnn_forward_ref(x, params):
    """Pure-JAX reference matching torch.nn.RNN(relu, num_layers=5) semantics."""
    emb = jnp.take(params["emb"], x, axis=0).astype(jnp.float32)   # (B, T, E)
    B, T, _ = emb.shape
    H = params["whh"].shape[-1]
    seq = emb
    for l in range(N_LAYERS):
        w_ih = params["wih0"] if l == 0 else params["wihl"][l - 1]
        h = jnp.zeros((B, H), jnp.float32)
        outs = []
        for t in range(T):
            h = jnp.maximum(
                seq[:, t, :] @ w_ih + params["bih"][l]
                + h @ params["whh"][l] + params["bhh"][l], 0.0)
            outs.append(h)
        seq = jnp.stack(outs, axis=1)
    logits = seq[:, -1, :] @ params["wfc"] + params["bfc"]
    return jax.nn.softmax(logits, axis=1)


def init_params(key, vocab_size, hidden_size, output_size):
    ks = jax.random.split(key, 8)
    s = 1.0 / np.sqrt(hidden_size)
    return {
        "emb":  jax.random.normal(ks[0], (vocab_size, EMB_DIM), jnp.float32) * 0.1,
        "wih0": jax.random.uniform(ks[1], (EMB_DIM, hidden_size), jnp.float32, -s, s),
        "wihl": jax.random.uniform(ks[2], (N_LAYERS - 1, hidden_size, hidden_size),
                                   jnp.float32, -s, s),
        "whh":  jax.random.uniform(ks[3], (N_LAYERS, hidden_size, hidden_size),
                                   jnp.float32, -s, s),
        "bih":  jax.random.uniform(ks[4], (N_LAYERS, 1, hidden_size), jnp.float32, -s, s),
        "bhh":  jax.random.uniform(ks[5], (N_LAYERS, 1, hidden_size), jnp.float32, -s, s),
        "wfc":  jax.random.uniform(ks[6], (hidden_size, output_size), jnp.float32, -s, s),
        "bfc":  jax.random.uniform(ks[7], (1, output_size), jnp.float32, -s, s),
    }


if __name__ == "__main__":
    B, T = 2, 8
    HIDDEN, OUTPUT, VOCAB = 32, 10, 50

    key = jax.random.PRNGKey(0)
    k_param, k_x = jax.random.split(key)
    params = init_params(k_param, VOCAB, HIDDEN, OUTPUT)
    x = jax.random.randint(k_x, (B, T), 0, VOCAB, dtype=jnp.int32)

    out = jax.block_until_ready(my_rnn_forward(x, params))

    ref = jax.block_until_ready(my_rnn_forward_ref(x, params))
    np.testing.assert_allclose(np.asarray(out), np.asarray(ref), rtol=1e-4, atol=1e-5)
    assert out.shape == (B, OUTPUT)
    np.testing.assert_allclose(np.asarray(out).sum(axis=1), np.ones(B), rtol=1e-5, atol=1e-5)

    print("KERNEL_OK")
</pallas_src>

<mosaic_0001>
module attributes {stable_mosaic.version = 11 : i64} {
  func.func @rnn_forward_kernel(%arg0: i32, %arg1: memref<8x2x1xi32, #tpu.memory_space<vmem>>, %arg2: memref<128x304xf32, #tpu.memory_space<vmem>>, %arg3: memref<304x32xf32, #tpu.memory_space<vmem>>, %arg4: memref<4x32x32xf32, #tpu.memory_space<vmem>>, %arg5: memref<5x32x32xf32, #tpu.memory_space<vmem>>, %arg6: memref<5x1x32xf32, #tpu.memory_space<vmem>>, %arg7: memref<32x128xf32, #tpu.memory_space<vmem>>, %arg8: memref<1x128xf32, #tpu.memory_space<vmem>>, %arg9: memref<2x128xf32, #tpu.memory_space<vmem>>, %arg10: memref<16x32xf32, #tpu.memory_space<vmem>>, %arg11: memref<16x32xf32, #tpu.memory_space<vmem>>) attributes {dimension_semantics = [#tpu.dimension_semantics<parallel>], iteration_bounds = array<i64: 1>, scalar_prefetch = 0 : i64, scratch_operands = 2 : i64, tpu.core_type = #tpu.core_type<tc>, window_params = [{transform_indices = @transform_0, window_bounds = array<i64: 8, 2, 1>}, {pipeline_mode = #tpu.pipeline_mode<synchronous>, transform_indices = @transform_1, window_bounds = array<i64: 128, 304>}, {pipeline_mode = #tpu.pipeline_mode<synchronous>, transform_indices = @transform_2, window_bounds = array<i64: 304, 32>}, {pipeline_mode = #tpu.pipeline_mode<synchronous>, transform_indices = @transform_3, window_bounds = array<i64: 4, 32, 32>}, {pipeline_mode = #tpu.pipeline_mode<synchronous>, transform_indices = @transform_4, window_bounds = array<i64: 5, 32, 32>}, {pipeline_mode = #tpu.pipeline_mode<synchronous>, transform_indices = @transform_5, window_bounds = array<i64: 5, 1, 32>}, {pipeline_mode = #tpu.pipeline_mode<synchronous>, transform_indices = @transform_6, window_bounds = array<i64: 32, 128>}, {pipeline_mode = #tpu.pipeline_mode<synchronous>, transform_indices = @transform_7, window_bounds = array<i64: 1, 128>}, {transform_indices = @transform_8, window_bounds = array<i64: 2, 128>}]} {
    %c0 = arith.constant 0 : index
    %c0_0 = arith.constant 0 : index
    %0 = vector.load %arg2[%c0, %c0_0] : memref<128x304xf32, #tpu.memory_space<vmem>>, vector<128x304xf32>
    %c0_1 = arith.constant 0 : index
    %c0_2 = arith.constant 0 : index
    %1 = vector.load %arg3[%c0_1, %c0_2] : memref<304x32xf32, #tpu.memory_space<vmem>>, vector<304x32xf32>
    %cst = arith.constant dense<0.000000e+00> : vector<128x32xf32>
    %2 = tpu.matmul %0, %1, %cst {dimension_numbers = #tpu.dot_dimension_numbers<[1], [0], [0], [1], [0, 0, 1, 1], [], []>} : vector<128x304xf32>, vector<304x32xf32>, vector<128x32xf32> -> vector<128x32xf32>
    %c0_3 = arith.constant 0 : index
    %c0_4 = arith.constant 0 : index
    %c0_5 = arith.constant 0 : index
    %3 = vector.load %arg6[%c0_3, %c0_4, %c0_5] : memref<5x1x32xf32, #tpu.memory_space<vmem>>, vector<1x1x32xf32>
    %4 = vector.shape_cast %3 : vector<1x1x32xf32> to vector<1x32xf32>
    %5 = vector.broadcast %4 : vector<1x32xf32> to vector<128x32xf32>
    %6 = arith.addf %2, %5 : vector<128x32xf32>
    %7 = tpu.iota {dimensions = array<i32: 1>} : vector<2x128xi32>
    %c0_6 = arith.constant 0 : index
    %c0_7 = arith.constant 0 : index
    %c0_8 = arith.constant 0 : index
    %8 = vector.load %arg1[%c0_6, %c0_7, %c0_8] : memref<8x2x1xi32, #tpu.memory_space<vmem>>, vector<1x2x1xi32>
    %9 = vector.shape_cast %8 : vector<1x2x1xi32> to vector<2x1xi32>
    %10 = vector.broadcast %9 : vector<2x1xi32> to vector<2x128xi32>
    %11 = arith.cmpi eq, %10, %7 : vector<2x128xi32>
    %12 = arith.extui %11 : vector<2x128xi1> to vector<2x128xi32>
    %13 = arith.sitofp %12 : vector<2x128xi32> to vector<2x128xf32>
    %cst_9 = arith.constant dense<0.000000e+00> : vector<2x32xf32>
    %14 = tpu.matmul %13, %6, %cst_9 {dimension_numbers = #tpu.dot_dimension_numbers<[1], [0], [0], [1], [0, 0, 1, 1], [], []>} : vector<2x128xf32>, vector<128x32xf32>, vector<2x32xf32> -> vector<2x32xf32>
    %c0_10 = arith.constant 0 : index
    %c0_11 = arith.constant 0 : index
    %15 = vector.load %arg10[%c0_10, %c0_11] : memref<16x32xf32, #tpu.memory_space<vmem>>, vector<2x32xf32>
    tpu.vector_store %arg10[%c0_10, %c0_11], %14 {strides = array<i32>} : memref<16x32xf32, #tpu.memory_space<vmem>>, vector<2x32xf32>,
    %c1 = arith.constant 1 : index
    %c0_12 = arith.constant 0 : index
    %c0_13 = arith.constant 0 : index
    %16 = vector.load %arg1[%c1, %c0_12, %c0_13] : memref<8x2x1xi32, #tpu.memory_space<vmem>>, vector<1x2x1xi32>
    %17 = vector.shape_cast %16 : vector<1x2x1xi32> to vector<2x1xi32>
    %18 = vector.broadcast %17 : vector<2x1xi32> to vector<2x128xi32>
    %19 = arith.cmpi eq, %18, %7 : vector<2x128xi32>
    %20 = arith.extui %19 : vector<2x128xi1> to vector<2x128xi32>
    %21 = arith.sitofp %20 : vector<2x128xi32> to vector<2x128xf32>
    %cst_14 = arith.constant dense<0.000000e+00> : vector<2x32xf32>
    %22 = tpu.matmul %21, %6, %cst_14 {dimension_numbers = #tpu.dot_dimension_numbers<[1], [0], [0], [1], [0, 0, 1, 1], [], []>} : vector<2x128xf32>, vector<128x32xf32>, vector<2x32xf32> -> vector<2x32xf32>
    %c2 = arith.constant 2 : index
    %c0_15 = arith.constant 0 : index
    %23 = vector.load %arg10[%c2, %c0_15] : memref<16x32xf32, #tpu.memory_space<vmem>>, vector<2x32xf32>
    tpu.vector_store %arg10[%c2, %c0_15], %22 {strides = array<i32>} : memref<16x32xf32, #tpu.memory_space<vmem>>, vector<2x32xf32>,
    %c2_16 = arith.constant 2 : index
    %c0_17 = arith.constant 0 : index
    %c0_18 = arith.constant 0 : index
    %24 = vector.load %arg1[%c2_16, %c0_17, %c0_18] : memref<8x2x1xi32, #tpu.memory_space<vmem>>, vector<1x2x1xi32>
    %25 = vector.shape_cast %24 : vector<1x2x1xi32> to vector<2x1xi32>
    %26 = vector.broadcast %25 : vector<2x1xi32> to vector<2x128xi32>
    %27 = arith.cmpi eq, %26, %7 : vector<2x128xi32>
    %28 = arith.extui %27 : vector<2x128xi1> to vector<2x128xi32>
    %29 = arith.sitofp %28 : vector<2x128xi32> to vector<2x128xf32>
    %cst_19 = arith.constant dense<0.000000e+00> : vector<2x32xf32>
    %30 = tpu.matmul %29, %6, %cst_19 {dimension_numbers = #tpu.dot_dimension_numbers<[1], [0], [0], [1], [0, 0, 1, 1], [], []>} : vector<2x128xf32>, vector<128x32xf32>, vector<2x32xf32> -> vector<2x32xf32>
    %c4 = arith.constant 4 : index
    %c0_20 = arith.constant 0 : index
    %31 = vector.load %arg10[%c4, %c0_20] : memref<16x32xf32, #tpu.memory_space<vmem>>, vector<2x32xf32>
    tpu.vector_store %arg10[%c4, %c0_20], %30 {strides = array<i32>} : memref<16x32xf32, #tpu.memory_space<vmem>>, vector<2x32xf32>,
    %c3 = arith.constant 3 : index
    %c0_21 = arith.constant 0 : index
    %c0_22 = arith.constant 0 : index
    %32 = vector.load %arg1[%c3, %c0_21, %c0_22] : memref<8x2x1xi32, #tpu.memory_space<vmem>>, vector<1x2x1xi32>
    %33 = vector.shape_cast %32 : vector<1x2x1xi32> to vector<2x1xi32>
    %34 = vector.broadcast %33 : vector<2x1xi32> to vector<2x128xi32>
    %35 = arith.cmpi eq, %34, %7 : vector<2x128xi32>
    %36 = arith.extui %35 : vector<2x128xi1> to vector<2x128xi32>
    %37 = arith.sitofp %36 : vector<2x128xi32> to vector<2x128xf32>
    %cst_23 = arith.constant dense<0.000000e+00> : vector<2x32xf32>
    %38 = tpu.matmul %37, %6, %cst_23 {dimension_numbers = #tpu.dot_dimension_numbers<[1], [0], [0], [1], [0, 0, 1, 1], [], []>} : vector<2x128xf32>, vector<128x32xf32>, vector<2x32xf32> -> vector<2x32xf32>
    %c6 = arith.constant 6 : index
    %c0_24 = arith.constant 0 : index
    %39 = vector.load %arg10[%c6, %c0_24] : memref<16x32xf32, #tpu.memory_space<vmem>>, vector<2x32xf32>
    tpu.vector_store %arg10[%c6, %c0_24], %38 {strides = array<i32>} : memref<16x32xf32, #tpu.memory_space<vmem>>, vector<2x32xf32>,
    %c4_25 = arith.constant 4 : index
    %c0_26 = arith.constant 0 : index
    %c0_27 = arith.constant 0 : index
    %40 = vector.load %arg1[%c4_25, %c0_26, %c0_27] : memref<8x2x1xi32, #tpu.memory_space<vmem>>, vector<1x2x1xi32>
    %41 = vector.shape_cast %40 : vector<1x2x1xi32> to vector<2x1xi32>
    %42 = vector.broadcast %41 : vector<2x1xi32> to vector<2x128xi32>
    %43 = arith.cmpi eq, %42, %7 : vector<2x128xi32>
    %44 = arith.extui %43 : vector<2x128xi1> to vector<2x128xi32>
    %45 = arith.sitofp %44 : vector<2x128xi32> to vector<2x128xf32>
    %cst_28 = arith.constant dense<0.000000e+00> : vector<2x32xf32>
    %46 = tpu.matmul %45, %6, %cst_28 {dimension_numbers = #tpu.dot_dimension_numbers<[1], [0], [0], [1], [0, 0, 1, 1], [], []>} : vector<2x128xf32>, vector<128x32xf32>, vector<2x32xf32> -> vector<2x32xf32>
    %c8 = arith.constant 8 : index
    %c0_29 = arith.constant 0 : index
    %47 = vector.load %arg10[%c8, %c0_29] : memref<16x32xf32, #tpu.memory_space<vmem>>, vector<2x32xf32>
    tpu.vector_store %arg10[%c8, %c0_29], %46 {strides = array<i32>} : memref<16x32xf32, #tpu.memory_space<vmem>>, vector<2x32xf32>,
    %c5 = arith.constant 5 : index
    %c0_30 = arith.constant 0 : index
    %c0_31 = arith.constant 0 : index
    %48 = vector.load %arg1[%c5, %c0_30, %c0_31] : memref<8x2x1xi32, #tpu.memory_space<vmem>>, vector<1x2x1xi32>
    %49 = vector.shape_cast %48 : vector<1x2x1xi32> to vector<2x1xi32>
    %50 = vector.broadcast %49 : vector<2x1xi32> to vector<2x128xi32>
    %51 = arith.cmpi eq, %50, %7 : vector<2x128xi32>
    %52 = arith.extui %51 : vector<2x128xi1> to vector<2x128xi32>
    %53 = arith.sitofp %52 : vector<2x128xi32> to vector<2x128xf32>
    %cst_32 = arith.constant dense<0.000000e+00> : vector<2x32xf32>
    %54 = tpu.matmul %53, %6, %cst_32 {dimension_numbers = #tpu.dot_dimension_numbers<[1], [0], [0], [1], [0, 0, 1, 1], [], []>} : vector<2x128xf32>, vector<128x32xf32>, vector<2x32xf32> -> vector<2x32xf32>
    %c10 = arith.constant 10 : index
    %c0_33 = arith.constant 0 : index
    %55 = vector.load %arg10[%c10, %c0_33] : memref<16x32xf32, #tpu.memory_space<vmem>>, vector<2x32xf32>
    tpu.vector_store %arg10[%c10, %c0_33], %54 {strides = array<i32>} : memref<16x32xf32, #tpu.memory_space<vmem>>, vector<2x32xf32>,
    %c6_34 = arith.constant 6 : index
    %c0_35 = arith.constant 0 : index
    %c0_36 = arith.constant 0 : index
    %56 = vector.load %arg1[%c6_34, %c0_35, %c0_36] : memref<8x2x1xi32, #tpu.memory_space<vmem>>, vector<1x2x1xi32>
    %57 = vector.shape_cast %56 : vector<1x2x1xi32> to vector<2x1xi32>
    %58 = vector.broadcast %57 : vector<2x1xi32> to vector<2x128xi32>
    %59 = arith.cmpi eq, %58, %7 : vector<2x128xi32>
    %60 = arith.extui %59 : vector<2x128xi1> to vector<2x128xi32>
    %61 = arith.sitofp %60 : vector<2x128xi32> to vector<2x128xf32>
    %cst_37 = arith.constant dense<0.000000e+00> : vector<2x32xf32>
    %62 = tpu.matmul %61, %6, %cst_37 {dimension_numbers = #tpu.dot_dimension_numbers<[1], [0], [0], [1], [0, 0, 1, 1], [], []>} : vector<2x128xf32>, vector<128x32xf32>, vector<2x32xf32> -> vector<2x32xf32>
    %c12 = arith.constant 12 : index
    %c0_38 = arith.constant 0 : index
    %63 = vector.load %arg10[%c12, %c0_38] : memref<16x32xf32, #tpu.memory_space<vmem>>, vector<2x32xf32>
    tpu.vector_store %arg10[%c12, %c0_38], %62 {strides = array<i32>} : memref<16x32xf32, #tpu.memory_space<vmem>>, vector<2x32xf32>,
    %c7 = arith.constant 7 : index
    %c0_39 = arith.constant 0 : index
    %c0_40 = arith.constant 0 : index
    %64 = vector.load %arg1[%c7, %c0_39, %c0_40] : memref<8x2x1xi32, #tpu.memory_space<vmem>>, vector<1x2x1xi32>
    %65 = vector.shape_cast %64 : vector<1x2x1xi32> to vector<2x1xi32>
    %66 = vector.broadcast %65 : vector<2x1xi32> to vector<2x128xi32>
    %67 = arith.cmpi eq, %66, %7 : vector<2x128xi32>
    %68 = arith.extui %67 : vector<2x128xi1> to vector<2x128xi32>
    %69 = arith.sitofp %68 : vector<2x128xi32> to vector<2x128xf32>
    %cst_41 = arith.constant dense<0.000000e+00> : vector<2x32xf32>
    %70 = tpu.matmul %69, %6, %cst_41 {dimension_numbers = #tpu.dot_dimension_numbers<[1], [0], [0], [1], [0, 0, 1, 1], [], []>} : vector<2x128xf32>, vector<128x32xf32>, vector<2x32xf32> -> vector<2x32xf32>
    %c14 = arith.constant 14 : index
    %c0_42 = arith.constant 0 : index
    %71 = vector.load %arg10[%c14, %c0_42] : memref<16x32xf32, #tpu.memory_space<vmem>>, vector<2x32xf32>
    tpu.vector_store %arg10[%c14, %c0_42], %70 {strides = array<i32>} : memref<16x32xf32, #tpu.memory_space<vmem>>, vector<2x32xf32>,
    %c0_43 = arith.constant 0 : index
    %c0_44 = arith.constant 0 : index
    %c0_45 = arith.constant 0 : index
    %72 = vector.load %arg5[%c0_43, %c0_44, %c0_45] : memref<5x32x32xf32, #tpu.memory_space<vmem>>, vector<1x32x32xf32>
    %73 = vector.shape_cast %72 : vector<1x32x32xf32> to vector<32x32xf32>
    %cst_46 = arith.constant 0.000000e+00 : f32
    %74 = vector.broadcast %cst_46 : f32 to vector<2x32xf32>
    %c0_47 = arith.constant 0 : index
    %c0_48 = arith.constant 0 : index
    %75 = vector.load %arg10[%c0_47, %c0_48] : memref<16x32xf32, #tpu.memory_space<vmem>>, vector<2x32xf32>
    %cst_49 = arith.constant dense<0.000000e+00> : vector<2x32xf32>
    %76 = tpu.matmul %74, %73, %cst_49 {dimension_numbers = #tpu.dot_dimension_numbers<[1], [0], [0], [1], [0, 0, 1, 1], [], []>} : vector<2x32xf32>, vector<32x32xf32>, vector<2x32xf32> -> vector<2x32xf32>
    %77 = arith.addf %75, %76 : vector<2x32xf32>
    %cst_50 = arith.constant 0.000000e+00 : f32
    %78 = vector.broadcast %cst_50 : f32 to vector<2x32xf32>
    %79 = arith.maximumf %77, %78 : vector<2x32xf32>
    %c0_51 = arith.constant 0 : index
    %c0_52 = arith.constant 0 : index
    %80 = vector.load %arg11[%c0_51, %c0_52] : memref<16x32xf32, #tpu.memory_space<vmem>>, vector<2x32xf32>
    tpu.vector_store %arg11[%c0_51, %c0_52], %79 {strides = array<i32>} : memref<16x32xf32, #tpu.memory_space<vmem>>, vector<2x32xf32>,
    %c2_53 = arith.constant 2 : index
    %c0_54 = arith.constant 0 : index
    %81 = vector.load %arg10[%c2_53, %c0_54] : memref<16x32xf32, #tpu.memory_space<vmem>>, vector<2x32xf32>
    %cst_55 = arith.constant dense<0.000000e+00> : vector<2x32xf32>
    %82 = tpu.matmul %79, %73, %cst_55 {dimension_numbers = #tpu.dot_dimension_numbers<[1], [0], [0], [1], [0, 0, 1, 1], [], []>} : vector<2x32xf32>, vector<32x32xf32>, vector<2x32xf32> -> vector<2x32xf32>
    %83 = arith.addf %81, %82 : vector<2x32xf32>
    %cst_56 = arith.constant 0.000000e+00 : f32
    %84 = vector.broadcast %cst_56 : f32 to vector<2x32xf32>
    %85 = arith.maximumf %83, %84 : vector<2x32xf32>
    %c2_57 = arith.constant 2 : index
    %c0_58 = arith.constant 0 : index
    %86 = vector.load %arg11[%c2_57, %c0_58] : memref<16x32xf32, #tpu.memory_space<vmem>>, vector<2x32xf32>
    tpu.vector_store %arg11[%c2_57, %c0_58], %85 {strides = array<i32>} : memref<16x32xf32, #tpu.memory_space<vmem>>, vector<2x32xf32>,
    %c4_59 = arith.constant 4 : index
    %c0_60 = arith.constant 0 : index
    %87 = vector.load %arg10[%c4_59, %c0_60] : memref<16x32xf32, #tpu.memory_space<vmem>>, vector<2x32xf32>
    %cst_61 = arith.constant dense<0.000000e+00> : vector<2x32xf32>
    %88 = tpu.matmul %85, %73, %cst_61 {dimension_numbers = #tpu.dot_dimension_numbers<[1], [0], [0], [1], [0, 0, 1, 1], [], []>} : vector<2x32xf32>, vector<32x32xf32>, vector<2x32xf32> -> vector<2x32xf32>
    %89 = arith.addf %87, %88 : vector<2x32xf32>
    %cst_62 = arith.constant 0.000000e+00 : f32
    %90 = vector.broadcast %cst_62 : f32 to vector<2x32xf32>
    %91 = arith.maximumf %89, %90 : vector<2x32xf32>
    %c4_63 = arith.constant 4 : index
    %c0_64 = arith.constant 0 : index
    %92 = vector.load %arg11[%c4_63, %c0_64] : memref<16x32xf32, #tpu.memory_space<vmem>>, vector<2x32xf32>
    tpu.vector_store %arg11[%c4_63, %c0_64], %91 {strides = array<i32>} : memref<16x32xf32, #tpu.memory_space<vmem>>, vector<2x32xf32>,
    %c6_65 = arith.constant 6 : index
    %c0_66 = arith.constant 0 : index
    %93 = vector.load %arg10[%c6_65, %c0_66] : memref<16x32xf32, #tpu.memory_space<vmem>>, vector<2x32xf32>
    %cst_67 = arith.constant dense<0.000000e+00> : vector<2x32xf32>
    %94 = tpu.matmul %91, %73, %cst_67 {dimension_numbers = #tpu.dot_dimension_numbers<[1], [0], [0], [1], [0, 0, 1, 1], [], []>} : vector<2x32xf32>, vector<32x32xf32>, vector<2x32xf32> -> vector<2x32xf32>
    %95 = arith.addf %93, %94 : vector<2x32xf32>
    %cst_68 = arith.constant 0.000000e+00 : f32
    %96 = vector.broadcast %cst_68 : f32 to vector<2x32xf32>
    %97 = arith.maximumf %95, %96 : vector<2x32xf32>
    %c6_69 = arith.constant 6 : index
    %c0_70 = arith.constant 0 : index
    %98 = vector.load %arg11[%c6_69, %c0_70] : memref<16x32xf32, #tpu.memory_space<vmem>>, vector<2x32xf32>
    tpu.vector_store %arg11[%c6_69, %c0_70], %97 {strides = array<i32>} : memref<16x32xf32, #tpu.memory_space<vmem>>, vector<2x32xf32>,
    %c8_71 = arith.constant 8 : index
    %c0_72 = arith.constant 0 : index
    %99 = vector.load %arg10[%c8_71, %c0_72] : memref<16x32xf32, #tpu.memory_space<vmem>>, vector<2x32xf32>
    %cst_73 = arith.constant dense<0.000000e+00> : vector<2x32xf32>
    %100 = tpu.matmul %97, %73, %cst_73 {dimension_numbers = #tpu.dot_dimension_numbers<[1], [0], [0], [1], [0, 0, 1, 1], [], []>} : vector<2x32xf32>, vector<32x32xf32>, vector<2x32xf32> -> vector<2x32xf32>
    %101 = arith.addf %99, %100 : vector<2x32xf32>
    %cst_74 = arith.constant 0.000000e+00 : f32
    %102 = vector.broadcast %cst_74 : f32 to vector<2x32xf32>
    %103 = arith.maximumf %101, %102 : vector<2x32xf32>
    %c8_75 = arith.constant 8 : index
    %c0_76 = arith.constant 0 : index
    %104 = vector.load %arg11[%c8_75, %c0_76] : memref<16x32xf32, #tpu.memory_space<vmem>>, vector<2x32xf32>
    tpu.vector_store %arg11[%c8_75, %c0_76], %103 {strides = array<i32>} : memref<16x32xf32, #tpu.memory_space<vmem>>, vector<2x32xf32>,
    %c10_77 = arith.constant 10 : index
    %c0_78 = arith.constant 0 : index
    %105 = vector.load %arg10[%c10_77, %c0_78] : memref<16x32xf32, #tpu.memory_space<vmem>>, vector<2x32xf32>
    %cst_79 = arith.constant dense<0.000000e+00> : vector<2x32xf32>
    %106 = tpu.matmul %103, %73, %cst_79 {dimension_numbers = #tpu.dot_dimension_numbers<[1], [0], [0], [1], [0, 0, 1, 1], [], []>} : vector<2x32xf32>, vector<32x32xf32>, vector<2x32xf32> -> vector<2x32xf32>
    %107 = arith.addf %105, %106 : vector<2x32xf32>
    %cst_80 = arith.constant 0.000000e+00 : f32
    %108 = vector.broadcast %cst_80 : f32 to vector<2x32xf32>
    %109 = arith.maximumf %107, %108 : vector<2x32xf32>
    %c10_81 = arith.constant 10 : index
    %c0_82 = arith.constant 0 : index
    %110 = vector.load %arg11[%c10_81, %c0_82] : memref<16x32xf32, #tpu.memory_space<vmem>>, vector<2x32xf32>
    tpu.vector_store %arg11[%c10_81, %c0_82], %109 {strides = array<i32>} : memref<16x32xf32, #tpu.memory_space<vmem>>, vector<2x32xf32>,
    %c12_83 = arith.constant 12 : index
    %c0_84 = arith.constant 0 : index
    %111 = vector.load %arg10[%c12_83, %c0_84] : memref<16x32xf32, #tpu.memory_space<vmem>>, vector<2x32xf32>
    %cst_85 = arith.constant dense<0.000000e+00> : vector<2x32xf32>
    %112 = tpu.matmul %109, %73, %cst_85 {dimension_numbers = #tpu.dot_dimension_numbers<[1], [0], [0], [1], [0, 0, 1, 1], [], []>} : vector<2x32xf32>, vector<32x32xf32>, vector<2x32xf32> -> vector<2x32xf32>
    %113 = arith.addf %111, %112 : vector<2x32xf32>
    %cst_86 = arith.constant 0.000000e+00 : f32
    %114 = vector.broadcast %cst_86 : f32 to vector<2x32xf32>
    %115 = arith.maximumf %113, %114 : vector<2x32xf32>
    %c12_87 = arith.constant 12 : index
    %c0_88 = arith.constant 0 : index
    %116 = vector.load %arg11[%c12_87, %c0_88] : memref<16x32xf32, #tpu.memory_space<vmem>>, vector<2x32xf32>
    tpu.vector_store %arg11[%c12_87, %c0_88], %115 {strides = array<i32>} : memref<16x32xf32, #tpu.memory_space<vmem>>, vector<2x32xf32>,
    %c14_89 = arith.constant 14 : index
    %c0_90 = arith.constant 0 : index
    %117 = vector.load %arg10[%c14_89, %c0_90] : memref<16x32xf32, #tpu.memory_space<vmem>>, vector<2x32xf32>
    %cst_91 = arith.constant dense<0.000000e+00> : vector<2x32xf32>
    %118 = tpu.matmul %115, %73, %cst_91 {dimension_numbers = #tpu.dot_dimension_numbers<[1], [0], [0], [1], [0, 0, 1, 1], [], []>} : vector<2x32xf32>, vector<32x32xf32>, vector<2x32xf32> -> vector<2x32xf32>
    %119 = arith.addf %117, %118 : vector<2x32xf32>
    %cst_92 = arith.constant 0.000000e+00 : f32
    %120 = vector.broadcast %cst_92 : f32 to vector<2x32xf32>
    %121 = arith.maximumf %119, %120 : vector<2x32xf32>
    %c14_93 = arith.constant 14 : index
    %c0_94 = arith.constant 0 : index
    %122 = vector.load %arg11[%c14_93, %c0_94] : memref<16x32xf32, #tpu.memory_space<vmem>>, vector<2x32xf32>
    tpu.vector_store %arg11[%c14_93, %c0_94], %121 {strides = array<i32>} : memref<16x32xf32, #tpu.memory_space<vmem>>, vector<2x32xf32>,
    %c0_95 = arith.constant 0 : index
    %c0_96 = arith.constant 0 : index
    %123 = vector.load %arg11[%c0_95, %c0_96] : memref<16x32xf32, #tpu.memory_space<vmem>>, vector<16x32xf32>
    %c0_97 = arith.constant 0 : index
    %c0_98 = arith.constant 0 : index
    %c0_99 = arith.constant 0 : index
    %124 = vector.load %arg4[%c0_97, %c0_98, %c0_99] : memref<4x32x32xf32, #tpu.memory_space<vmem>>, vector<1x32x32xf32>
    %125 = vector.shape_cast %124 : vector<1x32x32xf32> to vector<32x32xf32>
    %cst_100 = arith.constant dense<0.000000e+00> : vector<16x32xf32>
    %126 = tpu.matmul %123, %125, %cst_100 {dimension_numbers = #tpu.dot_dimension_numbers<[1], [0], [0], [1], [0, 0, 1, 1], [], []>} : vector<16x32xf32>, vector<32x32xf32>, vector<16x32xf32> -> vector<16x32xf32>
    %c1_101 = arith.constant 1 : index
    %c0_102 = arith.constant 0 : index
    %c0_103 = arith.constant 0 : index
    %127 = vector.load %arg6[%c1_101, %c0_102, %c0_103] : memref<5x1x32xf32, #tpu.memory_space<vmem>>, vector<1x1x32xf32>
    %128 = vector.shape_cast %127 : vector<1x1x32xf32> to vector<1x32xf32>
    %129 = vector.broadcast %128 : vector<1x32xf32> to vector<16x32xf32>
    %130 = arith.addf %126, %129 : vector<16x32xf32>
    %c0_104 = arith.constant 0 : index
    %c0_105 = arith.constant 0 : index
    %131 = vector.load %arg10[%c0_104, %c0_105] : memref<16x32xf32, #tpu.memory_space<vmem>>, vector<16x32xf32>
    tpu.vector_store %arg10[%c0_104, %c0_105], %130 {strides = array<i32>} : memref<16x32xf32, #tpu.memory_space<vmem>>, vector<16x32xf32>,
    %c1_106 = arith.constant 1 : index
    %c0_107 = arith.constant 0 : index
    %c0_108 = arith.constant 0 : index
    %132 = vector.load %arg5[%c1_106, %c0_107, %c0_108] : memref<5x32x32xf32, #tpu.memory_space<vmem>>, vector<1x32x32xf32>
    %133 = vector.shape_cast %132 : vector<1x32x32xf32> to vector<32x32xf32>
    %cst_109 = arith.constant 0.000000e+00 : f32
    %134 = vector.broadcast %cst_109 : f32 to vector<2x32xf32>
    %c0_110 = arith.constant 0 : index
    %c0_111 = arith.constant 0 : index
    %135 = vector.load %arg10[%c0_110, %c0_111] : memref<16x32xf32, #tpu.memory_space<vmem>>, vector<2x32xf32>
    %cst_112 = arith.constant dense<0.000000e+00> : vector<2x32xf32>
    %136 = tpu.matmul %134, %133, %cst_112 {dimension_numbers = #tpu.dot_dimension_numbers<[1], [0], [0], [1], [0, 0, 1, 1], [], []>} : vector<2x32xf32>, vector<32x32xf32>, vector<2x32xf32> -> vector<2x32xf32>
    %137 = arith.addf %135, %136 : vector<2x32xf32>
    %cst_113 = arith.constant 0.000000e+00 : f32
    %138 = vector.broadcast %cst_113 : f32 to vector<2x32xf32>
    %139 = arith.maximumf %137, %138 : vector<2x32xf32>
    %c0_114 = arith.constant 0 : index
    %c0_115 = arith.constant 0 : index
    %140 = vector.load %arg11[%c0_114, %c0_115] : memref<16x32xf32, #tpu.memory_space<vmem>>, vector<2x32xf32>
    tpu.vector_store %arg11[%c0_114, %c0_115], %139 {strides = array<i32>} : memref<16x32xf32, #tpu.memory_space<vmem>>, vector<2x32xf32>,
    %c2_116 = arith.constant 2 : index
    %c0_117 = arith.constant 0 : index
    %141 = vector.load %arg10[%c2_116, %c0_117] : memref<16x32xf32, #tpu.memory_space<vmem>>, vector<2x32xf32>
    %cst_118 = arith.constant dense<0.000000e+00> : vector<2x32xf32>
    %142 = tpu.matmul %139, %133, %cst_118 {dimension_numbers = #tpu.dot_dimension_numbers<[1], [0], [0], [1], [0, 0, 1, 1], [], []>} : vector<2x32xf32>, vector<32x32xf32>, vector<2x32xf32> -> vector<2x32xf32>
    %143 = arith.addf %141, %142 : vector<2x32xf32>
    %cst_119 = arith.constant 0.000000e+00 : f32
    %144 = vector.broadcast %cst_119 : f32 to vector<2x32xf32>
    %145 = arith.maximumf %143, %144 : vector<2x32xf32>
    %c2_120 = arith.constant 2 : index
    %c0_121 = arith.constant 0 : index
    %146 = vector.load %arg11[%c2_120, %c0_121] : memref<16x32xf32, #tpu.memory_space<vmem>>, vector<2x32xf32>
    tpu.vector_store %arg11[%c2_120, %c0_121], %145 {strides = array<i32>} : memref<16x32xf32, #tpu.memory_space<vmem>>, vector<2x32xf32>,
    %c4_122 = arith.constant 4 : index
    %c0_123 = arith.constant 0 : index
    %147 = vector.load %arg10[%c4_122, %c0_123] : memref<16x32xf32, #tpu.memory_space<vmem>>, vector<2x32xf32>
    %cst_124 = arith.constant dense<0.000000e+00> : vector<2x32xf32>
    %148 = tpu.matmul %145, %133, %cst_124 {dimension_numbers = #tpu.dot_dimension_numbers<[1], [0], [0], [1], [0, 0, 1, 1], [], []>} : vector<2x32xf32>, vector<32x32xf32>, vector<2x32xf32> -> vector<2x32xf32>
    %149 = arith.addf %147, %148 : vector<2x32xf32>
    %cst_125 = arith.constant 0.000000e+00 : f32
    %150 = vector.broadcast %cst_125 : f32 to vector<2x32xf32>
    %151 = arith.maximumf %149, %150 : vector<2x32xf32>
    %c4_126 = arith.constant 4 : index
    %c0_127 = arith.constant 0 : index
    %152 = vector.load %arg11[%c4_126, %c0_127] : memref<16x32xf32, #tpu.memory_space<vmem>>, vector<2x32xf32>
    tpu.vector_store %arg11[%c4_126, %c0_127], %151 {strides = array<i32>} : memref<16x32xf32, #tpu.memory_space<vmem>>, vector<2x32xf32>,
    %c6_128 = arith.constant 6 : index
    %c0_129 = arith.constant 0 : index
    %153 = vector.load %arg10[%c6_128, %c0_129] : memref<16x32xf32, #tpu.memory_space<vmem>>, vector<2x32xf32>
    %cst_130 = arith.constant dense<0.000000e+00> : vector<2x32xf32>
    %154 = tpu.matmul %151, %133, %cst_130 {dimension_numbers = #tpu.dot_dimension_numbers<[1], [0], [0], [1], [0, 0, 1, 1], [], []>} : vector<2x32xf32>, vector<32x32xf32>, vector<2x32xf32> -> vector<2x32xf32>
    %155 = arith.addf %153, %154 : vector<2x32xf32>
    %cst_131 = arith.constant 0.000000e+00 : f32
    %156 = vector.broadcast %cst_131 : f32 to vector<2x32xf32>
    %157 = arith.maximumf %155, %156 : vector<2x32xf32>
    %c6_132 = arith.constant 6 : index
    %c0_133 = arith.constant 0 : index
    %158 = vector.load %arg11[%c6_132, %c0_133] : memref<16x32xf32, #tpu.memory_space<vmem>>, vector<2x32xf32>
    tpu.vector_store %arg11[%c6_132, %c0_133], %157 {strides = array<i32>} : memref<16x32xf32, #tpu.memory_space<vmem>>, vector<2x32xf32>,
    %c8_134 = arith.constant 8 : index
    %c0_135 = arith.constant 0 : index
    %159 = vector.load %arg10[%c8_134, %c0_135] : memref<16x32xf32, #tpu.memory_space<vmem>>, vector<2x32xf32>
    %cst_136 = arith.constant dense<0.000000e+00> : vector<2x32xf32>
    %160 = tpu.matmul %157, %133, %cst_136 {dimension_numbers = #tpu.dot_dimension_numbers<[1], [0], [0], [1], [0, 0, 1, 1], [], []>} : vector<2x32xf32>, vector<32x32xf32>, vector<2x32xf32> -> vector<2x32xf32>
    %161 = arith.addf %159, %160 : vector<2x32xf32>
    %cst_137 = arith.constant 0.000000e+00 : f32
    %162 = vector.broadcast %cst_137 : f32 to vector<2x32xf32>
    %163 = arith.maximumf %161, %162 : vector<2x32xf32>
    %c8_138 = arith.constant 8 : index
    %c0_139 = arith.constant 0 : index
    %164 = vector.load %arg11[%c8_138, %c0_139] : memref<16x32xf32, #tpu.memory_space<vmem>>, vector<2x32xf32>
    tpu.vector_store %arg11[%c8_138, %c0_139], %163 {strides = array<i32>} : memref<16x32xf32, #tpu.memory_space<vmem>>, vector<2x32xf32>,
    %c10_140 = arith.constant 10 : index
    %c0_141 = arith.constant 0 : index
    %165 = vector.load %arg10[%c10_140, %c0_141] : memref<16x32xf32, #tpu.memory_space<vmem>>, vector<2x32xf32>
    %cst_142 = arith.constant dense<0.000000e+00> : vector<2x32xf32>
    %166 = tpu.matmul %163, %133, %cst_142 {dimension_numbers = #tpu.dot_dimension_numbers<[1], [0], [0], [1], [0, 0, 1, 1], [], []>} : vector<2x32xf32>, vector<32x32xf32>, vector<2x32xf32> -> vector<2x32xf32>
    %167 = arith.addf %165, %166 : vector<2x32xf32>
    %cst_143 = arith.constant 0.000000e+00 : f32
    %168 = vector.broadcast %cst_143 : f32 to vector<2x32xf32>
    %169 = arith.maximumf %167, %168 : vector<2x32xf32>
    %c10_144 = arith.constant 10 : index
    %c0_145 = arith.constant 0 : index
    %170 = vector.load %arg11[%c10_144, %c0_145] : memref<16x32xf32, #tpu.memory_space<vmem>>, vector<2x32xf32>
    tpu.vector_store %arg11[%c10_144, %c0_145], %169 {strides = array<i32>} : memref<16x32xf32, #tpu.memory_space<vmem>>, vector<2x32xf32>,
    %c12_146 = arith.constant 12 : index
    %c0_147 = arith.constant 0 : index
    %171 = vector.load %arg10[%c12_146, %c0_147] : memref<16x32xf32, #tpu.memory_space<vmem>>, vector<2x32xf32>
    %cst_148 = arith.constant dense<0.000000e+00> : vector<2x32xf32>
    %172 = tpu.matmul %169, %133, %cst_148 {dimension_numbers = #tpu.dot_dimension_numbers<[1], [0], [0], [1], [0, 0, 1, 1], [], []>} : vector<2x32xf32>, vector<32x32xf32>, vector<2x32xf32> -> vector<2x32xf32>
    %173 = arith.addf %171, %172 : vector<2x32xf32>
    %cst_149 = arith.constant 0.000000e+00 : f32
    %174 = vector.broadcast %cst_149 : f32 to vector<2x32xf32>
    %175 = arith.maximumf %173, %174 : vector<2x32xf32>
    %c12_150 = arith.constant 12 : index
    %c0_151 = arith.constant 0 : index
    %176 = vector.load %arg11[%c12_150, %c0_151] : memref<16x32xf32, #tpu.memory_space<vmem>>, vector<2x32xf32>
    tpu.vector_store %arg11[%c12_150, %c0_151], %175 {strides = array<i32>} : memref<16x32xf32, #tpu.memory_space<vmem>>, vector<2x32xf32>,
    %c14_152 = arith.constant 14 : index
    %c0_153 = arith.constant 0 : index
    %177 = vector.load %arg10[%c14_152, %c0_153] : memref<16x32xf32, #tpu.memory_space<vmem>>, vector<2x32xf32>
    %cst_154 = arith.constant dense<0.000000e+00> : vector<2x32xf32>
    %178 = tpu.matmul %175, %133, %cst_154 {dimension_numbers = #tpu.dot_dimension_numbers<[1], [0], [0], [1], [0, 0, 1, 1], [], []>} : vector<2x32xf32>, vector<32x32xf32>, vector<2x32xf32> -> vector<2x32xf32>
    %179 = arith.addf %177, %178 : vector<2x32xf32>
    %cst_155 = arith.constant 0.000000e+00 : f32
    %180 = vector.broadcast %cst_155 : f32 to vector<2x32xf32>
    %181 = arith.maximumf %179, %180 : vector<2x32xf32>
    %c14_156 = arith.constant 14 : index
    %c0_157 = arith.constant 0 : index
    %182 = vector.load %arg11[%c14_156, %c0_157] : memref<16x32xf32, #tpu.memory_space<vmem>>, vector<2x32xf32>
    tpu.vector_store %arg11[%c14_156, %c0_157], %181 {strides = array<i32>} : memref<16x32xf32, #tpu.memory_space<vmem>>, vector<2x32xf32>,
    %c0_158 = arith.constant 0 : index
    %c0_159 = arith.constant 0 : index
    %183 = vector.load %arg11[%c0_158, %c0_159] : memref<16x32xf32, #tpu.memory_space<vmem>>, vector<16x32xf32>
    %c1_160 = arith.constant 1 : index
    %c0_161 = arith.constant 0 : index
    %c0_162 = arith.constant 0 : index
    %184 = vector.load %arg4[%c1_160, %c0_161, %c0_162] : memref<4x32x32xf32, #tpu.memory_space<vmem>>, vector<1x32x32xf32>
    %185 = vector.shape_cast %184 : vector<1x32x32xf32> to vector<32x32xf32>
    %cst_163 = arith.constant dense<0.000000e+00> : vector<16x32xf32>
    %186 = tpu.matmul %183, %185, %cst_163 {dimension_numbers = #tpu.dot_dimension_numbers<[1], [0], [0], [1], [0, 0, 1, 1], [], []>} : vector<16x32xf32>, vector<32x32xf32>, vector<16x32xf32> -> vector<16x32xf32>
    %c2_164 = arith.constant 2 : index
    %c0_165 = arith.constant 0 : index
    %c0_166 = arith.constant 0 : index
    %187 = vector.load %arg6[%c2_164, %c0_165, %c0_166] : memref<5x1x32xf32, #tpu.memory_space<vmem>>, vector<1x1x32xf32>
    %188 = vector.shape_cast %187 : vector<1x1x32xf32> to vector<1x32xf32>
    %189 = vector.broadcast %188 : vector<1x32xf32> to vector<16x32xf32>
    %190 = arith.addf %186, %189 : vector<16x32xf32>
    %c0_167 = arith.constant 0 : index
    %c0_168 = arith.constant 0 : index
    %191 = vector.load %arg10[%c0_167, %c0_168] : memref<16x32xf32, #tpu.memory_space<vmem>>, vector<16x32xf32>
    tpu.vector_store %arg10[%c0_167, %c0_168], %190 {strides = array<i32>} : memref<16x32xf32, #tpu.memory_space<vmem>>, vector<16x32xf32>,
    %c2_169 = arith.constant 2 : index
    %c0_170 = arith.constant 0 : index
    %c0_171 = arith.constant 0 : index
    %192 = vector.load %arg5[%c2_169, %c0_170, %c0_171] : memref<5x32x32xf32, #tpu.memory_space<vmem>>, vector<1x32x32xf32>
    %193 = vector.shape_cast %192 : vector<1x32x32xf32> to vector<32x32xf32>
    %cst_172 = arith.constant 0.000000e+00 : f32
    %194 = vector.broadcast %cst_172 : f32 to vector<2x32xf32>
    %c0_173 = arith.constant 0 : index
    %c0_174 = arith.constant 0 : index
    %195 = vector.load %arg10[%c0_173, %c0_174] : memref<16x32xf32, #tpu.memory_space<vmem>>, vector<2x32xf32>
    %cst_175 = arith.constant dense<0.000000e+00> : vector<2x32xf32>
    %196 = tpu.matmul %194, %193, %cst_175 {dimension_numbers = #tpu.dot_dimension_numbers<[1], [0], [0], [1], [0, 0, 1, 1], [], []>} : vector<2x32xf32>, vector<32x32xf32>, vector<2x32xf32> -> vector<2x32xf32>
    %197 = arith.addf %195, %196 : vector<2x32xf32>
    %cst_176 = arith.constant 0.000000e+00 : f32
    %198 = vector.broadcast %cst_176 : f32 to vector<2x32xf32>
    %199 = arith.maximumf %197, %198 : vector<2x32xf32>
    %c0_177 = arith.constant 0 : index
    %c0_178 = arith.constant 0 : index
    %200 = vector.load %arg11[%c0_177, %c0_178] : memref<16x32xf32, #tpu.memory_space<vmem>>, vector<2x32xf32>
    tpu.vector_store %arg11[%c0_177, %c0_178], %199 {strides = array<i32>} : memref<16x32xf32, #tpu.memory_space<vmem>>, vector<2x32xf32>,
    %c2_179 = arith.constant 2 : index
    %c0_180 = arith.constant 0 : index
    %201 = vector.load %arg10[%c2_179, %c0_180] : memref<16x32xf32, #tpu.memory_space<vmem>>, vector<2x32xf32>
    %cst_181 = arith.constant dense<0.000000e+00> : vector<2x32xf32>
    %202 = tpu.matmul %199, %193, %cst_181 {dimension_numbers = #tpu.dot_dimension_numbers<[1], [0], [0], [1], [0, 0, 1, 1], [], []>} : vector<2x32xf32>, vector<32x32xf32>, vector<2x32xf32> -> vector<2x32xf32>
    %203 = arith.addf %201, %202 : vector<2x32xf32>
    %cst_182 = arith.constant 0.000000e+00 : f32
    %204 = vector.broadcast %cst_182 : f32 to vector<2x32xf32>
    %205 = arith.maximumf %203, %204 : vector<2x32xf32>
    %c2_183 = arith.constant 2 : index
    %c0_184 = arith.constant 0 : index
    %206 = vector.load %arg11[%c2_183, %c0_184] : memref<16x32xf32, #tpu.memory_space<vmem>>, vector<2x32xf32>
    tpu.vector_store %arg11[%c2_183, %c0_184], %205 {strides = array<i32>} : memref<16x32xf32, #tpu.memory_space<vmem>>, vector<2x32xf32>,
    %c4_185 = arith.constant 4 : index
    %c0_186 = arith.constant 0 : index
    %207 = vector.load %arg10[%c4_185, %c0_186] : memref<16x32xf32, #tpu.memory_space<vmem>>, vector<2x32xf32>
    %cst_187 = arith.constant dense<0.000000e+00> : vector<2x32xf32>
    %208 = tpu.matmul %205, %193, %cst_187 {dimension_numbers = #tpu.dot_dimension_numbers<[1], [0], [0], [1], [0, 0, 1, 1], [], []>} : vector<2x32xf32>, vector<32x32xf32>, vector<2x32xf32> -> vector<2x32xf32>
    %209 = arith.addf %207, %208 : vector<2x32xf32>
    %cst_188 = arith.constant 0.000000e+00 : f32
    %210 = vector.broadcast %cst_188 : f32 to vector<2x32xf32>
    %211 = arith.maximumf %209, %210 : vector<2x32xf32>
    %c4_189 = arith.constant 4 : index
    %c0_190 = arith.constant 0 : index
    %212 = vector.load %arg11[%c4_189, %c0_190] : memref<16x32xf32, #tpu.memory_space<vmem>>, vector<2x32xf32>
    tpu.vector_store %arg11[%c4_189, %c0_190], %211 {strides = array<i32>} : memref<16x32xf32, #tpu.memory_space<vmem>>, vector<2x32xf32>,
    %c6_191 = arith.constant 6 : index
    %c0_192 = arith.constant 0 : index
    %213 = vector.load %arg10[%c6_191, %c0_192] : memref<16x32xf32, #tpu.memory_space<vmem>>, vector<2x32xf32>
    %cst_193 = arith.constant dense<0.000000e+00> : vector<2x32xf32>
    %214 = tpu.matmul %211, %193, %cst_193 {dimension_numbers = #tpu.dot_dimension_numbers<[1], [0], [0], [1], [0, 0, 1, 1], [], []>} : vector<2x32xf32>, vector<32x32xf32>, vector<2x32xf32> -> vector<2x32xf32>
    %215 = arith.addf %213, %214 : vector<2x32xf32>
    %cst_194 = arith.constant 0.000000e+00 : f32
    %216 = vector.broadcast %cst_194 : f32 to vector<2x32xf32>
    %217 = arith.maximumf %215, %216 : vector<2x32xf32>
    %c6_195 = arith.constant 6 : index
    %c0_196 = arith.constant 0 : index
    %218 = vector.load %arg11[%c6_195, %c0_196] : memref<16x32xf32, #tpu.memory_space<vmem>>, vector<2x32xf32>
    tpu.vector_store %arg11[%c6_195, %c0_196], %217 {strides = array<i32>} : memref<16x32xf32, #tpu.memory_space<vmem>>, vector<2x32xf32>,
    %c8_197 = arith.constant 8 : index
    %c0_198 = arith.constant 0 : index
    %219 = vector.load %arg10[%c8_197, %c0_198] : memref<16x32xf32, #tpu.memory_space<vmem>>, vector<2x32xf32>
    %cst_199 = arith.constant dense<0.000000e+00> : vector<2x32xf32>
    %220 = tpu.matmul %217, %193, %cst_199 {dimension_numbers = #tpu.dot_dimension_numbers<[1], [0], [0], [1], [0, 0, 1, 1], [], []>} : vector<2x32xf32>, vector<32x32xf32>, vector<2x32xf32> -> vector<2x32xf32>
    %221 = arith.addf %219, %220 : vector<2x32xf32>
    %cst_200 = arith.constant 0.000000e+00 : f32
    %222 = vector.broadcast %cst_200 : f32 to vector<2x32xf32>
    %223 = arith.maximumf %221, %222 : vector<2x32xf32>
    %c8_201 = arith.constant 8 : index
    %c0_202 = arith.constant 0 : index
    %224 = vector.load %arg11[%c8_201, %c0_202] : memref<16x32xf32, #tpu.memory_space<vmem>>, vector<2x32xf32>
    tpu.vector_store %arg11[%c8_201, %c0_202], %223 {strides = array<i32>} : memref<16x32xf32, #tpu.memory_space<vmem>>, vector<2x32xf32>,
    %c10_203 = arith.constant 10 : index
    %c0_204 = arith.constant 0 : index
    %225 = vector.load %arg10[%c10_203, %c0_204] : memref<16x32xf32, #tpu.memory_space<vmem>>, vector<2x32xf32>
    %cst_205 = arith.constant dense<0.000000e+00> : vector<2x32xf32>
    %226 = tpu.matmul %223, %193, %cst_205 {dimension_numbers = #tpu.dot_dimension_numbers<[1], [0], [0], [1], [0, 0, 1, 1], [], []>} : vector<2x32xf32>, vector<32x32xf32>, vector<2x32xf32> -> vector<2x32xf32>
    %227 = arith.addf %225, %226 : vector<2x32xf32>
    %cst_206 = arith.constant 0.000000e+00 : f32
    %228 = vector.broadcast %cst_206 : f32 to vector<2x32xf32>
    %229 = arith.maximumf %227, %228 : vector<2x32xf32>
    %c10_207 = arith.constant 10 : index
    %c0_208 = arith.constant 0 : index
    %230 = vector.load %arg11[%c10_207, %c0_208] : memref<16x32xf32, #tpu.memory_space<vmem>>, vector<2x32xf32>
    tpu.vector_store %arg11[%c10_207, %c0_208], %229 {strides = array<i32>} : memref<16x32xf32, #tpu.memory_space<vmem>>, vector<2x32xf32>,
    %c12_209 = arith.constant 12 : index
    %c0_210 = arith.constant 0 : index
    %231 = vector.load %arg10[%c12_209, %c0_210] : memref<16x32xf32, #tpu.memory_space<vmem>>, vector<2x32xf32>
    %cst_211 = arith.constant dense<0.000000e+00> : vector<2x32xf32>
    %232 = tpu.matmul %229, %193, %cst_211 {dimension_numbers = #tpu.dot_dimension_numbers<[1], [0], [0], [1], [0, 0, 1, 1], [], []>} : vector<2x32xf32>, vector<32x32xf32>, vector<2x32xf32> -> vector<2x32xf32>
    %233 = arith.addf %231, %232 : vector<2x32xf32>
    %cst_212 = arith.constant 0.000000e+00 : f32
    %234 = vector.broadcast %cst_212 : f32 to vector<2x32xf32>
    %235 = arith.maximumf %233, %234 : vector<2x32xf32>
    %c12_213 = arith.constant 12 : index
    %c0_214 = arith.constant 0 : index
    %236 = vector.load %arg11[%c12_213, %c0_214] : memref<16x32xf32, #tpu.memory_space<vmem>>, vector<2x32xf32>
    tpu.vector_store %arg11[%c12_213, %c0_214], %235 {strides = array<i32>} : memref<16x32xf32, #tpu.memory_space<vmem>>, vector<2x32xf32>,
    %c14_215 = arith.constant 14 : index
    %c0_216 = arith.constant 0 : index
    %237 = vector.load %arg10[%c14_215, %c0_216] : memref<16x32xf32, #tpu.memory_space<vmem>>, vector<2x32xf32>
    %cst_217 = arith.constant dense<0.000000e+00> : vector<2x32xf32>
    %238 = tpu.matmul %235, %193, %cst_217 {dimension_numbers = #tpu.dot_dimension_numbers<[1], [0], [0], [1], [0, 0, 1, 1], [], []>} : vector<2x32xf32>, vector<32x32xf32>, vector<2x32xf32> -> vector<2x32xf32>
    %239 = arith.addf %237, %238 : vector<2x32xf32>
    %cst_218 = arith.constant 0.000000e+00 : f32
    %240 = vector.broadcast %cst_218 : f32 to vector<2x32xf32>
    %241 = arith.maximumf %239, %240 : vector<2x32xf32>
    %c14_219 = arith.constant 14 : index
    %c0_220 = arith.constant 0 : index
    %242 = vector.load %arg11[%c14_219, %c0_220] : memref<16x32xf32, #tpu.memory_space<vmem>>, vector<2x32xf32>
    tpu.vector_store %arg11[%c14_219, %c0_220], %241 {strides = array<i32>} : memref<16x32xf32, #tpu.memory_space<vmem>>, vector<2x32xf32>,
    %c0_221 = arith.constant 0 : index
    %c0_222 = arith.constant 0 : index
    %243 = vector.load %arg11[%c0_221, %c0_222] : memref<16x32xf32, #tpu.memory_space<vmem>>, vector<16x32xf32>
    %c2_223 = arith.constant 2 : index
    %c0_224 = arith.constant 0 : index
    %c0_225 = arith.constant 0 : index
    %244 = vector.load %arg4[%c2_223, %c0_224, %c0_225] : memref<4x32x32xf32, #tpu.memory_space<vmem>>, vector<1x32x32xf32>
    %245 = vector.shape_cast %244 : vector<1x32x32xf32> to vector<32x32xf32>
    %cst_226 = arith.constant dense<0.000000e+00> : vector<16x32xf32>
    %246 = tpu.matmul %243, %245, %cst_226 {dimension_numbers = #tpu.dot_dimension_numbers<[1], [0], [0], [1], [0, 0, 1, 1], [], []>} : vector<16x32xf32>, vector<32x32xf32>, vector<16x32xf32> -> vector<16x32xf32>
    %c3_227 = arith.constant 3 : index
    %c0_228 = arith.constant 0 : index
    %c0_229 = arith.constant 0 : index
    %247 = vector.load %arg6[%c3_227, %c0_228, %c0_229] : memref<5x1x32xf32, #tpu.memory_space<vmem>>, vector<1x1x32xf32>
    %248 = vector.shape_cast %247 : vector<1x1x32xf32> to vector<1x32xf32>
    %249 = vector.broadcast %248 : vector<1x32xf32> to vector<16x32xf32>
    %250 = arith.addf %246, %249 : vector<16x32xf32>
    %c0_230 = arith.constant 0 : index
    %c0_231 = arith.constant 0 : index
    %251 = vector.load %arg10[%c0_230, %c0_231] : memref<16x32xf32, #tpu.memory_space<vmem>>, vector<16x32xf32>
    tpu.vector_store %arg10[%c0_230, %c0_231], %250 {strides = array<i32>} : memref<16x32xf32, #tpu.memory_space<vmem>>, vector<16x32xf32>,
    %c3_232 = arith.constant 3 : index
    %c0_233 = arith.constant 0 : index
    %c0_234 = arith.constant 0 : index
    %252 = vector.load %arg5[%c3_232, %c0_233, %c0_234] : memref<5x32x32xf32, #tpu.memory_space<vmem>>, vector<1x32x32xf32>
    %253 = vector.shape_cast %252 : vector<1x32x32xf32> to vector<32x32xf32>
    %cst_235 = arith.constant 0.000000e+00 : f32
    %254 = vector.broadcast %cst_235 : f32 to vector<2x32xf32>
    %c0_236 = arith.constant 0 : index
    %c0_237 = arith.constant 0 : index
    %255 = vector.load %arg10[%c0_236, %c0_237] : memref<16x32xf32, #tpu.memory_space<vmem>>, vector<2x32xf32>
    %cst_238 = arith.constant dense<0.000000e+00> : vector<2x32xf32>
    %256 = tpu.matmul %254, %253, %cst_238 {dimension_numbers = #tpu.dot_dimension_numbers<[1], [0], [0], [1], [0, 0, 1, 1], [], []>} : vector<2x32xf32>, vector<32x32xf32>, vector<2x32xf32> -> vector<2x32xf32>
    %257 = arith.addf %255, %256 : vector<2x32xf32>
    %cst_239 = arith.constant 0.000000e+00 : f32
    %258 = vector.broadcast %cst_239 : f32 to vector<2x32xf32>
    %259 = arith.maximumf %257, %258 : vector<2x32xf32>
    %c0_240 = arith.constant 0 : index
    %c0_241 = arith.constant 0 : index
    %260 = vector.load %arg11[%c0_240, %c0_241] : memref<16x32xf32, #tpu.memory_space<vmem>>, vector<2x32xf32>
    tpu.vector_store %arg11[%c0_240, %c0_241], %259 {strides = array<i32>} : memref<16x32xf32, #tpu.memory_space<vmem>>, vector<2x32xf32>,
    %c2_242 = arith.constant 2 : index
    %c0_243 = arith.constant 0 : index
    %261 = vector.load %arg10[%c2_242, %c0_243] : memref<16x32xf32, #tpu.memory_space<vmem>>, vector<2x32xf32>
    %cst_244 = arith.constant dense<0.000000e+00> : vector<2x32xf32>
    %262 = tpu.matmul %259, %253, %cst_244 {dimension_numbers = #tpu.dot_dimension_numbers<[1], [0], [0], [1], [0, 0, 1, 1], [], []>} : vector<2x32xf32>, vector<32x32xf32>, vector<2x32xf32> -> vector<2x32xf32>
    %263 = arith.addf %261, %262 : vector<2x32xf32>
    %cst_245 = arith.constant 0.000000e+00 : f32
    %264 = vector.broadcast %cst_245 : f32 to vector<2x32xf32>
    %265 = arith.maximumf %263, %264 : vector<2x32xf32>
    %c2_246 = arith.constant 2 : index
    %c0_247 = arith.constant 0 : index
    %266 = vector.load %arg11[%c2_246, %c0_247] : memref<16x32xf32, #tpu.memory_space<vmem>>, vector<2x32xf32>
    tpu.vector_store %arg11[%c2_246, %c0_247], %265 {strides = array<i32>} : memref<16x32xf32, #tpu.memory_space<vmem>>, vector<2x32xf32>,
    %c4_248 = arith.constant 4 : index
    %c0_249 = arith.constant 0 : index
    %267 = vector.load %arg10[%c4_248, %c0_249] : memref<16x32xf32, #tpu.memory_space<vmem>>, vector<2x32xf32>
    %cst_250 = arith.constant dense<0.000000e+00> : vector<2x32xf32>
    %268 = tpu.matmul %265, %253, %cst_250 {dimension_numbers = #tpu.dot_dimension_numbers<[1], [0], [0], [1], [0, 0, 1, 1], [], []>} : vector<2x32xf32>, vector<32x32xf32>, vector<2x32xf32> -> vector<2x32xf32>
    %269 = arith.addf %267, %268 : vector<2x32xf32>
    %cst_251 = arith.constant 0.000000e+00 : f32
    %270 = vector.broadcast %cst_251 : f32 to vector<2x32xf32>
    %271 = arith.maximumf %269, %270 : vector<2x32xf32>
    %c4_252 = arith.constant 4 : index
    %c0_253 = arith.constant 0 : index
    %272 = vector.load %arg11[%c4_252, %c0_253] : memref<16x32xf32, #tpu.memory_space<vmem>>, vector<2x32xf32>
    tpu.vector_store %arg11[%c4_252, %c0_253], %271 {strides = array<i32>} : memref<16x32xf32, #tpu.memory_space<vmem>>, vector<2x32xf32>,
    %c6_254 = arith.constant 6 : index
    %c0_255 = arith.constant 0 : index
    %273 = vector.load %arg10[%c6_254, %c0_255] : memref<16x32xf32, #tpu.memory_space<vmem>>, vector<2x32xf32>
    %cst_256 = arith.constant dense<0.000000e+00> : vector<2x32xf32>
    %274 = tpu.matmul %271, %253, %cst_256 {dimension_numbers = #tpu.dot_dimension_numbers<[1], [0], [0], [1], [0, 0, 1, 1], [], []>} : vector<2x32xf32>, vector<32x32xf32>, vector<2x32xf32> -> vector<2x32xf32>
    %275 = arith.addf %273, %274 : vector<2x32xf32>
    %cst_257 = arith.constant 0.000000e+00 : f32
    %276 = vector.broadcast %cst_257 : f32 to vector<2x32xf32>
    %277 = arith.maximumf %275, %276 : vector<2x32xf32>
    %c6_258 = arith.constant 6 : index
    %c0_259 = arith.constant 0 : index
    %278 = vector.load %arg11[%c6_258, %c0_259] : memref<16x32xf32, #tpu.memory_space<vmem>>, vector<2x32xf32>
    tpu.vector_store %arg11[%c6_258, %c0_259], %277 {strides = array<i32>} : memref<16x32xf32, #tpu.memory_space<vmem>>, vector<2x32xf32>,
    %c8_260 = arith.constant 8 : index
    %c0_261 = arith.constant 0 : index
    %279 = vector.load %arg10[%c8_260, %c0_261] : memref<16x32xf32, #tpu.memory_space<vmem>>, vector<2x32xf32>
    %cst_262 = arith.constant dense<0.000000e+00> : vector<2x32xf32>
    %280 = tpu.matmul %277, %253, %cst_262 {dimension_numbers = #tpu.dot_dimension_numbers<[1], [0], [0], [1], [0, 0, 1, 1], [], []>} : vector<2x32xf32>, vector<32x32xf32>, vector<2x32xf32> -> vector<2x32xf32>
    %281 = arith.addf %279, %280 : vector<2x32xf32>
    %cst_263 = arith.constant 0.000000e+00 : f32
    %282 = vector.broadcast %cst_263 : f32 to vector<2x32xf32>
    %283 = arith.maximumf %281, %282 : vector<2x32xf32>
    %c8_264 = arith.constant 8 : index
    %c0_265 = arith.constant 0 : index
    %284 = vector.load %arg11[%c8_264, %c0_265] : memref<16x32xf32, #tpu.memory_space<vmem>>, vector<2x32xf32>
    tpu.vector_store %arg11[%c8_264, %c0_265], %283 {strides = array<i32>} : memref<16x32xf32, #tpu.memory_space<vmem>>, vector<2x32xf32>,
    %c10_266 = arith.constant 10 : index
    %c0_267 = arith.constant 0 : index
    %285 = vector.load %arg10[%c10_266, %c0_267] : memref<16x32xf32, #tpu.memory_space<vmem>>, vector<2x32xf32>
    %cst_268 = arith.constant dense<0.000000e+00> : vector<2x32xf32>
    %286 = tpu.matmul %283, %253, %cst_268 {dimension_numbers = #tpu.dot_dimension_numbers<[1], [0], [0], [1], [0, 0, 1, 1], [], []>} : vector<2x32xf32>, vector<32x32xf32>, vector<2x32xf32> -> vector<2x32xf32>
    %287 = arith.addf %285, %286 : vector<2x32xf32>
    %cst_269 = arith.constant 0.000000e+00 : f32
    %288 = vector.broadcast %cst_269 : f32 to vector<2x32xf32>
    %289 = arith.maximumf %287, %288 : vector<2x32xf32>
    %c10_270 = arith.constant 10 : index
    %c0_271 = arith.constant 0 : index
    %290 = vector.load %arg11[%c10_270, %c0_271] : memref<16x32xf32, #tpu.memory_space<vmem>>, vector<2x32xf32>
    tpu.vector_store %arg11[%c10_270, %c0_271], %289 {strides = array<i32>} : memref<16x32xf32, #tpu.memory_space<vmem>>, vector<2x32xf32>,
    %c12_272 = arith.constant 12 : index
    %c0_273 = arith.constant 0 : index
    %291 = vector.load %arg10[%c12_272, %c0_273] : memref<16x32xf32, #tpu.memory_space<vmem>>, vector<2x32xf32>
    %cst_274 = arith.constant dense<0.000000e+00> : vector<2x32xf32>
    %292 = tpu.matmul %289, %253, %cst_274 {dimension_numbers = #tpu.dot_dimension_numbers<[1], [0], [0], [1], [0, 0, 1, 1], [], []>} : vector<2x32xf32>, vector<32x32xf32>, vector<2x32xf32> -> vector<2x32xf32>
    %293 = arith.addf %291, %292 : vector<2x32xf32>
    %cst_275 = arith.constant 0.000000e+00 : f32
    %294 = vector.broadcast %cst_275 : f32 to vector<2x32xf32>
    %295 = arith.maximumf %293, %294 : vector<2x32xf32>
    %c12_276 = arith.constant 12 : index
    %c0_277 = arith.constant 0 : index
    %296 = vector.load %arg11[%c12_276, %c0_277] : memref<16x32xf32, #tpu.memory_space<vmem>>, vector<2x32xf32>
    tpu.vector_store %arg11[%c12_276, %c0_277], %295 {strides = array<i32>} : memref<16x32xf32, #tpu.memory_space<vmem>>, vector<2x32xf32>,
    %c14_278 = arith.constant 14 : index
    %c0_279 = arith.constant 0 : index
    %297 = vector.load %arg10[%c14_278, %c0_279] : memref<16x32xf32, #tpu.memory_space<vmem>>, vector<2x32xf32>
    %cst_280 = arith.constant dense<0.000000e+00> : vector<2x32xf32>
    %298 = tpu.matmul %295, %253, %cst_280 {dimension_numbers = #tpu.dot_dimension_numbers<[1], [0], [0], [1], [0, 0, 1, 1], [], []>} : vector<2x32xf32>, vector<32x32xf32>, vector<2x32xf32> -> vector<2x32xf32>
    %299 = arith.addf %297, %298 : vector<2x32xf32>
    %cst_281 = arith.constant 0.000000e+00 : f32
    %300 = vector.broadcast %cst_281 : f32 to vector<2x32xf32>
    %301 = arith.maximumf %299, %300 : vector<2x32xf32>
    %c14_282 = arith.constant 14 : index
    %c0_283 = arith.constant 0 : index
    %302 = vector.load %arg11[%c14_282, %c0_283] : memref<16x32xf32, #tpu.memory_space<vmem>>, vector<2x32xf32>
    tpu.vector_store %arg11[%c14_282, %c0_283], %301 {strides = array<i32>} : memref<16x32xf32, #tpu.memory_space<vmem>>, vector<2x32xf32>,
    %c0_284 = arith.constant 0 : index
    %c0_285 = arith.constant 0 : index
    %303 = vector.load %arg11[%c0_284, %c0_285] : memref<16x32xf32, #tpu.memory_space<vmem>>, vector<16x32xf32>
    %c3_286 = arith.constant 3 : index
    %c0_287 = arith.constant 0 : index
    %c0_288 = arith.constant 0 : index
    %304 = vector.load %arg4[%c3_286, %c0_287, %c0_288] : memref<4x32x32xf32, #tpu.memory_space<vmem>>, vector<1x32x32xf32>
    %305 = vector.shape_cast %304 : vector<1x32x32xf32> to vector<32x32xf32>
    %cst_289 = arith.constant dense<0.000000e+00> : vector<16x32xf32>
    %306 = tpu.matmul %303, %305, %cst_289 {dimension_numbers = #tpu.dot_dimension_numbers<[1], [0], [0], [1], [0, 0, 1, 1], [], []>} : vector<16x32xf32>, vector<32x32xf32>, vector<16x32xf32> -> vector<16x32xf32>
    %c4_290 = arith.constant 4 : index
    %c0_291 = arith.constant 0 : index
    %c0_292 = arith.constant 0 : index
    %307 = vector.load %arg6[%c4_290, %c0_291, %c0_292] : memref<5x1x32xf32, #tpu.memory_space<vmem>>, vector<1x1x32xf32>
    %308 = vector.shape_cast %307 : vector<1x1x32xf32> to vector<1x32xf32>
    %309 = vector.broadcast %308 : vector<1x32xf32> to vector<16x32xf32>
    %310 = arith.addf %306, %309 : vector<16x32xf32>
    %c0_293 = arith.constant 0 : index
    %c0_294 = arith.constant 0 : index
    %311 = vector.load %arg10[%c0_293, %c0_294] : memref<16x32xf32, #tpu.memory_space<vmem>>, vector<16x32xf32>
    tpu.vector_store %arg10[%c0_293, %c0_294], %310 {strides = array<i32>} : memref<16x32xf32, #tpu.memory_space<vmem>>, vector<16x32xf32>,
    %c4_295 = arith.constant 4 : index
    %c0_296 = arith.constant 0 : index
    %c0_297 = arith.constant 0 : index
    %312 = vector.load %arg5[%c4_295, %c0_296, %c0_297] : memref<5x32x32xf32, #tpu.memory_space<vmem>>, vector<1x32x32xf32>
    %313 = vector.shape_cast %312 : vector<1x32x32xf32> to vector<32x32xf32>
    %cst_298 = arith.constant 0.000000e+00 : f32
    %314 = vector.broadcast %cst_298 : f32 to vector<2x32xf32>
    %c0_299 = arith.constant 0 : index
    %c0_300 = arith.constant 0 : index
    %315 = vector.load %arg10[%c0_299, %c0_300] : memref<16x32xf32, #tpu.memory_space<vmem>>, vector<2x32xf32>
    %cst_301 = arith.constant dense<0.000000e+00> : vector<2x32xf32>
    %316 = tpu.matmul %314, %313, %cst_301 {dimension_numbers = #tpu.dot_dimension_numbers<[1], [0], [0], [1], [0, 0, 1, 1], [], []>} : vector<2x32xf32>, vector<32x32xf32>, vector<2x32xf32> -> vector<2x32xf32>
    %317 = arith.addf %315, %316 : vector<2x32xf32>
    %cst_302 = arith.constant 0.000000e+00 : f32
    %318 = vector.broadcast %cst_302 : f32 to vector<2x32xf32>
    %319 = arith.maximumf %317, %318 : vector<2x32xf32>
    %c0_303 = arith.constant 0 : index
    %c0_304 = arith.constant 0 : index
    %320 = vector.load %arg11[%c0_303, %c0_304] : memref<16x32xf32, #tpu.memory_space<vmem>>, vector<2x32xf32>
    tpu.vector_store %arg11[%c0_303, %c0_304], %319 {strides = array<i32>} : memref<16x32xf32, #tpu.memory_space<vmem>>, vector<2x32xf32>,
    %c2_305 = arith.constant 2 : index
    %c0_306 = arith.constant 0 : index
    %321 = vector.load %arg10[%c2_305, %c0_306] : memref<16x32xf32, #tpu.memory_space<vmem>>, vector<2x32xf32>
    %cst_307 = arith.constant dense<0.000000e+00> : vector<2x32xf32>
    %322 = tpu.matmul %319, %313, %cst_307 {dimension_numbers = #tpu.dot_dimension_numbers<[1], [0], [0], [1], [0, 0, 1, 1], [], []>} : vector<2x32xf32>, vector<32x32xf32>, vector<2x32xf32> -> vector<2x32xf32>
    %323 = arith.addf %321, %322 : vector<2x32xf32>
    %cst_308 = arith.constant 0.000000e+00 : f32
    %324 = vector.broadcast %cst_308 : f32 to vector<2x32xf32>
    %325 = arith.maximumf %323, %324 : vector<2x32xf32>
    %c2_309 = arith.constant 2 : index
    %c0_310 = arith.constant 0 : index
    %326 = vector.load %arg11[%c2_309, %c0_310] : memref<16x32xf32, #tpu.memory_space<vmem>>, vector<2x32xf32>
    tpu.vector_store %arg11[%c2_309, %c0_310], %325 {strides = array<i32>} : memref<16x32xf32, #tpu.memory_space<vmem>>, vector<2x32xf32>,
    %c4_311 = arith.constant 4 : index
    %c0_312 = arith.constant 0 : index
    %327 = vector.load %arg10[%c4_311, %c0_312] : memref<16x32xf32, #tpu.memory_space<vmem>>, vector<2x32xf32>
    %cst_313 = arith.constant dense<0.000000e+00> : vector<2x32xf32>
    %328 = tpu.matmul %325, %313, %cst_313 {dimension_numbers = #tpu.dot_dimension_numbers<[1], [0], [0], [1], [0, 0, 1, 1], [], []>} : vector<2x32xf32>, vector<32x32xf32>, vector<2x32xf32> -> vector<2x32xf32>
    %329 = arith.addf %327, %328 : vector<2x32xf32>
    %cst_314 = arith.constant 0.000000e+00 : f32
    %330 = vector.broadcast %cst_314 : f32 to vector<2x32xf32>
    %331 = arith.maximumf %329, %330 : vector<2x32xf32>
    %c4_315 = arith.constant 4 : index
    %c0_316 = arith.constant 0 : index
    %332 = vector.load %arg11[%c4_315, %c0_316] : memref<16x32xf32, #tpu.memory_space<vmem>>, vector<2x32xf32>
    tpu.vector_store %arg11[%c4_315, %c0_316], %331 {strides = array<i32>} : memref<16x32xf32, #tpu.memory_space<vmem>>, vector<2x32xf32>,
    %c6_317 = arith.constant 6 : index
    %c0_318 = arith.constant 0 : index
    %333 = vector.load %arg10[%c6_317, %c0_318] : memref<16x32xf32, #tpu.memory_space<vmem>>, vector<2x32xf32>
    %cst_319 = arith.constant dense<0.000000e+00> : vector<2x32xf32>
    %334 = tpu.matmul %331, %313, %cst_319 {dimension_numbers = #tpu.dot_dimension_numbers<[1], [0], [0], [1], [0, 0, 1, 1], [], []>} : vector<2x32xf32>, vector<32x32xf32>, vector<2x32xf32> -> vector<2x32xf32>
    %335 = arith.addf %333, %334 : vector<2x32xf32>
    %cst_320 = arith.constant 0.000000e+00 : f32
    %336 = vector.broadcast %cst_320 : f32 to vector<2x32xf32>
    %337 = arith.maximumf %335, %336 : vector<2x32xf32>
    %c6_321 = arith.constant 6 : index
    %c0_322 = arith.constant 0 : index
    %338 = vector.load %arg11[%c6_321, %c0_322] : memref<16x32xf32, #tpu.memory_space<vmem>>, vector<2x32xf32>
    tpu.vector_store %arg11[%c6_321, %c0_322], %337 {strides = array<i32>} : memref<16x32xf32, #tpu.memory_space<vmem>>, vector<2x32xf32>,
    %c8_323 = arith.constant 8 : index
    %c0_324 = arith.constant 0 : index
    %339 = vector.load %arg10[%c8_323, %c0_324] : memref<16x32xf32, #tpu.memory_space<vmem>>, vector<2x32xf32>
    %cst_325 = arith.constant dense<0.000000e+00> : vector<2x32xf32>
    %340 = tpu.matmul %337, %313, %cst_325 {dimension_numbers = #tpu.dot_dimension_numbers<[1], [0], [0], [1], [0, 0, 1, 1], [], []>} : vector<2x32xf32>, vector<32x32xf32>, vector<2x32xf32> -> vector<2x32xf32>
    %341 = arith.addf %339, %340 : vector<2x32xf32>
    %cst_326 = arith.constant 0.000000e+00 : f32
    %342 = vector.broadcast %cst_326 : f32 to vector<2x32xf32>
    %343 = arith.maximumf %341, %342 : vector<2x32xf32>
    %c8_327 = arith.constant 8 : index
    %c0_328 = arith.constant 0 : index
    %344 = vector.load %arg11[%c8_327, %c0_328] : memref<16x32xf32, #tpu.memory_space<vmem>>, vector<2x32xf32>
    tpu.vector_store %arg11[%c8_327, %c0_328], %343 {strides = array<i32>} : memref<16x32xf32, #tpu.memory_space<vmem>>, vector<2x32xf32>,
    %c10_329 = arith.constant 10 : index
    %c0_330 = arith.constant 0 : index
    %345 = vector.load %arg10[%c10_329, %c0_330] : memref<16x32xf32, #tpu.memory_space<vmem>>, vector<2x32xf32>
    %cst_331 = arith.constant dense<0.000000e+00> : vector<2x32xf32>
    %346 = tpu.matmul %343, %313, %cst_331 {dimension_numbers = #tpu.dot_dimension_numbers<[1], [0], [0], [1], [0, 0, 1, 1], [], []>} : vector<2x32xf32>, vector<32x32xf32>, vector<2x32xf32> -> vector<2x32xf32>
    %347 = arith.addf %345, %346 : vector<2x32xf32>
    %cst_332 = arith.constant 0.000000e+00 : f32
    %348 = vector.broadcast %cst_332 : f32 to vector<2x32xf32>
    %349 = arith.maximumf %347, %348 : vector<2x32xf32>
    %c10_333 = arith.constant 10 : index
    %c0_334 = arith.constant 0 : index
    %350 = vector.load %arg11[%c10_333, %c0_334] : memref<16x32xf32, #tpu.memory_space<vmem>>, vector<2x32xf32>
    tpu.vector_store %arg11[%c10_333, %c0_334], %349 {strides = array<i32>} : memref<16x32xf32, #tpu.memory_space<vmem>>, vector<2x32xf32>,
    %c12_335 = arith.constant 12 : index
    %c0_336 = arith.constant 0 : index
    %351 = vector.load %arg10[%c12_335, %c0_336] : memref<16x32xf32, #tpu.memory_space<vmem>>, vector<2x32xf32>
    %cst_337 = arith.constant dense<0.000000e+00> : vector<2x32xf32>
    %352 = tpu.matmul %349, %313, %cst_337 {dimension_numbers = #tpu.dot_dimension_numbers<[1], [0], [0], [1], [0, 0, 1, 1], [], []>} : vector<2x32xf32>, vector<32x32xf32>, vector<2x32xf32> -> vector<2x32xf32>
    %353 = arith.addf %351, %352 : vector<2x32xf32>
    %cst_338 = arith.constant 0.000000e+00 : f32
    %354 = vector.broadcast %cst_338 : f32 to vector<2x32xf32>
    %355 = arith.maximumf %353, %354 : vector<2x32xf32>
    %c12_339 = arith.constant 12 : index
    %c0_340 = arith.constant 0 : index
    %356 = vector.load %arg11[%c12_339, %c0_340] : memref<16x32xf32, #tpu.memory_space<vmem>>, vector<2x32xf32>
    tpu.vector_store %arg11[%c12_339, %c0_340], %355 {strides = array<i32>} : memref<16x32xf32, #tpu.memory_space<vmem>>, vector<2x32xf32>,
    %c14_341 = arith.constant 14 : index
    %c0_342 = arith.constant 0 : index
    %357 = vector.load %arg10[%c14_341, %c0_342] : memref<16x32xf32, #tpu.memory_space<vmem>>, vector<2x32xf32>
    %cst_343 = arith.constant dense<0.000000e+00> : vector<2x32xf32>
    %358 = tpu.matmul %355, %313, %cst_343 {dimension_numbers = #tpu.dot_dimension_numbers<[1], [0], [0], [1], [0, 0, 1, 1], [], []>} : vector<2x32xf32>, vector<32x32xf32>, vector<2x32xf32> -> vector<2x32xf32>
    %359 = arith.addf %357, %358 : vector<2x32xf32>
    %cst_344 = arith.constant 0.000000e+00 : f32
    %360 = vector.broadcast %cst_344 : f32 to vector<2x32xf32>
    %361 = arith.maximumf %359, %360 : vector<2x32xf32>
    %c14_345 = arith.constant 14 : index
    %c0_346 = arith.constant 0 : index
    %362 = vector.load %arg11[%c14_345, %c0_346] : memref<16x32xf32, #tpu.memory_space<vmem>>, vector<2x32xf32>
    tpu.vector_store %arg11[%c14_345, %c0_346], %361 {strides = array<i32>} : memref<16x32xf32, #tpu.memory_space<vmem>>, vector<2x32xf32>,
    %c0_347 = arith.constant 0 : index
    %c0_348 = arith.constant 0 : index
    %363 = vector.load %arg7[%c0_347, %c0_348] : memref<32x128xf32, #tpu.memory_space<vmem>>, vector<32x128xf32>
    %cst_349 = arith.constant dense<0.000000e+00> : vector<2x128xf32>
    %364 = tpu.matmul %361, %363, %cst_349 {dimension_numbers = #tpu.dot_dimension_numbers<[1], [0], [0], [1], [0, 0, 1, 1], [], []>} : vector<2x32xf32>, vector<32x128xf32>, vector<2x128xf32> -> vector<2x128xf32>
    %c0_350 = arith.constant 0 : index
    %c0_351 = arith.constant 0 : index
    %365 = vector.load %arg8[%c0_350, %c0_351] : memref<1x128xf32, #tpu.memory_space<vmem>>, vector<1x128xf32>
    %366 = vector.broadcast %365 : vector<1x128xf32> to vector<2x128xf32>
    %367 = arith.addf %364, %366 : vector<2x128xf32>
    %cst_352 = arith.constant dense<0xFF800000> : vector<2xf32>
    %368 = vector.multi_reduction <maximumf>, %367, %cst_352 [1] : vector<2x128xf32> to vector<2xf32>
    %369 = vector.shape_cast %368 : vector<2xf32> to vector<2x1xf32>
    %370 = vector.broadcast %369 : vector<2x1xf32> to vector<2x128xf32>
    %371 = arith.subf %367, %370 : vector<2x128xf32>
    %372 = math.exp %371 : vector<2x128xf32>
    %cst_353 = arith.constant dense<0.000000e+00> : vector<2xf32>
    %373 = vector.multi_reduction <add>, %372, %cst_353 [1] : vector<2x128xf32> to vector<2xf32>
    %374 = vector.shape_cast %373 : vector<2xf32> to vector<2x1xf32>
    %375 = tpu.reciprocal %374 : vector<2x1xf32> -> vector<2x1xf32>
    %376 = vector.broadcast %375 : vector<2x1xf32> to vector<2x128xf32>
    %377 = arith.mulf %372, %376 : vector<2x128xf32>
    %c0_354 = arith.constant 0 : index
    %c0_355 = arith.constant 0 : index
    %378 = vector.load %arg9[%c0_354, %c0_355] : memref<2x128xf32, #tpu.memory_space<vmem>>, vector<2x128xf32>
    tpu.vector_store %arg9[%c0_354, %c0_355], %377 {strides = array<i32>} : memref<2x128xf32, #tpu.memory_space<vmem>>, vector<2x128xf32>,
    return
  }
  func.func @transform_0(%arg0: i32) -> (i32, i32, i32) {
    %c0_i32 = arith.constant 0 : i32
    %c0_i32_0 = arith.constant 0 : i32
    %c0_i32_1 = arith.constant 0 : i32
    return %c0_i32, %arg0, %c0_i32_0 : i32, i32, i32
  }
  func.func @transform_1(%arg0: i32) -> (i32, i32) {
    %c0_i32 = arith.constant 0 : i32
    %c0_i32_0 = arith.constant 0 : i32
    %c0_i32_1 = arith.constant 0 : i32
    return %c0_i32, %c0_i32_0 : i32, i32
  }
  func.func @transform_2(%arg0: i32) -> (i32, i32) {
    %c0_i32 = arith.constant 0 : i32
    %c0_i32_0 = arith.constant 0 : i32
    %c0_i32_1 = arith.constant 0 : i32
    return %c0_i32, %c0_i32_0 : i32, i32
  }
  func.func @transform_3(%arg0: i32) -> (i32, i32, i32) {
    %c0_i32 = arith.constant 0 : i32
    %c0_i32_0 = arith.constant 0 : i32
    %c0_i32_1 = arith.constant 0 : i32
    %c0_i32_2 = arith.constant 0 : i32
    return %c0_i32, %c0_i32_0, %c0_i32_1 : i32, i32, i32
  }
  func.func @transform_4(%arg0: i32) -> (i32, i32, i32) {
    %c0_i32 = arith.constant 0 : i32
    %c0_i32_0 = arith.constant 0 : i32
    %c0_i32_1 = arith.constant 0 : i32
    %c0_i32_2 = arith.constant 0 : i32
    return %c0_i32, %c0_i32_0, %c0_i32_1 : i32, i32, i32
  }
  func.func @transform_5(%arg0: i32) -> (i32, i32, i32) {
    %c0_i32 = arith.constant 0 : i32
    %c0_i32_0 = arith.constant 0 : i32
    %c0_i32_1 = arith.constant 0 : i32
    %c0_i32_2 = arith.constant 0 : i32
    return %c0_i32, %c0_i32_0, %c0_i32_1 : i32, i32, i32
  }
  func.func @transform_6(%arg0: i32) -> (i32, i32) {
    %c0_i32 = arith.constant 0 : i32
    %c0_i32_0 = arith.constant 0 : i32
    %c0_i32_1 = arith.constant 0 : i32
    return %c0_i32, %c0_i32_0 : i32, i32
  }
  func.func @transform_7(%arg0: i32) -> (i32, i32) {
    %c0_i32 = arith.constant 0 : i32
    %c0_i32_0 = arith.constant 0 : i32
    %c0_i32_1 = arith.constant 0 : i32
    return %c0_i32, %c0_i32_0 : i32, i32
  }
  func.func @transform_8(%arg0: i32) -> (i32, i32) {
    %c0_i32 = arith.constant 0 : i32
    %c0_i32_0 = arith.constant 0 : i32
    return %arg0, %c0_i32 : i32, i32
  }
}

</mosaic_0001>

<bundles_post_ra>
// kernel: tpu_custom_call.1
= control target key start
LH: loop header
LB: loop body
LE: loop exit
PB: predicated region body
PF: predicated region fallthrough
CT: control target
= control target key end

     0   :  { %v6640_v7 = vmov 0   ;;  %vm123_vm0 = vcmask 392192   ;;  %s7728_s0 = inlined_call_operand.vmem [shape: s32[8,2,1], index: 0, kind: input, shape index: {}]   ;;  %s7729_s1 = inlined_call_operand.vmem [shape: f32[128,304], index: 1, kind: input, shape index: {}]   ;;  %s7730_s2 = inlined_call_operand.vmem [shape: f32[304,32], index: 2, kind: input, shape index: {}]   ;;  %s7731_s3 = inlined_call_operand.vmem [shape: f32[4,32,32], index: 3, kind: input, shape index: {}]   ;;  %s7732_s4 = inlined_call_operand.vmem [shape: f32[5,32,32], index: 4, kind: input, shape index: {}]   ;;  %s7733_s5 = inlined_call_operand.vmem [shape: f32[5,1,32], index: 5, kind: input, shape index: {}]   ;;  %s7734_s6 = inlined_call_operand.vmem [shape: f32[32,128], index: 6, kind: input, shape index: {}]   ;;  %s7735_s7 = inlined_call_operand.vmem [shape: f32[1,128], index: 7, kind: input, shape index: {}]   ;;  %s7736_s8 = inlined_call_operand.hbm [shape: f32[2,128], index: 8, kind: output, shape index: {}]  }
   0x1   :  { %v94_v0 = vld [vmem:[%s7730_s2 + $0x80] sm:$0xff]  ;;  %v95_v1 = vld [vmem:[%s7730_s2 + $0x88] sm:$0xff]  ;;  %v96_v5 = vld [vmem:[%s7730_s2 + $0x90] sm:$0xff]  ;;  %6610 = vset.pattern.permute.xlu0 %v6640_v7  ;;  %6611 = vset.pattern.permute.xlu1 %v6640_v7 }
   0x2   :  { %v78_v2 = vld [vmem:[%s7730_s2] sm:$0xff]  ;;  %v6090_v3 = vpack.c.bf16 %v95_v1, %v94_v0  ;;  %v79_v4 = vld [vmem:[%s7730_s2 + $0x8] sm:$0xff]  ;;  %v97_v6 = vld [vmem:[%s7730_s2 + $0x98] sm:$0xff] }
   0x3   :  { %v6092_v8 = vpack.c.bf16 %v79_v4, %v78_v2  ;;  %v6094_v9 = vpack.c.bf16 %v97_v6, %v96_v5  ;;  %v80_v10 = vld [vmem:[%s7730_s2 + $0x10] sm:$0xff]  ;;  %v81_v11 = vld [vmem:[%s7730_s2 + $0x18] sm:$0xff]  ;;  %v98_v12 = vld [vmem:[%s7730_s2 + $0xa0] sm:$0xff] }
   0x4   :  { %6091 = vmatprep.subr.bf16.mxu0 %v6090_v3  ;;  %v99_v13 = vld [vmem:[%s7730_s2 + $0xa8] sm:$0xff]  ;;  %v6096_v14 = vpack.c.bf16 %v81_v11, %v80_v10  ;;  %v82_v16 = vld [vmem:[%s7730_s2 + $0x20] sm:$0xff]  ;;  %v100_v18 = vld [vmem:[%s7730_s2 + $0xb0] sm:$0xff] }
   0x5   :  { %6093 = vmatpush3.bf16.msra.mxu0 %v6092_v8  ;;  %v6098_v15 = vpack.c.bf16 %v99_v13, %v98_v12  ;;  %v83_v17 = vld [vmem:[%s7730_s2 + $0x28] sm:$0xff]  ;;  %v101_v19 = vld [vmem:[%s7730_s2 + $0xb8] sm:$0xff]  ;;  %v110_v21 = vld [vmem:[%s7730_s2 + $0x100] sm:$0xff] }
   0x6   :  { %6095 = vmatprep.subr.bf16.mxu0 %v6094_v9  ;;  %v6100_v20 = vpack.c.bf16 %v83_v17, %v82_v16  ;;  %v6102_v22 = vpack.c.bf16 %v101_v19, %v100_v18  ;;  %v84_v23 = vld [vmem:[%s7730_s2 + $0x30] sm:$0xff]  ;;  %v85_v24 = vld [vmem:[%s7730_s2 + $0x38] sm:$0xff]  ;;  %v111_v25 = vld [vmem:[%s7730_s2 + $0x108] sm:$0xff] }
   0x7   :  { %v102_v26 = vld [vmem:[%s7730_s2 + $0xc0] sm:$0xff]  ;;  %v103_v27 = vld [vmem:[%s7730_s2 + $0xc8] sm:$0xff]  ;;  %v6122_v28 = vpack.c.bf16 %v111_v25, %v110_v21  ;;  %v112_v29 = vld [vmem:[%s7730_s2 + $0x110] sm:$0xff]  ;;  %v6104_v31 = vpack.c.bf16 %v85_v24, %v84_v23 }
   0x8   :  { %v113_v30 = vld [vmem:[%s7730_s2 + $0x118] sm:$0xff]  ;;  %v86_v32 = vld [vmem:[%s7730_s2 + $0x40] sm:$0xff]  ;;  %v31_v34 = vld [vmem:[%s7729_s1 + $0x8] sm:$0xff]  ;;  %v6106_v36 = vpack.c.bf16 %v103_v27, %v102_v26 }
   0x9   :  { %6097 = vmatpush3.bf16.msra.mxu0 %v6096_v14  ;;  %6123 = vmatprep.subr.bf16.mxu1 %v6122_v28  ;;  %v6126_v33 = vpack.c.bf16 %v113_v30, %v112_v29  ;;  %v114_v35 = vld [vmem:[%s7730_s2 + $0x120] sm:$0xff]  ;;  %v87_v37 = vld [vmem:[%s7730_s2 + $0x48] sm:$0xff]  ;;  %v32_v39 = vld [vmem:[%s7729_s1 + $0x10] sm:$0xff] }
   0xa   :  { %6099 = vmatprep.subr.bf16.mxu0 %v6098_v15  ;;  %6125 = vmatpush3.bf16.msra.mxu1 %v6122_v28  ;;  %v115_v38 = vld [vmem:[%s7730_s2 + $0x128] sm:$0xff]  ;;  %v104_v40 = vld [vmem:[%s7730_s2 + $0xd0] sm:$0xff]  ;;  %v105_v41 = vld [vmem:[%s7730_s2 + $0xd8] sm:$0xff]  ;;  %v6108_v43 = vpack.c.bf16 %v87_v37, %v86_v32 }
   0xb   :  { %6127 = vmatprep.subr.bf16.mxu1 %v6126_v33  ;;  %236 = vmatprep.mubr.f32.mxu0 %v31_v34  ;;  %v6130_v42 = vpack.c.bf16 %v115_v38, %v114_v35  ;;  %v6110_v44 = vpack.c.bf16 %v105_v41, %v104_v40  ;;  %v88_v45 = vld [vmem:[%s7730_s2 + $0x50] sm:$0xff]  ;;  %v89_v46 = vld [vmem:[%s7730_s2 + $0x58] sm:$0xff]  ;;  %v106_v47 = vld [vmem:[%s7730_s2 + $0xe0] sm:$0xff] }
   0xc   :  { %5291 = vmatprep.mubr.msk.f32.mxu1 %vm123_vm0, %v32_v39  ;;  %v107_v48 = vld [vmem:[%s7730_s2 + $0xe8] sm:$0xff]  ;;  %v6112_v49 = vpack.c.bf16 %v89_v46, %v88_v45  ;;  %v90_v51 = vld [vmem:[%s7730_s2 + $0x60] sm:$0xff]  ;;  %v108_v54 = vld [vmem:[%s7730_s2 + $0xf0] sm:$0xff] }
   0xd   :  { %6101 = vmatpush3.bf16.msra.mxu0 %v6100_v20  ;;  %v6114_v50 = vpack.c.bf16 %v107_v48, %v106_v47  ;;  %v91_v52 = vld [vmem:[%s7730_s2 + $0x68] sm:$0xff]  ;;  %v109_v55 = vld [vmem:[%s7730_s2 + $0xf8] sm:$0xff]  ;;  %v38_v56 = vld [vmem:[%s7729_s1 + $0x40] sm:$0xff] }
   0xe   :  { %6103 = vmatprep.subr.bf16.mxu0 %v6102_v22  ;;  %6129 = vmatpush3.bf16.msra.mxu1 %v6126_v33  ;;  %v35_v53 = vld [vmem:[%s7729_s1 + $0x28] sm:$0xff]  ;;  %v6116_v57 = vpack.c.bf16 %v91_v52, %v90_v51  ;;  %v6118_v58 = vpack.c.bf16 %v109_v55, %v108_v54  ;;  %v92_v59 = vld [vmem:[%s7730_s2 + $0x70] sm:$0xff]  ;;  %v93_v60 = vld [vmem:[%s7730_s2 + $0x78] sm:$0xff] }
   0xf   :  { %6131 = vmatprep.subr.bf16.mxu1 %v6130_v42  ;;  %v41_v61 = vld [vmem:[%s7729_s1 + $0x58] sm:$0xff]  ;;  %v44_v62 = vld [vmem:[%s7729_s1 + $0x70] sm:$0xff]  ;;  %v6120_v63 = vpack.c.bf16 %v93_v60, %v92_v59  ;;  %v4713_v0 = vld [vmem:[%s7728_s0 + $0x4] sm:$0x3] }
  0x10   :  { %v47_v1 = vld [vmem:[%s7729_s1 + $0x88] sm:$0xff]  ;;  %v464_v2 = vld [vmem:[%s7728_s0] sm:$0x3]  ;;  %625 = vperm.xlu0 %6610, %v4713_v0  }
  0x11   :  { %6105 = vmatpush3.bf16.msra.mxu0 %v6104_v31  ;;  %v50_v3 = vld [vmem:[%s7729_s1 + $0xa0] sm:$0xff]  ;;  %466 = vperm.xlu1 %6611, %v464_v2  }
  0x12   :  { %6107 = vmatprep.subr.bf16.mxu0 %v6106_v36  ;;  %6133 = vmatpush3.bf16.msra.mxu1 %v6130_v42 }
  0x15   :  { %6109 = vmatpush3.bf16.msra.mxu0 %v6108_v43  ;;  %5292 = vmatmul.mubr.msk.f32.vlgmr.msra.gmra.mrb[0].mxu1 %vm123_vm0, %v35_v53 }
  0x16   :  { %6111 = vmatprep.subr.bf16.mxu0 %v6110_v44  ;;  %5294 = vmatprep.mubr.msk.f32.mxu1 %vm123_vm0, %v38_v56 }
  0x19   :  { %6113 = vmatpush3.bf16.msra.mxu0 %v6112_v49  ;;  %5295 = vmatmul.mubr.msk.f32.gmra.mrb[2].mxu1 %vm123_vm0, %v41_v61 }
  0x1a   :  { %6115 = vmatprep.subr.bf16.mxu0 %v6114_v50  ;;  %5297 = vmatprep.mubr.msk.f32.mxu1 %vm123_vm0, %v44_v62 }
  0x1d   :  { %6117 = vmatpush3.bf16.msra.mxu0 %v6116_v57 }
  0x1e   :  { %6119 = vmatprep.subr.bf16.mxu0 %v6118_v58 }
  0x1f   :  { %13 = vsyncpa [#allocation5], 0  ;;  %v4719_v4 = vld [vmem:[%s7728_s0 + $0x8] sm:$0x3]  ;;  %v30_v5 = vld [vmem:[%s7729_s1] sm:$0xff]  ;;  %5298 = vmatmul.mubr.msk.f32.gmra.mrb[4].mxu1 %vm123_vm0, %v47_v1  ;;  %v6641_v50 = vmov 0.0|0.0  }
  0x20   :  { %v34_v6 = vld [vmem:[%s7729_s1 + $0x20] sm:$0xff]  ;;  %5300 = vmatprep.mubr.msk.f32.mxu1 %vm123_vm0, %v50_v3  ;;  %v53_v7 = vld [vmem:[%s7729_s1 + $0xb8] sm:$0xff]  ;;  %v56_v8 = vld [vmem:[%s7729_s1 + $0xd0] sm:$0xff]  ;;  %783 = vperm.xlu0 %6610, %v4719_v4   ;;  %vm6642_vm1 = vmmov 0   ;;  %v6643_v51 = vmov 0.0   ;;  %vm541_vm10 = vcmask 254976  }
  0x21   :  { %6121 = vmatpush3.bf16.msra.mxu0 %v6120_v63  ;;  %v4710_v9 = vld [vmem:[%s7728_s0 + $0x2] sm:$0x3]  ;;  %v33_v10 = vld [vmem:[%s7729_s1 + $0x18] sm:$0xff]  ;;  %v59_v12 = vld [vmem:[%s7729_s1 + $0xe8] sm:$0xff]  ;;  %6134 = vmatprep.subr.bf16.mxu1 %v6641_v50  ;;  %vm1101_vm11 = vcmask 261120   ;;  %vm4664_vm12 = vcmask 1041408  }
  0x22   :  { %v37_v11 = vld [vmem:[%s7729_s1 + $0x38] sm:$0xff]  ;;  %v62_v13 = vld [vmem:[%s7729_s1 + $0x100] sm:$0xff]  ;;  %v4722_v14 = vld [vmem:[%s7728_s0 + $0xa] sm:$0x3]  ;;  %6182 = vmatprep.subr.bf16.mxu0 %v6641_v50 }
  0x23   :  { %5301 = vmatmul.mubr.msk.f32.gmra.mrb[6].mxu1 %vm123_vm0, %v53_v7  ;;  %v36_v15 = vld [vmem:[%s7729_s1 + $0x30] sm:$0xff]  ;;  %v65_v17 = vld [vmem:[%s7729_s1 + $0x118] sm:$0xff]  ;;  %v39_v19 = vld [vmem:[%s7729_s1 + $0x48] sm:$0xff] }
  0x24   :  { %237 = vmatmul.mubr.f32.vlgmr.msra.gmra.mrb[0].mxu0 %v30_v5  ;;  %5303 = vmatprep.mubr.msk.f32.mxu1 %vm123_vm0, %v56_v8  ;;  %v40_v16 = vld [vmem:[%s7729_s1 + $0x50] sm:$0xff]  ;;  %v43_v20 = vld [vmem:[%s7729_s1 + $0x68] sm:$0xff]  ;;  %v74_v22 = vld [vmem:[%s7729_s1 + $0x160] sm:$0xff] }
  0x25   :  { %241 = vmatprep.mubr.f32.mxu0 %v34_v6  ;;  %546 = vperm.xlu0 %6610, %v4710_v9   ;;  %v68_v18 = vld [vmem:[%s7729_s1 + $0x130] sm:$0xff]  ;;  %v71_v21 = vld [vmem:[%s7729_s1 + $0x148] sm:$0xff]  ;;  %v42_v23 = vld [vmem:[%s7729_s1 + $0x60] sm:$0xff] }
  0x26   :  { %v46_v24 = vld [vmem:[%s7729_s1 + $0x80] sm:$0xff]  ;;  %v77_v25 = vld [vmem:[%s7729_s1 + $0x178] sm:$0xff]  ;;  %v48_v28 = vld [vmem:[%s7729_s1 + $0x90] sm:$0xff] }
  0x27   :  { %5304 = vmatmul.mubr.msk.f32.gmra.mrb[8].mxu1 %vm123_vm0, %v59_v12  ;;  %v45_v26 = vld [vmem:[%s7729_s1 + $0x78] sm:$0xff]  ;;  %v52_v29 = vld [vmem:[%s7729_s1 + $0xb0] sm:$0xff]  ;;  %v51_v30 = vld [vmem:[%s7729_s1 + $0xa8] sm:$0xff] }
  0x28   :  { %242 = vmatmul.mubr.f32.gmra.mrb[2].mxu0 %v33_v10  ;;  %5306 = vmatprep.mubr.msk.f32.mxu1 %vm123_vm0, %v62_v13  ;;  %v49_v27 = vld [vmem:[%s7729_s1 + $0x98] sm:$0xff]  ;;  %v55_v31 = vld [vmem:[%s7729_s1 + $0xc8] sm:$0xff]  ;;  %v54_v32 = vld [vmem:[%s7729_s1 + $0xc0] sm:$0xff] }
  0x29   :  { %246 = vmatprep.mubr.f32.mxu0 %v37_v11  ;;  %862 = vperm.xlu0 %6610, %v4722_v14   ;;  %v58_v33 = vld [vmem:[%s7729_s1 + $0xe0] sm:$0xff]  ;;  %v57_v34 = vld [vmem:[%s7729_s1 + $0xd8] sm:$0xff]  ;;  %v60_v36 = vld [vmem:[%s7729_s1 + $0xf0] sm:$0xff] }
  0x2a   :  { %v61_v35 = vld [vmem:[%s7729_s1 + $0xf8] sm:$0xff]  ;;  %v64_v37 = vld [vmem:[%s7729_s1 + $0x110] sm:$0xff]  ;;  %v63_v38 = vld [vmem:[%s7729_s1 + $0x108] sm:$0xff] }
  0x2b   :  { %5307 = vmatmul.mubr.msk.f32.gmra.mrb[10].mxu1 %vm123_vm0, %v65_v17  ;;  %v67_v39 = vld [vmem:[%s7729_s1 + $0x128] sm:$0xff]  ;;  %v66_v40 = vld [vmem:[%s7729_s1 + $0x120] sm:$0xff]  ;;  %v69_v42 = vld [vmem:[%s7729_s1 + $0x138] sm:$0xff] }
  0x2c   :  { %247 = vmatmul.mubr.f32.gmra.mrb[4].mxu0 %v36_v15  ;;  %5309 = vmatprep.mubr.msk.f32.mxu1 %vm123_vm0, %v68_v18  ;;  %v70_v41 = vld [vmem:[%s7729_s1 + $0x140] sm:$0xff]  ;;  %v73_v43 = vld [vmem:[%s7729_s1 + $0x158] sm:$0xff]  ;;  %v72_v44 = vld [vmem:[%s7729_s1 + $0x150] sm:$0xff] }
  0x2d   :  { %251 = vmatprep.mubr.f32.mxu0 %v40_v16  ;;  %v76_v45 = vld [vmem:[%s7729_s1 + $0x170] sm:$0xff]  ;;  %v75_v46 = vld [vmem:[%s7729_s1 + $0x168] sm:$0xff]  ;;  %v4716_v48 = vld [vmem:[%s7728_s0 + $0x6] sm:$0x3] }
  0x2e   :  { %v4725_v47 = vld [vmem:[%s7728_s0 + $0xc] sm:$0x3]  ;;  %v4728_v49 = vld [vmem:[%s7728_s0 + $0xe] sm:$0x3]  ;;  %v6998_v60 = vld [vmem:[%s7733_s5] ss:$0 sm:$0xff] }
  0x2f   :  { %5310 = vmatmul.mubr.msk.f32.gmra.mrb[12].mxu1 %vm123_vm0, %v71_v21  ;;  %941 = vperm.xlu1 %6611, %v4725_v47  }
  0x30   :  { %252 = vmatmul.mubr.f32.gmra.mrb[6].mxu0 %v39_v19  ;;  %5312 = vmatprep.mubr.msk.f32.mxu1 %vm123_vm0, %v74_v22 }
  0x31   :  { %256 = vmatprep.mubr.f32.mxu0 %v43_v20 }
  0x33   :  { %5313 = vmatmul.mubr.msk.f32.gmra.mrb[14].mxu1 %vm123_vm0, %v77_v25  ;;  %704 = vperm.xlu1 %6611, %v4716_v48  }
  0x34   :  { %257 = vmatmul.mubr.f32.gmra.mrb[8].mxu0 %v42_v23  ;;  %5347 = vmatprep.mubr.msk.f32.mxu1 %vm6642_vm1, %v6643_v51 }
  0x35   :  { %261 = vmatprep.mubr.f32.mxu0 %v46_v24 }
  0x37   :  { %1020 = vperm.xlu1 %6611, %v4728_v49  }
  0x38   :  { %262 = vmatmul.mubr.f32.gmra.mrb[10].mxu0 %v45_v26 }
  0x39   :  { %266 = vmatprep.mubr.f32.mxu0 %v49_v27 }
  0x3c   :  { %267 = vmatmul.mubr.f32.gmra.mrb[12].mxu0 %v48_v28 }
  0x3d   :  { %271 = vmatprep.mubr.f32.mxu0 %v52_v29 }
  0x40   :  { %272 = vmatmul.mubr.f32.gmra.mrb[14].mxu0 %v51_v30 }
  0x41   :  { %276 = vmatprep.mubr.f32.mxu0 %v55_v31 }
  0x44   :  { %277 = vmatmul.mubr.f32.gmra.mrb[16].mxu0 %v54_v32 }
  0x45   :  { %281 = vmatprep.mubr.f32.mxu0 %v58_v33 }
  0x48   :  { %282 = vmatmul.mubr.f32.gmra.mrb[18].mxu0 %v57_v34 }
  0x49   :  { %286 = vmatprep.mubr.f32.mxu0 %v61_v35 }
  0x4c   :  { %287 = vmatmul.mubr.f32.gmra.mrb[20].mxu0 %v60_v36 }
  0x4d   :  { %291 = vmatprep.mubr.f32.mxu0 %v64_v37 }
  0x50   :  { %292 = vmatmul.mubr.f32.gmra.mrb[22].mxu0 %v63_v38 }
  0x51   :  { %296 = vmatprep.mubr.f32.mxu0 %v67_v39 }
  0x54   :  { %297 = vmatmul.mubr.f32.gmra.mrb[24].mxu0 %v66_v40 }
  0x55   :  { %301 = vmatprep.mubr.f32.mxu0 %v70_v41 }
  0x58   :  { %302 = vmatmul.mubr.f32.gmra.mrb[26].mxu0 %v69_v42 }
  0x59   :  { %306 = vmatprep.mubr.f32.mxu0 %v73_v43 }
  0x5c   :  { %307 = vmatmul.mubr.f32.gmra.mrb[28].mxu0 %v72_v44 }
  0x5d   :  { %311 = vmatprep.mubr.f32.mxu0 %v76_v45 }
  0x60   :  { %312 = vmatmul.mubr.f32.gmra.mrb[30].mxu0 %v75_v46 }
  0x61   :  { %5417 = vmatprep.mubr.msk.f32.mxu0 %vm6642_vm1, %v6643_v51 }
  0xe8   :  { %v5293_v52 = vpop.f32.mrb[0].mxu1 }
  0xe9   :  { %v383_v53 = vpop.f32.mrb[1].mxu1 }
  0xec   :  { %v5296_v54 = vpop.f32.mrb[2].mxu1 }
  0xed   :  { %v393_v55 = vpop.f32.mrb[3].mxu1 }
  0xf2   :  { %v5299_v56 = vpop.f32.mrb[4].mxu1 }
  0xf3   :  { %v403_v57 = vpop.f32.mrb[5].mxu1 }
  0xf6   :  { %v7000_v61 = vpop.f32.mrb[6].mxu1 }
  0xf7   :  { %v4844_v58 = vpop.f32.mrb[0].mxu0  ;;  %v413_v63 = vpop.f32.mrb[7].mxu1 }
  0xf8   :  { %v4845_v59 = vpop.f32.mrb[1].mxu0 }
  0xf9   :  { %v4846_v62 = vadd.f32 %v4845_v59, %v4844_v58 }
  0xfa   :  { %v7003_v3 = vpop.f32.mrb[8].mxu1 }
  0xfb   :  { %v4847_v0 = vpop.f32.mrb[2].mxu0  ;;  %v239_v1 = vadd.f32 %v4846_v62, %v6998_v60  ;;  %v423_v6 = vpop.f32.mrb[9].mxu1 }
  0xfc   :  { %v4848_v2 = vpop.f32.mrb[3].mxu0 }
  0xfd   :  { %v4849_v4 = vadd.f32 %v4848_v2, %v4847_v0  ;;  %v384_v5 = vadd.f32 %v383_v53, %v239_v1 }
  0xfe   :  { %v7006_v10 = vpop.f32.mrb[10].mxu1 }
  0xff   :  { %v244_v7 = vadd.f32 %v4849_v4, %v6998_v60  ;;  %v4850_v8 = vpop.f32.mrb[4].mxu0  ;;  %v7008_v13 = vpop.f32.mrb[11].mxu1 }
 0x100   :  { %v4851_v9 = vpop.f32.mrb[5].mxu0 }
 0x101   :  { %v389_v11 = vadd.f32 %v5293_v52, %v244_v7  ;;  %v4852_v12 = vadd.f32 %v4851_v9, %v4850_v8 }
 0x102   :  { %v7013_v18 = vpop.f32.mrb[12].mxu1 }
 0x103   :  { %v7010_v14 = vpack.c.bf16 %v389_v11, %v384_v5  ;;  %v4853_v15 = vpop.f32.mrb[6].mxu0  ;;  %v249_v16 = vadd.f32 %v4852_v12, %v6998_v60  ;;  %v7017_v21 = vpop.f32.mrb[13].mxu1 }
 0x104   :  { %v4854_v17 = vpop.f32.mrb[7].mxu0 }
 0x105   :  { %v4855_v19 = vadd.f32 %v4854_v17, %v4853_v15  ;;  %v394_v20 = vadd.f32 %v393_v55, %v249_v16  ;;  %6136 = vmatpush3.bf16.msra.mxu1 %v7010_v14  ;;  %6184 = vmatpush3.bf16.msra.mxu0 %v7010_v14 }
 0x106   :  { %6137 = vmatprep.subr.bf16.mxu1 %v6641_v50  ;;  %6185 = vmatprep.subr.bf16.mxu0 %v6641_v50  ;;  %v7022_v25 = vpop.f32.mrb[14].mxu1 }
 0x107   :  { %v254_v22 = vadd.f32 %v4855_v19, %v6998_v60  ;;  %v4856_v23 = vpop.f32.mrb[8].mxu0  ;;  %v7024_v28 = vpop.f32.mrb[15].mxu1 }
 0x108   :  { %v4857_v24 = vpop.f32.mrb[9].mxu0 }
 0x109   :  { %v399_v26 = vadd.f32 %v5296_v54, %v254_v22  ;;  %v4858_v27 = vadd.f32 %v4857_v24, %v4856_v23 }
 0x10b   :  { %v7026_v29 = vpack.c.bf16 %v399_v26, %v394_v20  ;;  %v4859_v30 = vpop.f32.mrb[10].mxu0  ;;  %v259_v31 = vadd.f32 %v4858_v27, %v6998_v60 }
 0x10c   :  { %v4860_v32 = vpop.f32.mrb[11].mxu0 }
 0x10d   :  { %v4861_v33 = vadd.f32 %v4860_v32, %v4859_v30  ;;  %v404_v34 = vadd.f32 %v403_v57, %v259_v31  ;;  %6139 = vmatpush3.bf16.msra.mxu1 %v7026_v29  ;;  %6187 = vmatpush3.bf16.msra.mxu0 %v7026_v29 }
 0x10e   :  { %6140 = vmatprep.subr.bf16.mxu1 %v6641_v50  ;;  %6188 = vmatprep.subr.bf16.mxu0 %v6641_v50 }
 0x10f   :  { %v264_v35 = vadd.f32 %v4861_v33, %v6998_v60  ;;  %v4862_v36 = vpop.f32.mrb[12].mxu0 }
 0x110   :  { %v4863_v37 = vpop.f32.mrb[13].mxu0 }
 0x111   :  { %v409_v38 = vadd.f32 %v5299_v56, %v264_v35  ;;  %v4864_v39 = vadd.f32 %v4863_v37, %v4862_v36  ;;  %v467_v37 = vpop.permute.xlu1 %466 }
 0x113   :  { %v7034_v40 = vpack.c.bf16 %v409_v38, %v404_v34  ;;  %v4865_v41 = vpop.f32.mrb[14].mxu0  ;;  %v269_v42 = vadd.f32 %v4864_v39, %v6998_v60  ;;  %v462_v34 = vlaneseq  ;;  %v626_v39 = vpop.permute.xlu0 %625 }
 0x114   :  { %v4866_v43 = vpop.f32.mrb[15].mxu0 }
 0x115   :  { %v4867_v44 = vadd.f32 %v4866_v43, %v4865_v41  ;;  %v414_v45 = vadd.f32 %v413_v63, %v269_v42  ;;  %6142 = vmatpush3.bf16.msra.mxu1 %v7034_v40  ;;  %6190 = vmatpush3.bf16.msra.mxu0 %v7034_v40  ;;  %v7082_v36 = vand.u32 127, %v462_v34  ;;  %v942_v41 = vpop.permute.xlu1 %941  ;;  %v1096_v42 = vld [vmem:[%s7732_s4] sm:$0xff]  ;;  %v1097_v43 = vld [vmem:[%s7732_s4 + $0x8] sm:$0xff] }
 0x116   :  { %6143 = vmatprep.subr.bf16.mxu1 %v6641_v50  ;;  %6191 = vmatprep.subr.bf16.mxu0 %v6641_v50 }
 0x117   :  { %v274_v46 = vadd.f32 %v4867_v44, %v6998_v60  ;;  %v4868_v47 = vpop.f32.mrb[16].mxu0  ;;  %vm627_vm2 = vcmp.eq.s32.totalorder %v626_v39, %v7082_v36  ;;  %vm468_vm3 = vcmp.eq.s32.totalorder %v467_v37, %v7082_v36  ;;  %v7174_v44 = vpack.c.bf16 %v1097_v43, %v1096_v42  ;;  %v1720_v42 = vld [vmem:[%s7731_s3 + $0x8] sm:$0xff] }
 0x118   :  { %v4869_v48 = vpop.f32.mrb[17].mxu0  ;;  %vm943_vm6 = vcmp.eq.s32.totalorder %v942_v41, %v7082_v36  ;;  %v1719_v41 = vld [vmem:[%s7731_s3] sm:$0xff] }
 0x119   :  { %v419_v49 = vadd.f32 %v7000_v61, %v274_v46  ;;  %v4870_v52 = vadd.f32 %v4869_v48, %v4868_v47  ;;  %v1098_v46 = vld [vmem:[%s7732_s4 + $0x10] sm:$0xff]  ;;  %v1099_v47 = vld [vmem:[%s7732_s4 + $0x18] sm:$0xff]  ;;  %v6374_v43 = vpack.c.bf16 %v1720_v42, %v1719_v41 }
 0x11a   :  { %v7190_v48 = vpack.c.bf16 %v1099_v47, %v1098_v46  ;;  %v4742_v47 = vld [vmem:[%s7732_s4 + $0x20] sm:$0xff]  ;;  %v4755_v41 = vld [vmem:[%s7731_s3 + $0x30] sm:$0xff]  ;;  %v4756_v42 = vld [vmem:[%s7731_s3 + $0x38] sm:$0xff] }
 0x11b   :  { %v7043_v53 = vpack.c.bf16 %v419_v49, %v414_v45  ;;  %v4871_v54 = vpop.f32.mrb[18].mxu0  ;;  %v279_v55 = vadd.f32 %v4870_v52, %v6998_v60  ;;  %v705_v45 = vpop.permute.xlu1 %704 }
 0x11c   :  { %v4872_v56 = vpop.f32.mrb[19].mxu0  ;;  %vm706_vm7 = vcmp.eq.s32.totalorder %v705_v45, %v7082_v36  ;;  %v1722_v45 = vld [vmem:[%s7731_s3 + $0x18] sm:$0xff] }
 0x11d   :  { %v4873_v57 = vadd.f32 %v4872_v56, %v4871_v54  ;;  %v424_v58 = vadd.f32 %v423_v6, %v279_v55  ;;  %6145 = vmatpush3.bf16.msra.mxu1 %v7043_v53  ;;  %6193 = vmatpush3.bf16.msra.mxu0 %v7043_v53 }
 0x11e   :  { %6146 = vmatprep.subr.bf16.mxu1 %v6641_v50  ;;  %6194 = vmatprep.subr.bf16.mxu0 %v6641_v50 }
 0x11f   :  { %v284_v59 = vadd.f32 %v4873_v57, %v6998_v60  ;;  %v4874_v61 = vpop.f32.mrb[20].mxu0 }
 0x120   :  { %v4875_v62 = vpop.f32.mrb[21].mxu0 }
 0x121   :  { %v429_v63 = vadd.f32 %v7003_v3, %v284_v59  ;;  %v4876_v0 = vadd.f32 %v4875_v62, %v4874_v61 }
 0x123   :  { %v7052_v1 = vpack.c.bf16 %v429_v63, %v424_v58  ;;  %v4877_v2 = vpop.f32.mrb[22].mxu0  ;;  %v289_v4 = vadd.f32 %v4876_v0, %v6998_v60 }
 0x124   :  { %v4878_v5 = vpop.f32.mrb[23].mxu0 }
 0x125   :  { %v4879_v6 = vadd.f32 %v4878_v5, %v4877_v2  ;;  %v434_v7 = vadd.f32 %v7008_v13, %v289_v4  ;;  %6148 = vmatpush3.bf16.msra.mxu1 %v7052_v1  ;;  %6196 = vmatpush3.bf16.msra.mxu0 %v7052_v1 }
 0x126   :  { %6149 = vmatprep.subr.bf16.mxu1 %v6641_v50  ;;  %6197 = vmatprep.subr.bf16.mxu0 %v6641_v50 }
 0x127   :  { %v294_v3 = vadd.f32 %v4879_v6, %v6998_v60  ;;  %v4880_v8 = vpop.f32.mrb[24].mxu0 }
 0x128   :  { %v4881_v9 = vpop.f32.mrb[25].mxu0 }
 0x129   :  { %v439_v11 = vadd.f32 %v7006_v10, %v294_v3  ;;  %v4882_v12 = vadd.f32 %v4881_v9, %v4880_v8 }
 0x12b   :  { %v7062_v15 = vpack.c.bf16 %v439_v11, %v434_v7  ;;  %v4883_v16 = vpop.f32.mrb[26].mxu0  ;;  %v299_v13 = vadd.f32 %v4882_v12, %v6998_v60 }
 0x12c   :  { %v4884_v17 = vpop.f32.mrb[27].mxu0 }
 0x12d   :  { %v4885_v19 = vadd.f32 %v4884_v17, %v4883_v16  ;;  %v444_v20 = vadd.f32 %v7017_v21, %v299_v13  ;;  %6151 = vmatpush3.bf16.msra.mxu1 %v7062_v15  ;;  %6199 = vmatpush3.bf16.msra.mxu0 %v7062_v15 }
 0x12e   :  { %6152 = vmatprep.subr.bf16.mxu1 %v6641_v50  ;;  %6200 = vmatprep.subr.bf16.mxu0 %v6641_v50 }
 0x12f   :  { %v304_v10 = vadd.f32 %v4885_v19, %v6998_v60  ;;  %v4886_v22 = vpop.f32.mrb[28].mxu0 }
 0x130   :  { %v4887_v23 = vpop.f32.mrb[29].mxu0 }
 0x131   :  { %v449_v24 = vadd.f32 %v7013_v18, %v304_v10  ;;  %v4888_v26 = vadd.f32 %v4887_v23, %v4886_v22 }
 0x133   :  { %v7072_v27 = vpack.c.bf16 %v449_v24, %v444_v20  ;;  %v4889_v30 = vpop.f32.mrb[30].mxu0  ;;  %v309_v21 = vadd.f32 %v4888_v26, %v6998_v60 }
 0x134   :  { %v4890_v31 = vpop.f32.mrb[31].mxu0 }
 0x135   :  { %v4891_v32 = vadd.f32 %v4890_v31, %v4889_v30  ;;  %v454_v33 = vadd.f32 %v7024_v28, %v309_v21  ;;  %6154 = vmatpush3.bf16.msra.mxu1 %v7072_v27  ;;  %6202 = vmatpush3.bf16.msra.mxu0 %v7072_v27 }
 0x136   :  { %6155 = vmatprep.subr.bf16.mxu1 %v6641_v50  ;;  %6203 = vmatprep.subr.bf16.mxu0 %v6641_v50 }
 0x137   :  { %v314_v18 = vadd.f32 %v4891_v32, %v6998_v60  ;;  %v6644_v60 = vmov 1.0  }
 0x139   :  { %v459_v35 = vadd.f32 %v7022_v25, %v314_v18  ;;  %v784_v25 = vpop.permute.xlu0 %783 }
 0x13a   :  { %vm785_vm4 = vcmp.eq.s32.totalorder %v784_v25, %v7082_v36 }
 0x13b   :  { %v7084_v38 = vpack.c.bf16 %v459_v35, %v454_v33 }
 0x13d   :  { %6157 = vmatpush3.bf16.msra.mxu1 %v7084_v38  ;;  %6205 = vmatpush3.bf16.msra.mxu0 %v7084_v38  ;;  %v547_v28 = vpop.permute.xlu0 %546 }
 0x13e   :  { %6158 = vmatprep.subr.bf16.mxu1 %v6641_v50  ;;  %6230 = vmatprep.subr.bf16.mxu0 %v6641_v50  ;;  %vm548_vm5 = vcmp.eq.s32.totalorder %v547_v28, %v7082_v36 }
 0x140   :  { %5348 = vmatmul.mubr.msk.f32.vlgmr.msra.gmra.mrb[16].mxu1 %vm468_vm3, %v6644_v60  ;;  %5418 = vmatmul.mubr.msk.f32.vlgmr.msra.gmra.mrb[32].mxu0 %vm627_vm2, %v6644_v60 }
 0x141   :  { %6160 = vmatpush3.bf16.msra.mxu1 %v7010_v14  ;;  %6232 = vmatpush3.bf16.msra.mxu0 %v7010_v14  ;;  %v863_v49 = vpop.permute.xlu0 %862 }
 0x142   :  { %6161 = vmatprep.subr.bf16.mxu1 %v6641_v50  ;;  %6233 = vmatprep.subr.bf16.mxu0 %v6641_v50  ;;  %vm864_vm8 = vcmp.eq.s32.totalorder %v863_v49, %v7082_v36  ;;  %v4744_v49 = vld [vmem:[%s7732_s4 + $0x30] sm:$0xff] }
 0x143   :  { %5382 = vmatprep.mubr.msk.f32.mxu1 %vm6642_vm1, %v6643_v51  ;;  %5487 = vmatprep.mubr.msk.f32.mxu0 %vm6642_vm1, %v6643_v51 }
 0x145   :  { %6163 = vmatpush3.bf16.msra.mxu1 %v7026_v29  ;;  %6235 = vmatpush3.bf16.msra.mxu0 %v7026_v29 }
 0x146   :  { %6164 = vmatprep.subr.bf16.mxu1 %v6641_v50  ;;  %6236 = vmatprep.subr.bf16.mxu0 %v6641_v50 }
 0x149   :  { %6166 = vmatpush3.bf16.msra.mxu1 %v7034_v40  ;;  %6238 = vmatpush3.bf16.msra.mxu0 %v7034_v40 }
 0x14a   :  { %6167 = vmatprep.subr.bf16.mxu1 %v6641_v50  ;;  %6239 = vmatprep.subr.bf16.mxu0 %v6641_v50 }
 0x14d   :  { %6169 = vmatpush3.bf16.msra.mxu1 %v7043_v53  ;;  %6241 = vmatpush3.bf16.msra.mxu0 %v7043_v53 }
 0x14e   :  { %6170 = vmatprep.subr.bf16.mxu1 %v6641_v50  ;;  %6242 = vmatprep.subr.bf16.mxu0 %v6641_v50 }
 0x151   :  { %6172 = vmatpush3.bf16.msra.mxu1 %v7052_v1  ;;  %6244 = vmatpush3.bf16.msra.mxu0 %v7052_v1 }
 0x152   :  { %6173 = vmatprep.subr.bf16.mxu1 %v6641_v50  ;;  %6245 = vmatprep.subr.bf16.mxu0 %v6641_v50 }
 0x155   :  { %6175 = vmatpush3.bf16.msra.mxu1 %v7062_v15  ;;  %6247 = vmatpush3.bf16.msra.mxu0 %v7062_v15 }
 0x156   :  { %6176 = vmatprep.subr.bf16.mxu1 %v6641_v50  ;;  %6248 = vmatprep.subr.bf16.mxu0 %v6641_v50 }
 0x159   :  { %6178 = vmatpush3.bf16.msra.mxu1 %v7072_v27  ;;  %6250 = vmatpush3.bf16.msra.mxu0 %v7072_v27 }
 0x15a   :  { %6179 = vmatprep.subr.bf16.mxu1 %v6641_v50  ;;  %6251 = vmatprep.subr.bf16.mxu0 %v6641_v50 }
 0x15d   :  { %6181 = vmatpush3.bf16.msra.mxu1 %v7084_v38  ;;  %6253 = vmatpush3.bf16.msra.mxu0 %v7084_v38 }
 0x15e   :  { %6206 = vmatprep.subr.bf16.mxu1 %v6641_v50  ;;  %6278 = vmatprep.subr.bf16.mxu0 %v6641_v50 }
 0x160   :  { %5383 = vmatmul.mubr.msk.f32.vlgmr.msra.gmra.mrb[18].mxu1 %vm548_vm5, %v6644_v60  ;;  %5488 = vmatmul.mubr.msk.f32.vlgmr.msra.gmra.mrb[34].mxu0 %vm785_vm4, %v6644_v60 }
 0x161   :  { %6208 = vmatpush3.bf16.msra.mxu1 %v7010_v14  ;;  %6280 = vmatpush3.bf16.msra.mxu0 %v7010_v14 }
 0x162   :  { %6209 = vmatprep.subr.bf16.mxu1 %v6641_v50  ;;  %6281 = vmatprep.subr.bf16.mxu0 %v6641_v50 }
 0x163   :  { %5452 = vmatprep.mubr.msk.f32.mxu1 %vm6642_vm1, %v6643_v51  ;;  %5557 = vmatprep.mubr.msk.f32.mxu0 %vm6642_vm1, %v6643_v51 }
 0x165   :  { %6211 = vmatpush3.bf16.msra.mxu1 %v7026_v29  ;;  %6283 = vmatpush3.bf16.msra.mxu0 %v7026_v29 }
 0x166   :  { %6212 = vmatprep.subr.bf16.mxu1 %v6641_v50  ;;  %6284 = vmatprep.subr.bf16.mxu0 %v6641_v50 }
 0x169   :  { %6214 = vmatpush3.bf16.msra.mxu1 %v7034_v40  ;;  %6286 = vmatpush3.bf16.msra.mxu0 %v7034_v40 }
 0x16a   :  { %6215 = vmatprep.subr.bf16.mxu1 %v6641_v50  ;;  %6287 = vmatprep.subr.bf16.mxu0 %v6641_v50 }
 0x16d   :  { %6217 = vmatpush3.bf16.msra.mxu1 %v7043_v53  ;;  %6289 = vmatpush3.bf16.msra.mxu0 %v7043_v53 }
 0x16e   :  { %6218 = vmatprep.subr.bf16.mxu1 %v6641_v50  ;;  %6290 = vmatprep.subr.bf16.mxu0 %v6641_v50 }
 0x171   :  { %6220 = vmatpush3.bf16.msra.mxu1 %v7052_v1  ;;  %6292 = vmatpush3.bf16.msra.mxu0 %v7052_v1 }
 0x172   :  { %6221 = vmatprep.subr.bf16.mxu1 %v6641_v50  ;;  %6293 = vmatprep.subr.bf16.mxu0 %v6641_v50 }
 0x175   :  { %6223 = vmatpush3.bf16.msra.mxu1 %v7062_v15  ;;  %6295 = vmatpush3.bf16.msra.mxu0 %v7062_v15 }
 0x176   :  { %6224 = vmatprep.subr.bf16.mxu1 %v6641_v50  ;;  %6296 = vmatprep.subr.bf16.mxu0 %v6641_v50 }
 0x179   :  { %6226 = vmatpush3.bf16.msra.mxu1 %v7072_v27  ;;  %6298 = vmatpush3.bf16.msra.mxu0 %v7072_v27 }
 0x17a   :  { %6227 = vmatprep.subr.bf16.mxu1 %v6641_v50  ;;  %6299 = vmatprep.subr.bf16.mxu0 %v6641_v50 }
 0x17d   :  { %6229 = vmatpush3.bf16.msra.mxu1 %v7084_v38  ;;  %6301 = vmatpush3.bf16.msra.mxu0 %v7084_v38 }
 0x17e   :  { %6254 = vmatprep.subr.bf16.mxu1 %v6641_v50  ;;  %6326 = vmatprep.subr.bf16.mxu0 %v6641_v50 }
 0x180   :  { %5453 = vmatmul.mubr.msk.f32.vlgmr.msra.gmra.mrb[20].mxu1 %vm706_vm7, %v6644_v60  ;;  %5558 = vmatmul.mubr.msk.f32.vlgmr.msra.gmra.mrb[36].mxu0 %vm943_vm6, %v6644_v60 }
 0x181   :  { %6256 = vmatpush3.bf16.msra.mxu1 %v7010_v14  ;;  %6328 = vmatpush3.bf16.msra.mxu0 %v7174_v44 }
 0x182   :  { %6257 = vmatprep.subr.bf16.mxu1 %v6641_v50  ;;  %6329 = vmatprep.subr.bf16.mxu0 %v6641_v50 }
 0x183   :  { %5603 = vmatprep.mubr.msk.f32.mxu0 %vm6642_vm1, %v6643_v51  ;;  %5522 = vmatprep.mubr.msk.f32.mxu1 %vm6642_vm1, %v6643_v51 }
 0x185   :  { %6259 = vmatpush3.bf16.msra.mxu1 %v7026_v29  ;;  %6331 = vmatpush3.bf16.msra.mxu0 %v7190_v48 }
 0x186   :  { %6260 = vmatprep.subr.bf16.mxu1 %v6641_v50  ;;  %6332 = vmatprep.subr.bf16.mxu0 %v6641_v50 }
 0x188   :  { %5604 = vmatmul.mubr.f32.vlgmr.msra.gmra.mrb[38].mxu0 %v6643_v51 }
 0x189   :  { %6262 = vmatpush3.bf16.msra.mxu1 %v7034_v40  ;;  %6334 = vmatpush3.bf16.msra.mxu0 %v7174_v44 }
 0x18a   :  { %6263 = vmatprep.subr.bf16.mxu1 %v6641_v50  ;;  %6335 = vmatprep.subr.bf16.mxu0 %v6641_v50 }
 0x18b   :  { %5614 = vmatprep.mubr.msk.f32.mxu0 %vm6642_vm1, %v6643_v51 }
 0x18d   :  { %6265 = vmatpush3.bf16.msra.mxu1 %v7043_v53  ;;  %6337 = vmatpush3.bf16.msra.mxu0 %v7190_v48 }
 0x18e   :  { %6266 = vmatprep.subr.bf16.mxu1 %v6641_v50  ;;  %6344 = vmatprep.subr.bf16.mxu0 %v6641_v50 }
 0x191   :  { %6268 = vmatpush3.bf16.msra.mxu1 %v7052_v1 }
 0x192   :  { %6269 = vmatprep.subr.bf16.mxu1 %v6641_v50 }
 0x195   :  { %6271 = vmatpush3.bf16.msra.mxu1 %v7062_v15 }
 0x196   :  { %6272 = vmatprep.subr.bf16.mxu1 %v6641_v50 }
 0x199   :  { %6274 = vmatpush3.bf16.msra.mxu1 %v7072_v27 }
 0x19a   :  { %6275 = vmatprep.subr.bf16.mxu1 %v6641_v50 }
 0x19d   :  { %6277 = vmatpush3.bf16.msra.mxu1 %v7084_v38 }
 0x19e   :  { %6302 = vmatprep.subr.bf16.mxu1 %v6641_v50 }
 0x1a0   :  { %5523 = vmatmul.mubr.msk.f32.vlgmr.msra.gmra.mrb[22].mxu1 %vm864_vm8, %v6644_v60 }
 0x1a1   :  { %6304 = vmatpush3.bf16.msra.mxu1 %v7010_v14  ;;  %5592 = vmatprep.mubr.msk.f32.mxu1 %vm6642_vm1, %v6643_v51  ;;  %v1021_v14 = vpop.permute.xlu1 %1020 }
 0x1a2   :  { %6305 = vmatprep.subr.bf16.mxu1 %v6641_v50  ;;  %vm1022_vm9 = vcmp.eq.s32.totalorder %v1021_v14, %v7082_v36 }
 0x1a5   :  { %6307 = vmatpush3.bf16.msra.mxu1 %v7026_v29 }
 0x1a6   :  { %6308 = vmatprep.subr.bf16.mxu1 %v6641_v50 }
 0x1a9   :  { %6310 = vmatpush3.bf16.msra.mxu1 %v7034_v40 }
 0x1aa   :  { %6311 = vmatprep.subr.bf16.mxu1 %v6641_v50 }
 0x1ad   :  { %6313 = vmatpush3.bf16.msra.mxu1 %v7043_v53 }
 0x1ae   :  { %6314 = vmatprep.subr.bf16.mxu1 %v6641_v50 }
 0x1b1   :  { %6316 = vmatpush3.bf16.msra.mxu1 %v7052_v1 }
 0x1b2   :  { %6317 = vmatprep.subr.bf16.mxu1 %v6641_v50 }
 0x1b5   :  { %6319 = vmatpush3.bf16.msra.mxu1 %v7062_v15 }
 0x1b6   :  { %6320 = vmatprep.subr.bf16.mxu1 %v6641_v50 }
 0x1b9   :  { %6322 = vmatpush3.bf16.msra.mxu1 %v7072_v27 }
 0x1ba   :  { %6323 = vmatprep.subr.bf16.mxu1 %v6641_v50 }
 0x1bd   :  { %6325 = vmatpush3.bf16.msra.mxu1 %v7084_v38 }
 0x1be   :  { %6338 = vmatprep.subr.bf16.mxu1 %v6641_v50 }
 0x1c0   :  { %5593 = vmatmul.mubr.msk.f32.vlgmr.msra.gmra.mrb[24].mxu1 %vm1022_vm9, %v6644_v60 }
 0x1c1   :  { %6340 = vmatpush3.bf16.msra.mxu1 %v7174_v44  ;;  %5625 = vmatprep.mubr.msk.f32.mxu1 %vm6642_vm1, %v6643_v51 }
 0x1c2   :  { %6341 = vmatprep.subr.bf16.mxu1 %v6641_v50 }
 0x1c5   :  { %6343 = vmatpush3.bf16.msra.mxu1 %v7190_v48 }
 0x1c6   :  { %6350 = vmatprep.subr.bf16.mxu1 %v6641_v50 }
 0x213   :  { %v696_v29 = vpop.f32.mrb[32].mxu0  ;;  %v537_v40 = vpop.f32.mrb[16].mxu1 }
 0x214   :  { %700 = vst.msk [vmem:[#allocation2 + $0x4] sm:$0x3] %vm541_vm10, %v696_v29  ;;  %v5419_v52 = vpop.f32.mrb[33].mxu0  ;;  %542 = vst.msk [vmem:[#allocation2] sm:$0x3] %vm541_vm10, %v537_v40  ;;  %v5349_v53 = vpop.f32.mrb[17].mxu1 }
 0x215   :  { %v4745_v29 = vld [vmem:[%s7732_s4 + $0x38] sm:$0xff] }
 0x216   :  { %v7331_v40 = vpack.c.bf16 %v4745_v29, %v4744_v49 }
 0x21b   :  { %v1100_v63 = vld [vmem:[#allocation2] sm:$0x3]  ;;  %v1255_v16 = vld [vmem:[#allocation2 + $0x4] sm:$0x3] }
 0x233   :  { %v617_v54 = vpop.f32.mrb[18].mxu1  ;;  %v854_v55 = vpop.f32.mrb[34].mxu0 }
 0x234   :  { %621 = vst.msk [vmem:[#allocation2 + $0x2] sm:$0x3] %vm541_vm10, %v617_v54  ;;  %858 = vst.msk [vmem:[#allocation2 + $0x8] sm:$0x3] %vm541_vm10, %v854_v55  ;;  %v5384_v56 = vpop.f32.mrb[19].mxu1  ;;  %v5489_v57 = vpop.f32.mrb[35].mxu0 }
 0x23b   :  { %v1178_v8 = vld [vmem:[#allocation2 + $0x2] sm:$0x3]  ;;  %v1409_v27 = vld [vmem:[#allocation2 + $0x8] sm:$0x3] }
 0x253   :  { %v775_v58 = vpop.f32.mrb[20].mxu1  ;;  %v1012_v59 = vpop.f32.mrb[36].mxu0 }
 0x254   :  { %779 = vst.msk [vmem:[#allocation2 + $0x6] sm:$0x3] %vm541_vm10, %v775_v58  ;;  %1016 = vst.msk [vmem:[#allocation2 + $0xc] sm:$0x3] %vm541_vm10, %v1012_v59  ;;  %v5454_v61 = vpop.f32.mrb[21].mxu1  ;;  %v5559_v62 = vpop.f32.mrb[37].mxu0 }
 0x255   :  { %v4739_v61 = vld [vmem:[%s7733_s5 + $0x1] ss:$0 sm:$0xff] }
 0x25b   :  { %v1171_v0 = vpop.f32.mrb[38].mxu0  ;;  %v1332_v10 = vld [vmem:[#allocation2 + $0x6] sm:$0x3]  ;;  %v1563_v38 = vld [vmem:[#allocation2 + $0xc] sm:$0x3] }
 0x25c   :  { %v1175_v1 = vadd.f32 %v1171_v0, %v1100_v63  ;;  %v5605_v2 = vpop.f32.mrb[39].mxu0 }
 0x25e   :  { %v1176_v4 = vmax.f32 %v1175_v1, 0.0 }
 0x260   :  { %1177 = vst.msk [vmem:[#allocation3] sm:$0x3] %vm541_vm10, %v1176_v4  ;;  %5615 = vmatmul.mubr.msk.f32.vlgmr.msra.gmra.mrb[40].mxu0 %vm1101_vm11, %v1176_v4 }
 0x261   :  { %6346 = vmatpush3.bf16.msra.mxu0 %v7174_v44  ;;  %5636 = vmatprep.mubr.msk.f32.mxu0 %vm6642_vm1, %v6643_v51 }
 0x262   :  { %6347 = vmatprep.subr.bf16.mxu0 %v6641_v50 }
 0x265   :  { %6349 = vmatpush3.bf16.msra.mxu0 %v7190_v48 }
 0x266   :  { %6356 = vmatprep.subr.bf16.mxu0 %v6641_v50 }
 0x273   :  { %v933_v5 = vpop.f32.mrb[22].mxu1 }
 0x274   :  { %937 = vst.msk [vmem:[#allocation2 + $0xa] sm:$0x3] %vm541_vm10, %v933_v5  ;;  %v5524_v6 = vpop.f32.mrb[23].mxu1 }
 0x27b   :  { %v1486_v33 = vld [vmem:[#allocation2 + $0xa] sm:$0x3] }
 0x293   :  { %v1091_v7 = vpop.f32.mrb[24].mxu1 }
 0x294   :  { %1095 = vst.msk [vmem:[#allocation2 + $0xe] sm:$0x3] %vm541_vm10, %v1091_v7  ;;  %v5594_v3 = vpop.f32.mrb[25].mxu1 }
 0x29b   :  { %v1640_v52 = vld [vmem:[#allocation2 + $0xe] sm:$0x3] }
 0x333   :  { %v1248_v9 = vpop.f32.mrb[40].mxu0 }
 0x334   :  { %v1252_v11 = vadd.f32 %v1248_v9, %v1178_v8  ;;  %v5616_v12 = vpop.f32.mrb[41].mxu0 }
 0x336   :  { %v1253_v15 = vmax.f32 %v1252_v11, 0.0 }
 0x338   :  { %1254 = vst.msk [vmem:[#allocation3 + $0x2] sm:$0x3] %vm541_vm10, %v1253_v15  ;;  %5626 = vmatmul.mubr.msk.f32.vlgmr.msra.gmra.mrb[26].mxu1 %vm1101_vm11, %v1253_v15 }
 0x339   :  { %6352 = vmatpush3.bf16.msra.mxu1 %v7174_v44  ;;  %5647 = vmatprep.mubr.msk.f32.mxu1 %vm6642_vm1, %v6643_v51 }
 0x33a   :  { %6353 = vmatprep.subr.bf16.mxu1 %v6641_v50 }
 0x33d   :  { %6355 = vmatpush3.bf16.msra.mxu1 %v7190_v48 }
 0x33e   :  { %6362 = vmatprep.subr.bf16.mxu1 %v6641_v50 }
 0x40b   :  { %v1325_v13 = vpop.f32.mrb[26].mxu1 }
 0x40c   :  { %v1329_v17 = vadd.f32 %v1325_v13, %v1255_v16  ;;  %v5627_v19 = vpop.f32.mrb[27].mxu1 }
 0x40e   :  { %v1330_v20 = vmax.f32 %v1329_v17, 0.0 }
 0x410   :  { %1331 = vst.msk [vmem:[#allocation3 + $0x4] sm:$0x3] %vm541_vm10, %v1330_v20  ;;  %5637 = vmatmul.mubr.msk.f32.vlgmr.msra.gmra.mrb[42].mxu0 %vm1101_vm11, %v1330_v20 }
 0x411   :  { %6358 = vmatpush3.bf16.msra.mxu0 %v7174_v44  ;;  %5658 = vmatprep.mubr.msk.f32.mxu0 %vm6642_vm1, %v6643_v51 }
 0x412   :  { %6359 = vmatprep.subr.bf16.mxu0 %v6641_v50 }
 0x415   :  { %6361 = vmatpush3.bf16.msra.mxu0 %v7190_v48 }
 0x416   :  { %6368 = vmatprep.subr.bf16.mxu0 %v6641_v50 }
 0x4e3   :  { %v1402_v22 = vpop.f32.mrb[42].mxu0 }
 0x4e4   :  { %v1406_v23 = vadd.f32 %v1402_v22, %v1332_v10  ;;  %v5638_v24 = vpop.f32.mrb[43].mxu0 }
 0x4e6   :  { %v1407_v26 = vmax.f32 %v1406_v23, 0.0 }
 0x4e8   :  { %1408 = vst.msk [vmem:[#allocation3 + $0x6] sm:$0x3] %vm541_vm10, %v1407_v26  ;;  %5648 = vmatmul.mubr.msk.f32.vlgmr.msra.gmra.mrb[28].mxu1 %vm1101_vm11, %v1407_v26 }
 0x4e9   :  { %6364 = vmatpush3.bf16.msra.mxu1 %v7174_v44  ;;  %5669 = vmatprep.mubr.msk.f32.mxu1 %vm6642_vm1, %v6643_v51 }
 0x4ea   :  { %6365 = vmatprep.subr.bf16.mxu1 %v6641_v50 }
 0x4ed   :  { %6367 = vmatpush3.bf16.msra.mxu1 %v7190_v48 }
 0x4ee   :  { %6375 = vmatprep.subr.bf16.mxu1 %v6374_v43 }
 0x4ef   :  { %v1717_v37 = vld [vmem:[#allocation3] sm:$0xff] }
 0x5bb   :  { %v1479_v30 = vpop.f32.mrb[28].mxu1 }
 0x5bc   :  { %v1483_v21 = vadd.f32 %v1479_v30, %v1409_v27  ;;  %v5649_v31 = vpop.f32.mrb[29].mxu1 }
 0x5be   :  { %v1484_v32 = vmax.f32 %v1483_v21, 0.0 }
 0x5c0   :  { %1485 = vst.msk [vmem:[#allocation3 + $0x8] sm:$0x3] %vm541_vm10, %v1484_v32  ;;  %5659 = vmatmul.mubr.msk.f32.vlgmr.msra.gmra.mrb[44].mxu0 %vm1101_vm11, %v1484_v32 }
 0x5c1   :  { %6370 = vmatpush3.bf16.msra.mxu0 %v7174_v44  ;;  %5680 = vmatprep.mubr.msk.f32.mxu0 %vm6642_vm1, %v6643_v51  ;;  %v1721_v44 = vld [vmem:[%s7731_s3 + $0x10] sm:$0xff] }
 0x5c2   :  { %6371 = vmatprep.subr.bf16.mxu0 %v6641_v50  ;;  %v6378_v46 = vpack.c.bf16 %v1722_v45, %v1721_v44  ;;  %v4761_v44 = vld [vmem:[%s7732_s4 + $0x40] sm:$0xff]  ;;  %v4762_v45 = vld [vmem:[%s7732_s4 + $0x48] sm:$0xff] }
 0x5c5   :  { %6373 = vmatpush3.bf16.msra.mxu0 %v7190_v48  ;;  %v4743_v48 = vld [vmem:[%s7732_s4 + $0x28] sm:$0xff] }
 0x5c6   :  { %6382 = vmatprep.subr.bf16.mxu0 %v6641_v50  ;;  %v7325_v14 = vpack.c.bf16 %v4743_v48, %v4742_v47  ;;  %v7424_v47 = vpack.c.bf16 %v4762_v45, %v4761_v44  ;;  %v4764_v48 = vld [vmem:[%s7732_s4 + $0x58] sm:$0xff] }
 0x5c7   :  { %v4783_v45 = vld [vmem:[%s7732_s4 + $0x78] sm:$0xff] }
 0x693   :  { %v1556_v34 = vpop.f32.mrb[44].mxu0 }
 0x694   :  { %v1560_v18 = vadd.f32 %v1556_v34, %v1486_v33  ;;  %v5660_v35 = vpop.f32.mrb[45].mxu0 }
 0x696   :  { %v1561_v36 = vmax.f32 %v1560_v18, 0.0 }
 0x698   :  { %1562 = vst.msk [vmem:[#allocation3 + $0xa] sm:$0x3] %vm541_vm10, %v1561_v36  ;;  %5670 = vmatmul.mubr.msk.f32.vlgmr.msra.gmra.mrb[30].mxu1 %vm1101_vm11, %v1561_v36 }
 0x699   :  { %5691 = vmatprep.mubr.msk.f32.mxu1 %vm1101_vm11, %v1717_v37  ;;  %6377 = vmatpush3.bf16.msra.mxu1 %v6374_v43  ;;  %v6434_v43 = vpack.c.bf16 %v4756_v42, %v4755_v41  ;;  %v4780_v41 = vld [vmem:[%s7732_s4 + $0x60] sm:$0xff]  ;;  %v4781_v42 = vld [vmem:[%s7732_s4 + $0x68] sm:$0xff] }
 0x69a   :  { %6379 = vmatprep.subr.bf16.mxu1 %v6378_v46  ;;  %v7523_v44 = vpack.c.bf16 %v4781_v42, %v4780_v41  ;;  %v4802_v42 = vld [vmem:[%s7732_s4 + $0x98] sm:$0xff] }
 0x69d   :  { %6381 = vmatpush3.bf16.msra.mxu1 %v6378_v46  ;;  %v4763_v46 = vld [vmem:[%s7732_s4 + $0x50] sm:$0xff] }
 0x69e   :  { %6388 = vmatprep.subr.bf16.mxu1 %v6641_v50  ;;  %v7430_v49 = vpack.c.bf16 %v4764_v48, %v4763_v46 }
 0x76b   :  { %v1633_v39 = vpop.f32.mrb[30].mxu1 }
 0x76c   :  { %v1637_v60 = vadd.f32 %v1633_v39, %v1563_v38  ;;  %v5671_v25 = vpop.f32.mrb[31].mxu1 }
 0x76d   :  { %v4754_v25 = vld [vmem:[%s7731_s3 + $0x28] sm:$0xff] }
 0x76e   :  { %v1638_v28 = vmax.f32 %v1637_v60, 0.0  ;;  %v4753_v60 = vld [vmem:[%s7731_s3 + $0x20] sm:$0xff] }
 0x770   :  { %1639 = vst.msk [vmem:[#allocation3 + $0xc] sm:$0x3] %vm541_vm10, %v1638_v28  ;;  %5681 = vmatmul.mubr.msk.f32.vlgmr.msra.gmra.mrb[46].mxu0 %vm1101_vm11, %v1638_v28  ;;  %v6430_v28 = vpack.c.bf16 %v4754_v25, %v4753_v60  ;;  %v4774_v60 = vld [vmem:[%s7731_s3 + $0x50] sm:$0xff]  ;;  %v4775_v25 = vld [vmem:[%s7731_s3 + $0x58] sm:$0xff] }
 0x771   :  { %5702 = vmatprep.mubr.msk.f32.mxu0 %vm6642_vm1, %v6643_v51  ;;  %6384 = vmatpush3.bf16.msra.mxu0 %v7325_v14 }
 0x772   :  { %6385 = vmatprep.subr.bf16.mxu0 %v6641_v50 }
 0x775   :  { %6387 = vmatpush3.bf16.msra.mxu0 %v7331_v40 }
 0x776   :  { %6394 = vmatprep.subr.bf16.mxu0 %v6641_v50 }
 0x778   :  { %5703 = vmatmul.mubr.f32.vlgmr.msra.gmra.mrb[48].mxu0 %v6643_v51 }
 0x779   :  { %6396 = vmatpush3.bf16.msra.mxu0 %v7325_v14  ;;  %5724 = vmatprep.mubr.msk.f32.mxu0 %vm6642_vm1, %v6643_v51 }
 0x77a   :  { %6397 = vmatprep.subr.bf16.mxu0 %v6641_v50 }
 0x77d   :  { %6399 = vmatpush3.bf16.msra.mxu0 %v7331_v40 }
 0x77e   :  { %6406 = vmatprep.subr.bf16.mxu0 %v6641_v50 }
 0x843   :  { %v1710_v53 = vpop.f32.mrb[46].mxu0 }
 0x844   :  { %v1714_v54 = vadd.f32 %v1710_v53, %v1640_v52  ;;  %v5682_v55 = vpop.f32.mrb[47].mxu0 }
 0x846   :  { %v1715_v56 = vmax.f32 %v1714_v54, 0.0 }
 0x848   :  { %1716 = vst.msk [vmem:[#allocation3 + $0xe] sm:$0x3] %vm541_vm10, %v1715_v56 }
 0x84b   :  { %v1886_v58 = vpop.f32.mrb[48].mxu0 }
 0x84c   :  { %v5704_v59 = vpop.f32.mrb[49].mxu0 }
 0x84f   :  { %v1718_v57 = vld [vmem:[#allocation3 + $0x8] sm:$0xff] }
 0x850   :  { %5692 = vmatmul.mubr.msk.f32.vlgmr.msra.gmra.mrb[32].mxu1 %vm1101_vm11, %v1718_v57  ;;  %v4758_v57 = vld [vmem:[%s7733_s5 + $0x2] ss:$0 sm:$0xff] }
 0x851   :  { %6390 = vmatpush3.bf16.msra.mxu1 %v7325_v14  ;;  %5713 = vmatprep.mubr.msk.f32.mxu1 %vm6642_vm1, %v6643_v51 }
 0x852   :  { %6391 = vmatprep.subr.bf16.mxu1 %v6641_v50 }
 0x855   :  { %6393 = vmatpush3.bf16.msra.mxu1 %v7331_v40 }
 0x856   :  { %6400 = vmatprep.subr.bf16.mxu1 %v6641_v50 }
 0x923   :  { %v5693_v62 = vpop.f32.mrb[32].mxu1 }
 0x924   :  { %v1809_v63 = vadd.f32 %v5693_v62, %v4739_v61  ;;  %v1803_v0 = vpop.f32.mrb[33].mxu1 }
 0x925   :  { %v1804_v1 = vadd.f32 %v4739_v61, %v1803_v0 }
 0x926   :  { %1813 = vst.msk [vmem:[#allocation2 + $0x8] sm:$0xff] %vm1101_vm11, %v1809_v63 }
 0x927   :  { %1812 = vst.msk [vmem:[#allocation2] sm:$0xff] %vm1101_vm11, %v1804_v1 }
 0x92d   :  { %v2124_v23 = vld [vmem:[#allocation2 + $0x8] sm:$0x3]  ;;  %v2201_v21 = vld [vmem:[#allocation2 + $0xa] sm:$0x3]  ;;  %v2278_v35 = vld [vmem:[#allocation2 + $0xc] sm:$0x3] }
 0x92e   :  { %v1819_v2 = vld [vmem:[#allocation2] sm:$0x3]  ;;  %v1893_v6 = vld [vmem:[#allocation2 + $0x2] sm:$0x3]  ;;  %v1970_v11 = vld [vmem:[#allocation2 + $0x4] sm:$0x3] }
 0x92f   :  { %v1890_v4 = vadd.f32 %v1886_v58, %v1819_v2  ;;  %v2047_v17 = vld [vmem:[#allocation2 + $0x6] sm:$0x3] }
 0x931   :  { %v1891_v5 = vmax.f32 %v1890_v4, 0.0 }
 0x933   :  { %1892 = vst.msk [vmem:[#allocation3] sm:$0x3] %vm541_vm10, %v1891_v5  ;;  %5714 = vmatmul.mubr.msk.f32.vlgmr.msra.gmra.mrb[34].mxu1 %vm1101_vm11, %v1891_v5 }
 0x934   :  { %6402 = vmatpush3.bf16.msra.mxu1 %v7325_v14  ;;  %5735 = vmatprep.mubr.msk.f32.mxu1 %vm6642_vm1, %v6643_v51 }
 0x935   :  { %6403 = vmatprep.subr.bf16.mxu1 %v6641_v50 }
 0x938   :  { %6405 = vmatpush3.bf16.msra.mxu1 %v7331_v40 }
 0x939   :  { %6412 = vmatprep.subr.bf16.mxu1 %v6641_v50 }
 0xa06   :  { %v1963_v7 = vpop.f32.mrb[34].mxu1 }
 0xa07   :  { %v1967_v3 = vadd.f32 %v1963_v7, %v1893_v6  ;;  %v5715_v8 = vpop.f32.mrb[35].mxu1 }
 0xa09   :  { %v1968_v9 = vmax.f32 %v1967_v3, 0.0 }
 0xa0b   :  { %1969 = vst.msk [vmem:[#allocation3 + $0x2] sm:$0x3] %vm541_vm10, %v1968_v9  ;;  %5725 = vmatmul.mubr.msk.f32.vlgmr.msra.gmra.mrb[50].mxu0 %vm1101_vm11, %v1968_v9 }
 0xa0c   :  { %6408 = vmatpush3.bf16.msra.mxu0 %v7325_v14  ;;  %5746 = vmatprep.mubr.msk.f32.mxu0 %vm6642_vm1, %v6643_v51 }
 0xa0d   :  { %6409 = vmatprep.subr.bf16.mxu0 %v6641_v50 }
 0xa10   :  { %6411 = vmatpush3.bf16.msra.mxu0 %v7331_v40 }
 0xa11   :  { %6418 = vmatprep.subr.bf16.mxu0 %v6641_v50 }
 0xade   :  { %v2040_v12 = vpop.f32.mrb[50].mxu0 }
 0xadf   :  { %v2044_v15 = vadd.f32 %v2040_v12, %v1970_v11  ;;  %v5726_v16 = vpop.f32.mrb[51].mxu0 }
 0xae1   :  { %v2045_v13 = vmax.f32 %v2044_v15, 0.0 }
 0xae3   :  { %2046 = vst.msk [vmem:[#allocation3 + $0x4] sm:$0x3] %vm541_vm10, %v2045_v13  ;;  %5736 = vmatmul.mubr.msk.f32.vlgmr.msra.gmra.mrb[36].mxu1 %vm1101_vm11, %v2045_v13 }
 0xae4   :  { %6414 = vmatpush3.bf16.msra.mxu1 %v7325_v14  ;;  %5757 = vmatprep.mubr.msk.f32.mxu1 %vm6642_vm1, %v6643_v51 }
 0xae5   :  { %6415 = vmatprep.subr.bf16.mxu1 %v6641_v50 }
 0xae8   :  { %6417 = vmatpush3.bf16.msra.mxu1 %v7331_v40 }
 0xae9   :  { %6424 = vmatprep.subr.bf16.mxu1 %v6641_v50 }
 0xbb6   :  { %v2117_v19 = vpop.f32.mrb[36].mxu1 }
 0xbb7   :  { %v2121_v20 = vadd.f32 %v2117_v19, %v2047_v17  ;;  %v5737_v10 = vpop.f32.mrb[37].mxu1 }
 0xbb9   :  { %v2122_v22 = vmax.f32 %v2121_v20, 0.0 }
 0xbbb   :  { %2123 = vst.msk [vmem:[#allocation3 + $0x6] sm:$0x3] %vm541_vm10, %v2122_v22  ;;  %5747 = vmatmul.mubr.msk.f32.vlgmr.msra.gmra.mrb[52].mxu0 %vm1101_vm11, %v2122_v22 }
 0xbbc   :  { %6420 = vmatpush3.bf16.msra.mxu0 %v7325_v14  ;;  %5768 = vmatprep.mubr.msk.f32.mxu0 %vm6642_vm1, %v6643_v51 }
 0xbbd   :  { %6421 = vmatprep.subr.bf16.mxu0 %v6641_v50 }
 0xbc0   :  { %6423 = vmatpush3.bf16.msra.mxu0 %v7331_v40 }
 0xbc1   :  { %6431 = vmatprep.subr.bf16.mxu0 %v6430_v28 }
 0xbc2   :  { %v2432_v18 = vld [vmem:[#allocation3] sm:$0xff] }
 0xc8e   :  { %v2194_v24 = vpop.f32.mrb[52].mxu0 }
 0xc8f   :  { %v2198_v26 = vadd.f32 %v2194_v24, %v2124_v23  ;;  %v5748_v27 = vpop.f32.mrb[53].mxu0 }
 0xc91   :  { %v2199_v30 = vmax.f32 %v2198_v26, 0.0 }
 0xc93   :  { %2200 = vst.msk [vmem:[#allocation3 + $0x8] sm:$0x3] %vm541_vm10, %v2199_v30  ;;  %5758 = vmatmul.mubr.msk.f32.vlgmr.msra.gmra.mrb[38].mxu1 %vm1101_vm11, %v2199_v30 }
 0xc94   :  { %6426 = vmatpush3.bf16.msra.mxu1 %v7325_v14  ;;  %5779 = vmatprep.mubr.msk.f32.mxu1 %vm6642_vm1, %v6643_v51  ;;  %v2355_v14 = vld [vmem:[#allocation2 + $0xe] sm:$0x3] }
 0xc95   :  { %6427 = vmatprep.subr.bf16.mxu1 %v6641_v50 }
 0xc98   :  { %6429 = vmatpush3.bf16.msra.mxu1 %v7331_v40 }
 0xc99   :  { %6438 = vmatprep.subr.bf16.mxu1 %v6641_v50 }
 0xd66   :  { %v2271_v31 = vpop.f32.mrb[38].mxu1 }
 0xd67   :  { %v2275_v32 = vadd.f32 %v2271_v31, %v2201_v21  ;;  %v5759_v33 = vpop.f32.mrb[39].mxu1 }
 0xd69   :  { %v2276_v34 = vmax.f32 %v2275_v32, 0.0 }
 0xd6b   :  { %2277 = vst.msk [vmem:[#allocation3 + $0xa] sm:$0x3] %vm541_vm10, %v2276_v34  ;;  %5769 = vmatmul.mubr.msk.f32.vlgmr.msra.gmra.mrb[54].mxu0 %vm1101_vm11, %v2276_v34 }
 0xd6c   :  { %5790 = vmatprep.mubr.msk.f32.mxu0 %vm1101_vm11, %v2432_v18  ;;  %6433 = vmatpush3.bf16.msra.mxu0 %v6430_v28  ;;  %v6490_v28 = vpack.c.bf16 %v4775_v25, %v4774_v60  ;;  %v4799_v60 = vld [vmem:[%s7732_s4 + $0x80] sm:$0xff]  ;;  %v4800_v25 = vld [vmem:[%s7732_s4 + $0x88] sm:$0xff] }
 0xd6d   :  { %6435 = vmatprep.subr.bf16.mxu0 %v6434_v43  ;;  %v7622_v41 = vpack.c.bf16 %v4800_v25, %v4799_v60 }
 0xd70   :  { %6437 = vmatpush3.bf16.msra.mxu0 %v6434_v43  ;;  %v4782_v43 = vld [vmem:[%s7732_s4 + $0x70] sm:$0xff] }
 0xd71   :  { %6444 = vmatprep.subr.bf16.mxu0 %v6641_v50  ;;  %v7529_v46 = vpack.c.bf16 %v4783_v45, %v4782_v43 }
 0xe3e   :  { %v2348_v36 = vpop.f32.mrb[54].mxu0 }
 0xe3f   :  { %v2352_v37 = vadd.f32 %v2348_v36, %v2278_v35  ;;  %v5770_v38 = vpop.f32.mrb[55].mxu0 }
 0xe40   :  { %v4773_v38 = vld [vmem:[%s7731_s3 + $0x48] sm:$0xff] }
 0xe41   :  { %v2353_v39 = vmax.f32 %v2352_v37, 0.0  ;;  %v4772_v37 = vld [vmem:[%s7731_s3 + $0x40] sm:$0xff] }
 0xe43   :  { %2354 = vst.msk [vmem:[#allocation3 + $0xc] sm:$0x3] %vm541_vm10, %v2353_v39  ;;  %5780 = vmatmul.mubr.msk.f32.vlgmr.msra.gmra.mrb[40].mxu1 %vm1101_vm11, %v2353_v39  ;;  %v6486_v39 = vpack.c.bf16 %v4773_v38, %v4772_v37  ;;  %v4793_v37 = vld [vmem:[%s7731_s3 + $0x70] sm:$0xff]  ;;  %v4794_v38 = vld [vmem:[%s7731_s3 + $0x78] sm:$0xff] }
 0xe44   :  { %5801 = vmatprep.mubr.msk.f32.mxu1 %vm6642_vm1, %v6643_v51  ;;  %6440 = vmatpush3.bf16.msra.mxu1 %v7424_v47 }
 0xe45   :  { %6441 = vmatprep.subr.bf16.mxu1 %v6641_v50 }
 0xe48   :  { %6443 = vmatpush3.bf16.msra.mxu1 %v7430_v49 }
 0xe49   :  { %6450 = vmatprep.subr.bf16.mxu1 %v6641_v50 }
 0xe4b   :  { %5802 = vmatmul.mubr.f32.vlgmr.msra.gmra.mrb[42].mxu1 %v6643_v51 }
 0xe4c   :  { %6452 = vmatpush3.bf16.msra.mxu1 %v7424_v47  ;;  %5823 = vmatprep.mubr.msk.f32.mxu1 %vm6642_vm1, %v6643_v51 }
 0xe4d   :  { %6453 = vmatprep.subr.bf16.mxu1 %v6641_v50 }
 0xe50   :  { %6455 = vmatpush3.bf16.msra.mxu1 %v7430_v49 }
 0xe51   :  { %6462 = vmatprep.subr.bf16.mxu1 %v6641_v50 }
 0xf16   :  { %v2425_v29 = vpop.f32.mrb[40].mxu1 }
 0xf17   :  { %v2429_v40 = vadd.f32 %v2425_v29, %v2355_v14  ;;  %v5781_v52 = vpop.f32.mrb[41].mxu1 }
 0xf19   :  { %v2430_v53 = vmax.f32 %v2429_v40, 0.0 }
 0xf1b   :  { %2431 = vst.msk [vmem:[#allocation3 + $0xe] sm:$0x3] %vm541_vm10, %v2430_v53 }
 0xf1e   :  { %v2602_v55 = vpop.f32.mrb[42].mxu1 }
 0xf1f   :  { %v5803_v56 = vpop.f32.mrb[43].mxu1 }
 0xf22   :  { %v2433_v54 = vld [vmem:[#allocation3 + $0x8] sm:$0xff] }
 0xf23   :  { %5791 = vmatmul.mubr.msk.f32.vlgmr.msra.gmra.mrb[56].mxu0 %vm1101_vm11, %v2433_v54  ;;  %v4777_v54 = vld [vmem:[%s7733_s5 + $0x3] ss:$0 sm:$0xff] }
 0xf24   :  { %6446 = vmatpush3.bf16.msra.mxu0 %v7424_v47  ;;  %5812 = vmatprep.mubr.msk.f32.mxu0 %vm6642_vm1, %v6643_v51 }
 0xf25   :  { %6447 = vmatprep.subr.bf16.mxu0 %v6641_v50 }
 0xf28   :  { %6449 = vmatpush3.bf16.msra.mxu0 %v7430_v49 }
 0xf29   :  { %6456 = vmatprep.subr.bf16.mxu0 %v6641_v50 }
 0xff6   :  { %v5792_v58 = vpop.f32.mrb[56].mxu0 }
 0xff7   :  { %v2525_v59 = vadd.f32 %v5792_v58, %v4758_v57  ;;  %v2519_v61 = vpop.f32.mrb[57].mxu0 }
 0xff8   :  { %v2520_v62 = vadd.f32 %v4758_v57, %v2519_v61 }
 0xff9   :  { %2529 = vst.msk [vmem:[#allocation2 + $0x8] sm:$0xff] %vm1101_vm11, %v2525_v59 }
 0xffa   :  { %2528 = vst.msk [vmem:[#allocation2] sm:$0xff] %vm1101_vm11, %v2520_v62 }
0x1000   :  { %v2840_v20 = vld [vmem:[#allocation2 + $0x8] sm:$0x3]  ;;  %v2917_v26 = vld [vmem:[#allocation2 + $0xa] sm:$0x3]  ;;  %v2994_v33 = vld [vmem:[#allocation2 + $0xc] sm:$0x3] }
0x1001   :  { %v2535_v63 = vld [vmem:[#allocation2] sm:$0x3]  ;;  %v2609_v2 = vld [vmem:[#allocation2 + $0x2] sm:$0x3]  ;;  %v2686_v3 = vld [vmem:[#allocation2 + $0x4] sm:$0x3] }
0x1002   :  { %v2606_v0 = vadd.f32 %v2602_v55, %v2535_v63  ;;  %v2763_v15 = vld [vmem:[#allocation2 + $0x6] sm:$0x3] }
0x1004   :  { %v2607_v1 = vmax.f32 %v2606_v0, 0.0 }
0x1006   :  { %2608 = vst.msk [vmem:[#allocation3] sm:$0x3] %vm541_vm10, %v2607_v1  ;;  %5813 = vmatmul.mubr.msk.f32.vlgmr.msra.gmra.mrb[58].mxu0 %vm1101_vm11, %v2607_v1 }
0x1007   :  { %6458 = vmatpush3.bf16.msra.mxu0 %v7424_v47  ;;  %5834 = vmatprep.mubr.msk.f32.mxu0 %vm6642_vm1, %v6643_v51 }
0x1008   :  { %6459 = vmatprep.subr.bf16.mxu0 %v6641_v50 }
0x100b   :  { %6461 = vmatpush3.bf16.msra.mxu0 %v7430_v49 }
0x100c   :  { %6468 = vmatprep.subr.bf16.mxu0 %v6641_v50 }
0x10d9   :  { %v2679_v4 = vpop.f32.mrb[58].mxu0 }
0x10da   :  { %v2683_v5 = vadd.f32 %v2679_v4, %v2609_v2  ;;  %v5814_v6 = vpop.f32.mrb[59].mxu0 }
0x10dc   :  { %v2684_v7 = vmax.f32 %v2683_v5, 0.0 }
0x10de   :  { %2685 = vst.msk [vmem:[#allocation3 + $0x2] sm:$0x3] %vm541_vm10, %v2684_v7  ;;  %5824 = vmatmul.mubr.msk.f32.vlgmr.msra.gmra.mrb[44].mxu1 %vm1101_vm11, %v2684_v7 }
0x10df   :  { %6464 = vmatpush3.bf16.msra.mxu1 %v7424_v47  ;;  %5845 = vmatprep.mubr.msk.f32.mxu1 %vm6642_vm1, %v6643_v51 }
0x10e0   :  { %6465 = vmatprep.subr.bf16.mxu1 %v6641_v50 }
0x10e3   :  { %6467 = vmatpush3.bf16.msra.mxu1 %v7430_v49 }
0x10e4   :  { %6474 = vmatprep.subr.bf16.mxu1 %v6641_v50 }
0x11b1   :  { %v2756_v8 = vpop.f32.mrb[44].mxu1 }
0x11b2   :  { %v2760_v9 = vadd.f32 %v2756_v8, %v2686_v3  ;;  %v5825_v11 = vpop.f32.mrb[45].mxu1 }
0x11b4   :  { %v2761_v12 = vmax.f32 %v2760_v9, 0.0 }
0x11b6   :  { %2762 = vst.msk [vmem:[#allocation3 + $0x4] sm:$0x3] %vm541_vm10, %v2761_v12  ;;  %5835 = vmatmul.mubr.msk.f32.vlgmr.msra.gmra.mrb[60].mxu0 %vm1101_vm11, %v2761_v12 }
0x11b7   :  { %6470 = vmatpush3.bf16.msra.mxu0 %v7424_v47  ;;  %5856 = vmatprep.mubr.msk.f32.mxu0 %vm6642_vm1, %v6643_v51 }
0x11b8   :  { %6471 = vmatprep.subr.bf16.mxu0 %v6641_v50 }
0x11bb   :  { %6473 = vmatpush3.bf16.msra.mxu0 %v7430_v49 }
0x11bc   :  { %6480 = vmatprep.subr.bf16.mxu0 %v6641_v50 }
0x1289   :  { %v2833_v16 = vpop.f32.mrb[60].mxu0 }
0x128a   :  { %v2837_v13 = vadd.f32 %v2833_v16, %v2763_v15  ;;  %v5836_v17 = vpop.f32.mrb[61].mxu0 }
0x128c   :  { %v2838_v19 = vmax.f32 %v2837_v13, 0.0 }
0x128e   :  { %2839 = vst.msk [vmem:[#allocation3 + $0x6] sm:$0x3] %vm541_vm10, %v2838_v19  ;;  %5846 = vmatmul.mubr.msk.f32.vlgmr.msra.gmra.mrb[46].mxu1 %vm1101_vm11, %v2838_v19 }
0x128f   :  { %6476 = vmatpush3.bf16.msra.mxu1 %v7424_v47  ;;  %5867 = vmatprep.mubr.msk.f32.mxu1 %vm6642_vm1, %v6643_v51 }
0x1290   :  { %6477 = vmatprep.subr.bf16.mxu1 %v6641_v50 }
0x1293   :  { %6479 = vmatpush3.bf16.msra.mxu1 %v7430_v49 }
0x1294   :  { %6487 = vmatprep.subr.bf16.mxu1 %v6486_v39 }
0x1295   :  { %v3148_v32 = vld [vmem:[#allocation3] sm:$0xff] }
0x1361   :  { %v2910_v10 = vpop.f32.mrb[46].mxu1 }
0x1362   :  { %v2914_v22 = vadd.f32 %v2910_v10, %v2840_v20  ;;  %v5847_v23 = vpop.f32.mrb[47].mxu1 }
0x1364   :  { %v2915_v24 = vmax.f32 %v2914_v22, 0.0 }
0x1366   :  { %2916 = vst.msk [vmem:[#allocation3 + $0x8] sm:$0x3] %vm541_vm10, %v2915_v24  ;;  %5857 = vmatmul.mubr.msk.f32.vlgmr.msra.gmra.mrb[62].mxu0 %vm1101_vm11, %v2915_v24 }
0x1367   :  { %6482 = vmatpush3.bf16.msra.mxu0 %v7424_v47  ;;  %5878 = vmatprep.mubr.msk.f32.mxu0 %vm6642_vm1, %v6643_v51  ;;  %v3071_v47 = vld [vmem:[#allocation2 + $0xe] sm:$0x3] }
0x1368   :  { %6483 = vmatprep.subr.bf16.mxu0 %v6641_v50 }
0x136b   :  { %6485 = vmatpush3.bf16.msra.mxu0 %v7430_v49 }
0x136c   :  { %6494 = vmatprep.subr.bf16.mxu0 %v6641_v50 }
0x1439   :  { %v2987_v27 = vpop.f32.mrb[62].mxu0 }
0x143a   :  { %v2991_v30 = vadd.f32 %v2987_v27, %v2917_v26  ;;  %v5858_v21 = vpop.f32.mrb[63].mxu0 }
0x143c   :  { %v2992_v31 = vmax.f32 %v2991_v30, 0.0 }
0x143e   :  { %2993 = vst.msk [vmem:[#allocation3 + $0xa] sm:$0x3] %vm541_vm10, %v2992_v31  ;;  %5868 = vmatmul.mubr.msk.f32.vlgmr.msra.gmra.mrb[48].mxu1 %vm1101_vm11, %v2992_v31 }
0x143f   :  { %5889 = vmatprep.mubr.msk.f32.mxu1 %vm1101_vm11, %v3148_v32  ;;  %6489 = vmatpush3.bf16.msra.mxu1 %v6486_v39  ;;  %v6546_v39 = vpack.c.bf16 %v4794_v38, %v4793_v37 }
0x1440   :  { %6491 = vmatprep.subr.bf16.mxu1 %v6490_v28 }
0x1443   :  { %6493 = vmatpush3.bf16.msra.mxu1 %v6490_v28  ;;  %v4801_v28 = vld [vmem:[%s7732_s4 + $0x90] sm:$0xff] }
0x1444   :  { %6500 = vmatprep.subr.bf16.mxu1 %v6641_v50  ;;  %v7628_v43 = vpack.c.bf16 %v4802_v42, %v4801_v28 }
0x1511   :  { %v3064_v34 = vpop.f32.mrb[48].mxu1 }
0x1512   :  { %v3068_v18 = vadd.f32 %v3064_v34, %v2994_v33  ;;  %v5869_v35 = vpop.f32.mrb[49].mxu1 }
0x1513   :  { %v4792_v35 = vld [vmem:[%s7731_s3 + $0x68] sm:$0xff] }
0x1514   :  { %v3069_v36 = vmax.f32 %v3068_v18, 0.0  ;;  %v4791_v18 = vld [vmem:[%s7731_s3 + $0x60] sm:$0xff] }
0x1516   :  { %3070 = vst.msk [vmem:[#allocation3 + $0xc] sm:$0x3] %vm541_vm10, %v3069_v36  ;;  %5879 = vmatmul.mubr.msk.f32.vlgmr.msra.gmra.mrb[64].mxu0 %vm1101_vm11, %v3069_v36  ;;  %v6542_v36 = vpack.c.bf16 %v4792_v35, %v4791_v18 }
0x1517   :  { %5900 = vmatprep.mubr.msk.f32.mxu0 %vm6642_vm1, %v6643_v51  ;;  %6496 = vmatpush3.bf16.msra.mxu0 %v7523_v44 }
0x1518   :  { %6497 = vmatprep.subr.bf16.mxu0 %v6641_v50 }
0x151b   :  { %6499 = vmatpush3.bf16.msra.mxu0 %v7529_v46 }
0x151c   :  { %6506 = vmatprep.subr.bf16.mxu0 %v6641_v50 }
0x151e   :  { %5901 = vmatmul.mubr.f32.vlgmr.msra.gmra.mrb[66].mxu0 %v6643_v51 }
0x151f   :  { %6508 = vmatpush3.bf16.msra.mxu0 %v7523_v44  ;;  %5922 = vmatprep.mubr.msk.f32.mxu0 %vm6642_vm1, %v6643_v51 }
0x1520   :  { %6509 = vmatprep.subr.bf16.mxu0 %v6641_v50 }
0x1523   :  { %6511 = vmatpush3.bf16.msra.mxu0 %v7529_v46 }
0x1524   :  { %6518 = vmatprep.subr.bf16.mxu0 %v6641_v50 }
0x15e9   :  { %v3141_v48 = vpop.f32.mrb[64].mxu0 }
0x15ea   :  { %v3145_v49 = vadd.f32 %v3141_v48, %v3071_v47  ;;  %v5880_v14 = vpop.f32.mrb[65].mxu0 }
0x15ec   :  { %v3146_v29 = vmax.f32 %v3145_v49, 0.0 }
0x15ee   :  { %3147 = vst.msk [vmem:[#allocation3 + $0xe] sm:$0x3] %vm541_vm10, %v3146_v29 }
0x15f1   :  { %v3318_v52 = vpop.f32.mrb[66].mxu0 }
0x15f2   :  { %v5902_v53 = vpop.f32.mrb[67].mxu0 }
0x15f5   :  { %v3149_v40 = vld [vmem:[#allocation3 + $0x8] sm:$0xff] }
0x15f6   :  { %5890 = vmatmul.mubr.msk.f32.vlgmr.msra.gmra.mrb[50].mxu1 %vm1101_vm11, %v3149_v40  ;;  %v4796_v40 = vld [vmem:[%s7733_s5 + $0x4] ss:$0 sm:$0xff] }
0x15f7   :  { %6502 = vmatpush3.bf16.msra.mxu1 %v7523_v44  ;;  %5911 = vmatprep.mubr.msk.f32.mxu1 %vm6642_vm1, %v6643_v51 }
0x15f8   :  { %6503 = vmatprep.subr.bf16.mxu1 %v6641_v50 }
0x15fb   :  { %6505 = vmatpush3.bf16.msra.mxu1 %v7529_v46 }
0x15fc   :  { %6512 = vmatprep.subr.bf16.mxu1 %v6641_v50 }
0x16c9   :  { %v5891_v55 = vpop.f32.mrb[50].mxu1 }
0x16ca   :  { %v3241_v56 = vadd.f32 %v5891_v55, %v4777_v54  ;;  %v3235_v57 = vpop.f32.mrb[51].mxu1 }
0x16cb   :  { %v3236_v58 = vadd.f32 %v4777_v54, %v3235_v57 }
0x16cc   :  { %3245 = vst.msk [vmem:[#allocation2 + $0x8] sm:$0xff] %vm1101_vm11, %v3241_v56 }
0x16cd   :  { %3244 = vst.msk [vmem:[#allocation2] sm:$0xff] %vm1101_vm11, %v3236_v58 }
0x16d3   :  { %v3556_v13 = vld [vmem:[#allocation2 + $0x8] sm:$0x3]  ;;  %v3633_v22 = vld [vmem:[#allocation2 + $0xa] sm:$0x3]  ;;  %v3710_v21 = vld [vmem:[#allocation2 + $0xc] sm:$0x3] }
0x16d4   :  { %v3251_v59 = vld [vmem:[#allocation2] sm:$0x3]  ;;  %v3325_v63 = vld [vmem:[#allocation2 + $0x2] sm:$0x3]  ;;  %v3402_v5 = vld [vmem:[#allocation2 + $0x4] sm:$0x3] }
0x16d5   :  { %v3322_v61 = vadd.f32 %v3318_v52, %v3251_v59  ;;  %v3479_v9 = vld [vmem:[#allocation2 + $0x6] sm:$0x3] }
0x16d7   :  { %v3323_v62 = vmax.f32 %v3322_v61, 0.0 }
0x16d9   :  { %3324 = vst.msk [vmem:[#allocation3] sm:$0x3] %vm541_vm10, %v3323_v62  ;;  %5912 = vmatmul.mubr.msk.f32.vlgmr.msra.gmra.mrb[52].mxu1 %vm1101_vm11, %v3323_v62 }
0x16da   :  { %6514 = vmatpush3.bf16.msra.mxu1 %v7523_v44  ;;  %5933 = vmatprep.mubr.msk.f32.mxu1 %vm6642_vm1, %v6643_v51 }
0x16db   :  { %6515 = vmatprep.subr.bf16.mxu1 %v6641_v50 }
0x16de   :  { %6517 = vmatpush3.bf16.msra.mxu1 %v7529_v46 }
0x16df   :  { %6524 = vmatprep.subr.bf16.mxu1 %v6641_v50 }
0x17ac   :  { %v3395_v0 = vpop.f32.mrb[52].mxu1 }
0x17ad   :  { %v3399_v1 = vadd.f32 %v3395_v0, %v3325_v63  ;;  %v5913_v2 = vpop.f32.mrb[53].mxu1 }
0x17af   :  { %v3400_v4 = vmax.f32 %v3399_v1, 0.0 }
0x17b1   :  { %3401 = vst.msk [vmem:[#allocation3 + $0x2] sm:$0x3] %vm541_vm10, %v3400_v4  ;;  %5923 = vmatmul.mubr.msk.f32.vlgmr.msra.gmra.mrb[68].mxu0 %vm1101_vm11, %v3400_v4 }
0x17b2   :  { %6520 = vmatpush3.bf16.msra.mxu0 %v7523_v44  ;;  %5944 = vmatprep.mubr.msk.f32.mxu0 %vm6642_vm1, %v6643_v51 }
0x17b3   :  { %6521 = vmatprep.subr.bf16.mxu0 %v6641_v50 }
0x17b6   :  { %6523 = vmatpush3.bf16.msra.mxu0 %v7529_v46 }
0x17b7   :  { %6530 = vmatprep.subr.bf16.mxu0 %v6641_v50 }
0x1884   :  { %v3472_v6 = vpop.f32.mrb[68].mxu0 }
0x1885   :  { %v3476_v7 = vadd.f32 %v3472_v6, %v3402_v5  ;;  %v5924_v3 = vpop.f32.mrb[69].mxu0 }
0x1887   :  { %v3477_v8 = vmax.f32 %v3476_v7, 0.0 }
0x1889   :  { %3478 = vst.msk [vmem:[#allocation3 + $0x4] sm:$0x3] %vm541_vm10, %v3477_v8  ;;  %5934 = vmatmul.mubr.msk.f32.vlgmr.msra.gmra.mrb[54].mxu1 %vm1101_vm11, %v3477_v8 }
0x188a   :  { %6526 = vmatpush3.bf16.msra.mxu1 %v7523_v44  ;;  %5955 = vmatprep.mubr.msk.f32.mxu1 %vm6642_vm1, %v6643_v51 }
0x188b   :  { %6527 = vmatprep.subr.bf16.mxu1 %v6641_v50 }
0x188e   :  { %6529 = vmatpush3.bf16.msra.mxu1 %v7529_v46 }
0x188f   :  { %6536 = vmatprep.subr.bf16.mxu1 %v6641_v50 }
0x195c   :  { %v3549_v11 = vpop.f32.mrb[54].mxu1 }
0x195d   :  { %v3553_v12 = vadd.f32 %v3549_v11, %v3479_v9  ;;  %v5935_v15 = vpop.f32.mrb[55].mxu1 }
0x195f   :  { %v3554_v16 = vmax.f32 %v3553_v12, 0.0 }
0x1961   :  { %3555 = vst.msk [vmem:[#allocation3 + $0x6] sm:$0x3] %vm541_vm10, %v3554_v16  ;;  %5945 = vmatmul.mubr.msk.f32.vlgmr.msra.gmra.mrb[70].mxu0 %vm1101_vm11, %v3554_v16 }
0x1962   :  { %6532 = vmatpush3.bf16.msra.mxu0 %v7523_v44  ;;  %5966 = vmatprep.mubr.msk.f32.mxu0 %vm6642_vm1, %v6643_v51 }
0x1963   :  { %6533 = vmatprep.subr.bf16.mxu0 %v6641_v50 }
0x1966   :  { %6535 = vmatpush3.bf16.msra.mxu0 %v7529_v46 }
0x1967   :  { %6543 = vmatprep.subr.bf16.mxu0 %v6542_v36 }
0x1968   :  { %v3864_v30 = vld [vmem:[#allocation3] sm:$0xff] }
0x1a34   :  { %v3626_v17 = vpop.f32.mrb[70].mxu0 }
0x1a35   :  { %v3630_v19 = vadd.f32 %v3626_v17, %v3556_v13  ;;  %v5946_v20 = vpop.f32.mrb[71].mxu0 }
0x1a37   :  { %v3631_v10 = vmax.f32 %v3630_v19, 0.0 }
0x1a39   :  { %3632 = vst.msk [vmem:[#allocation3 + $0x8] sm:$0x3] %vm541_vm10, %v3631_v10  ;;  %5956 = vmatmul.mubr.msk.f32.vlgmr.msra.gmra.mrb[56].mxu1 %vm1101_vm11, %v3631_v10 }
0x1a3a   :  { %6538 = vmatpush3.bf16.msra.mxu1 %v7523_v44  ;;  %5977 = vmatprep.mubr.msk.f32.mxu1 %vm6642_vm1, %v6643_v51  ;;  %v3787_v44 = vld [vmem:[#allocation2 + $0xe] sm:$0x3] }
0x1a3b   :  { %6539 = vmatprep.subr.bf16.mxu1 %v6641_v50 }
0x1a3e   :  { %6541 = vmatpush3.bf16.msra.mxu1 %v7529_v46 }
0x1a3f   :  { %6550 = vmatprep.subr.bf16.mxu1 %v6641_v50 }
0x1b0c   :  { %v3703_v23 = vpop.f32.mrb[56].mxu1 }
0x1b0d   :  { %v3707_v24 = vadd.f32 %v3703_v23, %v3633_v22  ;;  %v5957_v26 = vpop.f32.mrb[57].mxu1 }
0x1b0e   :  { %v4581_v26 = vld [vmem:[%s7734_s6 + $0x8] sm:$0xff] }
0x1b0f   :  { %v3708_v27 = vmax.f32 %v3707_v24, 0.0  ;;  %v4580_v24 = vld [vmem:[%s7734_s6] sm:$0xff] }
0x1b11   :  { %3709 = vst.msk [vmem:[#allocation3 + $0xa] sm:$0x3] %vm541_vm10, %v3708_v27  ;;  %5967 = vmatmul.mubr.msk.f32.vlgmr.msra.gmra.mrb[72].mxu0 %vm1101_vm11, %v3708_v27  ;;  %v6599_v27 = vpack.c.bf16 %v4581_v26, %v4580_v24 }
0x1b12   :  { %5988 = vmatprep.mubr.msk.f32.mxu0 %vm1101_vm11, %v3864_v30  ;;  %6545 = vmatpush3.bf16.msra.mxu0 %v6542_v36 }
0x1b13   :  { %6547 = vmatprep.subr.bf16.mxu0 %v6546_v39 }
0x1b16   :  { %6549 = vmatpush3.bf16.msra.mxu0 %v6546_v39  ;;  %v4810_v39 = vld [vmem:[%s7735_s7] ss:$0 sm:$0xff] }
0x1b17   :  { %6556 = vmatprep.subr.bf16.mxu0 %v6641_v50 }
0x1be4   :  { %v3780_v31 = vpop.f32.mrb[72].mxu0 }
0x1be5   :  { %v3784_v32 = vadd.f32 %v3780_v31, %v3710_v21  ;;  %v5968_v33 = vpop.f32.mrb[73].mxu0 }
0x1be7   :  { %v3785_v34 = vmax.f32 %v3784_v32, 0.0 }
0x1be9   :  { %3786 = vst.msk [vmem:[#allocation3 + $0xc] sm:$0x3] %vm541_vm10, %v3785_v34  ;;  %5978 = vmatmul.mubr.msk.f32.vlgmr.msra.gmra.mrb[58].mxu1 %vm1101_vm11, %v3785_v34  ;;  %v4583_v34 = vld [vmem:[%s7734_s6 + $0x18] sm:$0xff] }
0x1bea   :  { %5999 = vmatprep.mubr.msk.f32.mxu1 %vm6642_vm1, %v6643_v51  ;;  %6552 = vmatpush3.bf16.msra.mxu1 %v7622_v41 }
0x1beb   :  { %6553 = vmatprep.subr.bf16.mxu1 %v6641_v50 }
0x1bee   :  { %6555 = vmatpush3.bf16.msra.mxu1 %v7628_v43 }
0x1bef   :  { %6562 = vmatprep.subr.bf16.mxu1 %v6641_v50 }
0x1bf1   :  { %6000 = vmatmul.mubr.f32.vlgmr.msra.gmra.mrb[60].mxu1 %v6643_v51 }
0x1bf2   :  { %6564 = vmatpush3.bf16.msra.mxu1 %v7622_v41  ;;  %6021 = vmatprep.mubr.msk.f32.mxu1 %vm6642_vm1, %v6643_v51 }
0x1bf3   :  { %6565 = vmatprep.subr.bf16.mxu1 %v6641_v50 }
0x1bf6   :  { %6567 = vmatpush3.bf16.msra.mxu1 %v7628_v43 }
0x1bf7   :  { %6574 = vmatprep.subr.bf16.mxu1 %v6641_v50 }
0x1cbc   :  { %v3857_v45 = vpop.f32.mrb[58].mxu1 }
0x1cbd   :  { %v3861_v46 = vadd.f32 %v3857_v45, %v3787_v44  ;;  %v5979_v47 = vpop.f32.mrb[59].mxu1 }
0x1cbf   :  { %v3862_v48 = vmax.f32 %v3861_v46, 0.0 }
0x1cc1   :  { %3863 = vst.msk [vmem:[#allocation3 + $0xe] sm:$0x3] %vm541_vm10, %v3862_v48 }
0x1cc4   :  { %v4034_v14 = vpop.f32.mrb[60].mxu1 }
0x1cc5   :  { %v6001_v29 = vpop.f32.mrb[61].mxu1 }
0x1cc8   :  { %v3865_v49 = vld [vmem:[#allocation3 + $0x8] sm:$0xff] }
0x1cc9   :  { %5989 = vmatmul.mubr.msk.f32.vlgmr.msra.gmra.mrb[74].mxu0 %vm1101_vm11, %v3865_v49 }
0x1cca   :  { %6558 = vmatpush3.bf16.msra.mxu0 %v7622_v41  ;;  %6010 = vmatprep.mubr.msk.f32.mxu0 %vm6642_vm1, %v6643_v51 }
0x1ccb   :  { %6559 = vmatprep.subr.bf16.mxu0 %v6641_v50 }
0x1cce   :  { %6561 = vmatpush3.bf16.msra.mxu0 %v7628_v43 }
0x1ccf   :  { %6568 = vmatprep.subr.bf16.mxu0 %v6641_v50 }
0x1d9c   :  { %v5990_v52 = vpop.f32.mrb[74].mxu0 }
0x1d9d   :  { %v3957_v53 = vadd.f32 %v5990_v52, %v4796_v40  ;;  %v3951_v54 = vpop.f32.mrb[75].mxu0 }
0x1d9e   :  { %v3952_v55 = vadd.f32 %v4796_v40, %v3951_v54 }
0x1d9f   :  { %3961 = vst.msk [vmem:[#allocation2 + $0x8] sm:$0xff] %vm1101_vm11, %v3957_v53 }
0x1da0   :  { %3960 = vst.msk [vmem:[#allocation2] sm:$0xff] %vm1101_vm11, %v3952_v55 }
0x1da6   :  { %v4272_v12 = vld [vmem:[#allocation2 + $0x8] sm:$0x3]  ;;  %v4349_v19 = vld [vmem:[#allocation2 + $0xa] sm:$0x3]  ;;  %v4426_v30 = vld [vmem:[#allocation2 + $0xc] sm:$0x3] }
0x1da7   :  { %v3967_v56 = vld [vmem:[#allocation2] sm:$0x3]  ;;  %v4041_v59 = vld [vmem:[#allocation2 + $0x2] sm:$0x3]  ;;  %v4118_v1 = vld [vmem:[#allocation2 + $0x4] sm:$0x3] }
0x1da8   :  { %v4038_v57 = vadd.f32 %v4034_v14, %v3967_v56  ;;  %v4195_v7 = vld [vmem:[#allocation2 + $0x6] sm:$0x3] }
0x1daa   :  { %v4039_v58 = vmax.f32 %v4038_v57, 0.0 }
0x1dac   :  { %4040 = vst.msk [vmem:[#allocation3] sm:$0x3] %vm541_vm10, %v4039_v58  ;;  %6011 = vmatmul.mubr.msk.f32.vlgmr.msra.gmra.mrb[76].mxu0 %vm1101_vm11, %v4039_v58 }
0x1dad   :  { %6570 = vmatpush3.bf16.msra.mxu0 %v7622_v41  ;;  %6032 = vmatprep.mubr.msk.f32.mxu0 %vm6642_vm1, %v6643_v51 }
0x1dae   :  { %6571 = vmatprep.subr.bf16.mxu0 %v6641_v50 }
0x1db1   :  { %6573 = vmatpush3.bf16.msra.mxu0 %v7628_v43 }
0x1db2   :  { %6580 = vmatprep.subr.bf16.mxu0 %v6641_v50 }
0x1e7f   :  { %v4111_v61 = vpop.f32.mrb[76].mxu0 }
0x1e80   :  { %v4115_v62 = vadd.f32 %v4111_v61, %v4041_v59  ;;  %v6012_v63 = vpop.f32.mrb[77].mxu0 }
0x1e82   :  { %v4116_v0 = vmax.f32 %v4115_v62, 0.0 }
0x1e84   :  { %4117 = vst.msk [vmem:[#allocation3 + $0x2] sm:$0x3] %vm541_vm10, %v4116_v0  ;;  %6022 = vmatmul.mubr.msk.f32.vlgmr.msra.gmra.mrb[62].mxu1 %vm1101_vm11, %v4116_v0 }
0x1e85   :  { %6576 = vmatpush3.bf16.msra.mxu1 %v7622_v41  ;;  %6043 = vmatprep.mubr.msk.f32.mxu1 %vm6642_vm1, %v6643_v51 }
0x1e86   :  { %6577 = vmatprep.subr.bf16.mxu1 %v6641_v50 }
0x1e89   :  { %6579 = vmatpush3.bf16.msra.mxu1 %v7628_v43 }
0x1e8a   :  { %6586 = vmatprep.subr.bf16.mxu1 %v6641_v50 }
0x1f57   :  { %v4188_v2 = vpop.f32.mrb[62].mxu1 }
0x1f58   :  { %v4192_v4 = vadd.f32 %v4188_v2, %v4118_v1  ;;  %v6023_v5 = vpop.f32.mrb[63].mxu1 }
0x1f5a   :  { %v4193_v6 = vmax.f32 %v4192_v4, 0.0 }
0x1f5c   :  { %4194 = vst.msk [vmem:[#allocation3 + $0x4] sm:$0x3] %vm541_vm10, %v4193_v6  ;;  %6033 = vmatmul.mubr.msk.f32.vlgmr.msra.gmra.mrb[78].mxu0 %vm1101_vm11, %v4193_v6 }
0x1f5d   :  { %6582 = vmatpush3.bf16.msra.mxu0 %v7622_v41  ;;  %6054 = vmatprep.mubr.msk.f32.mxu0 %vm6642_vm1, %v6643_v51 }
0x1f5e   :  { %6583 = vmatprep.subr.bf16.mxu0 %v6641_v50 }
0x1f61   :  { %6585 = vmatpush3.bf16.msra.mxu0 %v7628_v43 }
0x1f62   :  { %6592 = vmatprep.subr.bf16.mxu0 %v6641_v50 }
0x202f   :  { %v4265_v3 = vpop.f32.mrb[78].mxu0 }
0x2030   :  { %v4269_v8 = vadd.f32 %v4265_v3, %v4195_v7  ;;  %v6034_v9 = vpop.f32.mrb[79].mxu0 }
0x2032   :  { %v4270_v11 = vmax.f32 %v4269_v8, 0.0 }
0x2034   :  { %4271 = vst.msk [vmem:[#allocation3 + $0x6] sm:$0x3] %vm541_vm10, %v4270_v11  ;;  %6044 = vmatmul.mubr.msk.f32.vlgmr.msra.gmra.mrb[64].mxu1 %vm1101_vm11, %v4270_v11 }
0x2035   :  { %6588 = vmatpush3.bf16.msra.mxu1 %v7622_v41  ;;  %6065 = vmatprep.mubr.msk.f32.mxu1 %vm6642_vm1, %v6643_v51 }
0x2036   :  { %6589 = vmatprep.subr.bf16.mxu1 %v6641_v50 }
0x2039   :  { %6591 = vmatpush3.bf16.msra.mxu1 %v7628_v43 }
0x203a   :  { %6598 = vmatprep.subr.bf16.mxu1 %v6641_v50 }
0x2107   :  { %v4342_v15 = vpop.f32.mrb[64].mxu1 }
0x2108   :  { %v4346_v16 = vadd.f32 %v4342_v15, %v4272_v12  ;;  %v6045_v13 = vpop.f32.mrb[65].mxu1 }
0x210a   :  { %v4347_v17 = vmax.f32 %v4346_v16, 0.0 }
0x210c   :  { %4348 = vst.msk [vmem:[#allocation3 + $0x8] sm:$0x3] %vm541_vm10, %v4347_v17  ;;  %6055 = vmatmul.mubr.msk.f32.vlgmr.msra.gmra.mrb[80].mxu0 %vm1101_vm11, %v4347_v17 }
0x210d   :  { %6594 = vmatpush3.bf16.msra.mxu0 %v7622_v41  ;;  %6076 = vmatprep.mubr.msk.f32.mxu0 %vm6642_vm1, %v6643_v51 }
0x210e   :  { %6595 = vmatprep.subr.bf16.mxu0 %v6641_v50 }
0x2111   :  { %6597 = vmatpush3.bf16.msra.mxu0 %v7628_v43 }
0x21df   :  { %v4419_v20 = vpop.f32.mrb[80].mxu0 }
0x21e0   :  { %v4423_v10 = vadd.f32 %v4419_v20, %v4349_v19  ;;  %v6056_v22 = vpop.f32.mrb[81].mxu0 }
0x21e2   :  { %v4424_v23 = vmax.f32 %v4423_v10, 0.0 }
0x21e4   :  { %4425 = vst.msk [vmem:[#allocation3 + $0xa] sm:$0x3] %vm541_vm10, %v4424_v23  ;;  %6066 = vmatmul.mubr.msk.f32.vlgmr.msra.gmra.mrb[66].mxu1 %vm1101_vm11, %v4424_v23 }
0x21e5   :  { %6087 = vmatprep.mubr.msk.f32.mxu1 %vm6642_vm1, %v6643_v51  ;;  %6600 = vmatpush3.bf16.msra.mxu1 %v6599_v27  ;;  %v4582_v51 = vld [vmem:[%s7734_s6 + $0x10] sm:$0xff]  ;;  %s6645_s6 = smov [#allocation4]  }
0x21e6   :  { %6601 = vmatprep.subr.bf16.mxu1 %v6641_v50  ;;  %v6602_v18 = vpack.c.bf16 %v4583_v34, %v4582_v51  ;;  %v4503_v50 = vld [vmem:[#allocation2 + $0xe] sm:$0x3]  ;;  %s4683_s24 = sshll.u32 %s6645_s6, 4  ;;  %s4684_s24 = int_to_ptr.vmem [resolvable:$true] %s4683_s24 }
0x21e7   :  { %s6616_s7 = scalar_lea.vmem %s4684_s24, 32  ;;  %p6621_p1 = scmp.lt.s32.totalorder %s4684_s24, %s4684_s24 }
0x21e8   :  { %p6617_p0 = scmp.ne.s32.totalorder %s4684_s24, %s6616_s7  ;;  %p6622_p2 = scmp.lt.s32.totalorder %s6616_s7, %s6616_s7 }
0x21e9   :  { %6603 = vmatpush3.bf16.msra.mxu1 %v6602_v18 }
0x21ea   :  { %p6623_p3 = por %p6622_p2, %p6621_p1 }
0x21ec   :  { %p6624_p4 = pnand %p6623_p3, %p6617_p0 }
0x22b7   :  { %v4496_v21 = vpop.f32.mrb[66].mxu1 }
0x22b8   :  { %v4500_v31 = vadd.f32 %v4496_v21, %v4426_v30  ;;  %v6067_v32 = vpop.f32.mrb[67].mxu1 }
0x22ba   :  { %v4501_v33 = vmax.f32 %v4500_v31, 0.0 }
0x22bc   :  { %4502 = vst.msk [vmem:[#allocation3 + $0xc] sm:$0x3] %vm541_vm10, %v4501_v33  ;;  %6077 = vmatmul.mubr.msk.f32.vlgmr.msra.gmra.mrb[82].mxu0 %vm1101_vm11, %v4501_v33 }
0x238f   :  { %v4573_v35 = vpop.f32.mrb[82].mxu0 }
0x2390   :  { %v4577_v36 = vadd.f32 %v4573_v35, %v4503_v50  ;;  %v6078_v37 = vpop.f32.mrb[83].mxu0 }
0x2392   :  { %v4578_v38 = vmax.f32 %v4577_v36, 0.0 }
0x2394   :  { %4579 = vst.msk [vmem:[#allocation3 + $0xe] sm:$0x3] %vm541_vm10, %v4578_v38  ;;  %6088 = vmatmul.mubr.msk.f32.vlgmr.msra.gmra.mrb[68].mxu1 %vm1101_vm11, %v4578_v38 }
0x2467   :  { %v4660_v60 = vpop.f32.mrb[68].mxu1 }
0x2468   :  { %v4661_v25 = vadd.f32 %v4810_v39, %v4660_v60  ;;  %v6089_v28 = vpop.f32.mrb[69].mxu1 }
0x246a   :  { %v4665_v41 = vsel %vm4664_vm12, %v4661_v25, -inf }
0x246b   :  { %4666 = vmax.xlane.f32.xlu0 %v4665_v41 }
0x24f8   :  { %v4667_v42 = vpop.xlane.xlu0 %4666 }
0x24f9   :  { %v4668_v43 = vsub.f32 %v4661_v25, %v4667_v42 }
0x24fb   :  { %v4669_v44 = vmul.f32 1.442695, %v4668_v43 }
0x24fd   :  { %6612 = vpow2.f32 %v4669_v44 }
0x2507   :  { %v6613_v45 = vpop.eup %6612 }
0x2508   :  { %v4671_v46 = vsel %vm4664_vm12, %v6613_v45, 0.0 }
0x2509   :  { %4672 = vadd.xlane.f32.xlu1 %v4671_v46 }
0x2596   :  { %v4673_v47 = vpop.xlane.xlu1 %4672 }
0x2597   :  { %6614 = vrcp.f32 %v4673_v47 }
0x25a1   :  { %v6615_v48 = vpop.eup %6614 }
0x25a2   :  { %v4675_v49 = vmul.f32 %v6615_v48, %v6613_v45 }
0x25a4   :  { %4676 = vst [vmem:[#allocation4] sm:$0x3] %v4675_v49 }
0x25a5   :  { %6627 = shalt.err (!%p6624_p4)
}
0x25a6   :  { %s6628_s27 = scalar_lea.hbm %s7736_s8, 32 }
0x25a7   :  { %p6629_p5 = scmp.ne.s32.totalorder %s7736_s8, %s6628_s27  ;;  %p6632_p6 = scmp.lt.u32.totalorder %s6628_s27, %s7736_s8 }
0x25a9   :  { %p6634_p7 = pnand %p6632_p6, %p6629_p5 }
0x25ab   :  { %6637 = shalt.err (!%p6634_p7)
}
0x25ac   :  { %4686 = dma.vmem_to_hbm [thread:$0]  %s4684_s24, 32, %s7736_s8, [#allocation5]  }
0x25ad   :  { %6638 = dma.done.wait [#allocation5], 32  }
0x25ae   :  { %6639 = vsyncadd [#allocation5], 4294967264 }
0x25af   :  { %4690 = vsyncpa [#allocation5], 1 }

</bundles_post_ra>
